<compile_context>
chip_gen: v5e
topology: v5e:2x2
jax: 0.10.0
libtpu: 0.0.40
codegen_flags: <defaults>
</compile_context>

<pallas_src>
import functools
import math

import jax
import jax.numpy as jnp
from jax.experimental import pallas as pl
from jax.experimental.pallas import tpu as pltpu


def _layer_norm(x, g, b, eps=1e-5):
    mu = jnp.mean(x, axis=-1, keepdims=True)
    var = jnp.mean((x - mu) ** 2, axis=-1, keepdims=True)
    return (x - mu) * jax.lax.rsqrt(var + eps) * g + b


# Row indices inside the packed per-layer parameter tensor (padded to 16 rows).
_BQ, _BK, _BV, _BO, _LN1G, _LN1B, _LN2G, _LN2B, _B2 = range(9)
_PVEC_ROWS = 16


def _fused_encoder_kernel(src_ref, pos_ref, bias_ref,
                          wqk_ref, wv_ref, wo_ref, w1_ref, w2_ref,
                          pvec_ref, b1_ref, fnp_ref,
                          out_ref, x_scr, *,
                          n_heads, q_tile, k_tile, apply_final_norm):
    layer = pl.program_id(1)
    n_layers = pl.num_programs(1)
    is_last = layer == n_layers - 1

    Bb, S, D = x_scr.shape
    H = n_heads
    hd = D // H

    # Layer 0: load this batch block's activations into the resident scratch.
    @pl.when(layer == 0)
    def _():
        x_scr[...] = src_ref[...].astype(jnp.float32)

    # Hoisted per-layer parameter reads (weights already streamed into VMEM).
    pv = pvec_ref[0]                       # (16, D) packed f32 vectors
    wqk_w = wqk_ref[0]                     # (D, 2D) bf16
    wv_w = wv_ref[0]                       # (D, D)  bf16
    wo_w = wo_ref[0]                       # (D, D)  bf16
    w1_w = w1_ref[0]                       # (D, FF) bf16
    w2_w = w2_ref[0]                       # (FF, D) bf16
    b1 = b1_ref[0]                         # (1, FF) f32

    x = x_scr[...].reshape(Bb * S, D)      # (Bb*S, D) f32, layer-input snapshot
    pos = pos_ref[...].astype(jnp.float32).reshape(Bb * S, D)

    # ---- fused Q/K projection (1/sqrt(hd) folded into Wq/bq host-side), V ----
    qk_in = (x + pos).astype(jnp.bfloat16)
    qk = jnp.dot(qk_in, wqk_w, preferred_element_type=jnp.float32)      # (Bb*S, 2D)
    q = (qk[:, :D] + pv[_BQ:_BQ + 1]).astype(jnp.bfloat16)
    k = (qk[:, D:] + pv[_BK:_BK + 1]).astype(jnp.bfloat16)
    v = (jnp.dot(x.astype(jnp.bfloat16), wv_w, preferred_element_type=jnp.float32)
         + pv[_BV:_BV + 1]).astype(jnp.bfloat16)

    contract_last = (((1,), (1,)), ((), ()))   # q_tile . k_tile^T (contract hd)

    # Static tile loops: batch element -> Q-row tile -> head -> KV tile.
    for b in range(Bb):
        bias_b = bias_ref[b]               # (1, S) additive key-padding bias (f32)
        base = b * S
        for q0 in range(0, S, q_tile):
            tq = min(q_tile, S - q0)
            r0, r1 = base + q0, base + q0 + tq
            q_t = q[r0:r1]                 # (tq, D) bf16

            # ---- flash-style online softmax over key tiles, per head ----
            ctx_parts = []
            for h in range(H):
                c0, c1 = h * hd, (h + 1) * hd
                qh = q_t[:, c0:c1]         # (tq, hd) bf16 lane slice (no copy/stack)
                m_i = jnp.full((tq, 1), -1e30, jnp.float32)
                l_i = jnp.zeros((tq, 1), jnp.float32)
                acc = jnp.zeros((tq, hd), jnp.float32)
                for k0 in range(0, S, k_tile):
                    tk = min(k_tile, S - k0)
                    kh = k[base + k0:base + k0 + tk, c0:c1]     # (tk, hd) bf16
                    vh = v[base + k0:base + k0 + tk, c0:c1]     # (tk, hd) bf16
                    s = jax.lax.dot_general(qh, kh, contract_last,
                                            preferred_element_type=jnp.float32)
                    s = s + bias_b[:, k0:k0 + tk]               # (tq, tk) f32
                    m_new = jnp.maximum(m_i, jnp.max(s, axis=-1, keepdims=True))
                    alpha = jnp.exp(m_i - m_new)
                    p = jnp.exp(s - m_new)
                    l_i = alpha * l_i + jnp.sum(p, axis=-1, keepdims=True)
                    acc = alpha * acc + jnp.dot(p.astype(jnp.bfloat16), vh,
                                                preferred_element_type=jnp.float32)
                    m_i = m_new
                ctx_parts.append(acc * (1.0 / l_i))
            ctx = jnp.concatenate(ctx_parts, axis=-1).astype(jnp.bfloat16)   # (tq, D)

            # ---- output projection: one K=D matmul over the concatenated heads ----
            attn = (jnp.dot(ctx, wo_w, preferred_element_type=jnp.float32)
                    + pv[_BO:_BO + 1])                                        # (tq, D)

            # ---- residual + norm1, row-tiled FFN, residual + norm2 ----
            x_t = x[r0:r1]
            x1 = _layer_norm(x_t + attn, pv[_LN1G:_LN1G + 1], pv[_LN1B:_LN1B + 1])
            h1 = jnp.maximum(
                jnp.dot(x1.astype(jnp.bfloat16), w1_w,
                        preferred_element_type=jnp.float32) + b1, 0.0)        # (tq, FF)
            h2 = jnp.dot(h1.astype(jnp.bfloat16), w2_w,
                         preferred_element_type=jnp.float32) + pv[_B2:_B2 + 1]
            y = _layer_norm(x1 + h2, pv[_LN2G:_LN2G + 1], pv[_LN2B:_LN2B + 1])

            x_scr[b, q0:q0 + tq, :] = y    # update resident activations

            # Epilogue: only the last layer writes the HBM output (final LN fused).
            @pl.when(is_last)
            def _():
                out = y
                if apply_final_norm:
                    fnp = fnp_ref[...]
                    out = _layer_norm(out, fnp[0:1], fnp[1:2])
                out_ref[b, q0:q0 + tq, :] = out.astype(out_ref.dtype)


def _pick_batch_block(B, max_blk=4):
    """Largest divisor of B that is <= max_blk (weight-DMA amortization)."""
    for cand in range(min(B, max_blk), 0, -1):
        if B % cand == 0:
            return cand
    return 1


def transformer_encoder_forward(src, src_key_padding_mask, pos, layer_params,
                                norm_params=None, *, n_heads):
    """Matches TransformerEncoder.forward(src, src_key_padding_mask, pos)."""
    B, S, D = src.shape
    L = len(layer_params)
    FF = layer_params[0]["w1"].shape[1]
    hd = D // n_heads
    scale = 1.0 / math.sqrt(hd)

    bblk = _pick_batch_block(B)
    n_bblk = B // bblk

    # Precompute the additive key-padding bias: padded key -> -1e9.
    key_mask = src_key_padding_mask.astype(jnp.bool_)
    bias = jnp.where(key_mask, jnp.float32(-1e9),
                     jnp.float32(0.0)).reshape(B, 1, S)

    def stack(name):
        return jnp.stack([p[name] for p in layer_params], axis=0)

    # Matmul weights in bf16 (f32 accumulation happens in-kernel).
    # 1/sqrt(hd) is folded into the Q half of wqk and into bq (host-side, free).
    wqk = jnp.concatenate([stack("wq") * scale, stack("wk")],
                          axis=-1).astype(jnp.bfloat16)                      # (L,D,2D)
    wv = stack("wv").astype(jnp.bfloat16)                                    # (L,D,D)
    wo = stack("wo").astype(jnp.bfloat16)                                    # (L,D,D)
    w1 = stack("w1").astype(jnp.bfloat16)                                    # (L,D,FF)
    w2 = stack("w2").astype(jnp.bfloat16)                                    # (L,FF,D)
    b1 = stack("b1").astype(jnp.float32)                                     # (L,1,FF)

    # Pack all D-wide per-layer vectors into one (L, 16, D) f32 tensor (one DMA).
    pvec = jnp.concatenate(
        [stack("bq") * scale, stack("bk"), stack("bv"), stack("bo"),
         stack("ln1_g"), stack("ln1_b"), stack("ln2_g"), stack("ln2_b"),
         stack("b2"),
         jnp.zeros((L, _PVEC_ROWS - 9, D), jnp.float32)],
        axis=1).astype(jnp.float32)

    apply_final_norm = norm_params is not None
    if apply_final_norm:
        fnp = jnp.concatenate([norm_params["g"], norm_params["b"]],
                              axis=0).astype(jnp.float32)                    # (2, D)
    else:
        fnp = jnp.zeros((2, D), jnp.float32)

    pos_bf16 = pos.astype(jnp.bfloat16)   # pos is only ever added then cast to bf16

    # Generation-aware VMEM budget and tile sizes (64 MiB parts get the tighter
    # budget / smaller KV tile; 128 MiB parts get ~96 MiB and a larger KV tile).
    try:
        vmem_cap = int(pltpu.get_tpu_info().vmem_capacity_bytes)
        if vmem_cap <= 0:
            vmem_cap = 64 * 1024 * 1024
    except Exception:
        vmem_cap = 64 * 1024 * 1024
    vmem_limit = max(32 * 1024 * 1024,
                     min(vmem_cap * 3 // 4, 100 * 1024 * 1024))
    k_tile = min(S, 256 if vmem_cap <= 64 * 1024 * 1024 else 512)
    q_tile = min(S, 256)

    in_specs = [
        pl.BlockSpec((bblk, S, D), lambda b, l: (b, 0, 0)),                  # src
        pl.BlockSpec((bblk, S, D), lambda b, l: (b, 0, 0)),                  # pos (bf16)
        pl.BlockSpec((bblk, 1, S), lambda b, l: (b, 0, 0)),                  # mask bias
        pl.BlockSpec((1, D, 2 * D), lambda b, l: (l, 0, 0)),                 # wqk
        pl.BlockSpec((1, D, D), lambda b, l: (l, 0, 0)),                     # wv
        pl.BlockSpec((1, D, D), lambda b, l: (l, 0, 0)),                     # wo
        pl.BlockSpec((1, D, FF), lambda b, l: (l, 0, 0)),                    # w1
        pl.BlockSpec((1, FF, D), lambda b, l: (l, 0, 0)),                    # w2
        pl.BlockSpec((1, _PVEC_ROWS, D), lambda b, l: (l, 0, 0)),            # packed vecs
        pl.BlockSpec((1, 1, FF), lambda b, l: (l, 0, 0)),                    # b1
        pl.BlockSpec((2, D), lambda b, l: (0, 0)),                           # final norm
    ]

    # Advisory cost estimate so XLA schedules around the long fused custom call.
    matmul_flops = L * B * (2 * S * D * (2 * D)        # fused QK projection
                            + 2 * S * D * D            # V projection
                            + 4 * S * S * D            # scores + PV
                            + 2 * S * D * D            # output projection
                            + 4 * S * D * FF)          # FFN
    weight_bytes = sum(int(a.size) * a.dtype.itemsize
                       for a in (wqk, wv, wo, w1, w2, pvec, b1))
    bytes_accessed = (int(src.size) * 4 + int(pos_bf16.size) * 2
                      + int(bias.size) * 4 + int(fnp.size) * 4
                      + n_bblk * weight_bytes + B * S * D * 4)
    cost = pl.CostEstimate(flops=int(matmul_flops),
                           transcendentals=int(L * B * n_heads * S * S),
                           bytes_accessed=int(bytes_accessed))

    kernel = functools.partial(_fused_encoder_kernel, n_heads=n_heads,
                               q_tile=q_tile, k_tile=k_tile,
                               apply_final_norm=apply_final_norm)
    return pl.pallas_call(
        kernel,
        out_shape=jax.ShapeDtypeStruct((B, S, D), jnp.float32),
        grid_spec=pltpu.PrefetchScalarGridSpec(
            num_scalar_prefetch=0,
            grid=(n_bblk, L),
            in_specs=in_specs,
            out_specs=pl.BlockSpec((bblk, S, D), lambda b, l: (b, 0, 0)),
            scratch_shapes=[pltpu.VMEM((bblk, S, D), jnp.float32)],
        ),
        compiler_params=pltpu.CompilerParams(
            dimension_semantics=("parallel", "arbitrary"),
            vmem_limit_bytes=int(vmem_limit),
        ),
        cost_estimate=cost,
    )(src, pos_bf16, bias, wqk, wv, wo, w1, w2, pvec, b1, fnp)


def init_layer_params(key, d_model, dim_feedforward):
    ks = jax.random.split(key, 6)

    def lin_w(k, fan_in, shape):
        return jax.random.normal(k, shape, jnp.float32) / math.sqrt(fan_in)

    return {
        "wq": lin_w(ks[0], d_model, (d_model, d_model)),
        "bq": jnp.zeros((1, d_model), jnp.float32),
        "wk": lin_w(ks[1], d_model, (d_model, d_model)),
        "bk": jnp.zeros((1, d_model), jnp.float32),
        "wv": lin_w(ks[2], d_model, (d_model, d_model)),
        "bv": jnp.zeros((1, d_model), jnp.float32),
        "wo": lin_w(ks[3], d_model, (d_model, d_model)),
        "bo": jnp.zeros((1, d_model), jnp.float32),
        "ln1_g": jnp.ones((1, d_model), jnp.float32),
        "ln1_b": jnp.zeros((1, d_model), jnp.float32),
        "ln2_g": jnp.ones((1, d_model), jnp.float32),
        "ln2_b": jnp.zeros((1, d_model), jnp.float32),
        "w1": lin_w(ks[4], d_model, (d_model, dim_feedforward)),
        "b1": jnp.zeros((1, dim_feedforward), jnp.float32),
        "w2": lin_w(ks[5], dim_feedforward, (dim_feedforward, d_model)),
        "b2": jnp.zeros((1, d_model), jnp.float32),
    }


if __name__ == "__main__":
    B, S, D, H, FF, NUM_LAYERS = 2, 16, 32, 4, 64, 2

    key = jax.random.PRNGKey(0)
    k_src, k_pos, k_params = jax.random.split(key, 3)

    src = jax.random.normal(k_src, (B, S, D), jnp.float32)
    pos = jax.random.normal(k_pos, (B, S, D), jnp.float32)
    # key padding mask: True => padded token (last 3 tokens of batch element 1)
    src_key_padding_mask = jnp.zeros((B, S), jnp.bool_).at[1, -3:].set(True)

    layer_keys = jax.random.split(k_params, NUM_LAYERS)
    layer_params = [init_layer_params(k, D, FF) for k in layer_keys]
    norm_params = {"g": jnp.ones((1, D), jnp.float32),
                   "b": jnp.zeros((1, D), jnp.float32)}

    out = transformer_encoder_forward(src, src_key_padding_mask, pos,
                                      layer_params, norm_params, n_heads=H)
    jax.block_until_ready(out)
    assert out.shape == (B, S, D)
    assert bool(jnp.all(jnp.isfinite(out)))
    print("KERNEL_OK")
</pallas_src>

<mosaic_0001>
module attributes {stable_mosaic.version = 11 : i64} {
  func.func @_fused_encoder_kernel(%arg0: i32, %arg1: i32, %arg2: memref<2x16x32xf32, #tpu.memory_space<vmem>>, %arg3: memref<2x16x32xbf16, #tpu.memory_space<vmem>>, %arg4: memref<2x1x16xf32, #tpu.memory_space<vmem>>, %arg5: memref<1x32x64xbf16, #tpu.memory_space<vmem>>, %arg6: memref<1x32x32xbf16, #tpu.memory_space<vmem>>, %arg7: memref<1x32x32xbf16, #tpu.memory_space<vmem>>, %arg8: memref<1x32x64xbf16, #tpu.memory_space<vmem>>, %arg9: memref<1x64x32xbf16, #tpu.memory_space<vmem>>, %arg10: memref<1x16x32xf32, #tpu.memory_space<vmem>>, %arg11: memref<1x1x64xf32, #tpu.memory_space<vmem>>, %arg12: memref<2x32xf32, #tpu.memory_space<vmem>>, %arg13: memref<2x16x32xf32, #tpu.memory_space<vmem>>, %arg14: memref<2x16x32xf32, #tpu.memory_space<vmem>>) attributes {dimension_semantics = [#tpu.dimension_semantics<parallel>, #tpu.dimension_semantics<arbitrary>], iteration_bounds = array<i64: 1, 2>, scalar_prefetch = 0 : i64, scratch_operands = 1 : i64, tpu.core_type = #tpu.core_type<tc>, window_params = [{transform_indices = @transform_0, window_bounds = array<i64: 2, 16, 32>}, {transform_indices = @transform_1, window_bounds = array<i64: 2, 16, 32>}, {transform_indices = @transform_2, window_bounds = array<i64: 2, 1, 16>}, {transform_indices = @transform_3, window_bounds = array<i64: 1, 32, 64>}, {transform_indices = @transform_4, window_bounds = array<i64: 1, 32, 32>}, {transform_indices = @transform_5, window_bounds = array<i64: 1, 32, 32>}, {transform_indices = @transform_6, window_bounds = array<i64: 1, 32, 64>}, {transform_indices = @transform_7, window_bounds = array<i64: 1, 64, 32>}, {transform_indices = @transform_8, window_bounds = array<i64: 1, 16, 32>}, {transform_indices = @transform_9, window_bounds = array<i64: 1, 1, 64>}, {pipeline_mode = #tpu.pipeline_mode<synchronous>, transform_indices = @transform_10, window_bounds = array<i64: 2, 32>}, {transform_indices = @transform_11, window_bounds = array<i64: 2, 16, 32>}]} {
    %c1_i32 = arith.constant 1 : i32
    %0 = arith.cmpi eq, %arg1, %c1_i32 : i32
    %c0_i32 = arith.constant 0 : i32
    %1 = arith.cmpi eq, %arg1, %c0_i32 : i32
    %2 = arith.extui %1 : i1 to i32
    %c0_i32_0 = arith.constant 0 : i32
    %3 = arith.cmpi ne, %2, %c0_i32_0 : i32
    scf.if %3 {
      %c0_133 = arith.constant 0 : index
      %c0_134 = arith.constant 0 : index
      %c0_135 = arith.constant 0 : index
      %434 = vector.load %arg2[%c0_133, %c0_134, %c0_135] : memref<2x16x32xf32, #tpu.memory_space<vmem>>, vector<2x16x32xf32>
      %c0_136 = arith.constant 0 : index
      %c0_137 = arith.constant 0 : index
      %c0_138 = arith.constant 0 : index
      %435 = vector.load %arg14[%c0_136, %c0_137, %c0_138] : memref<2x16x32xf32, #tpu.memory_space<vmem>>, vector<2x16x32xf32>
      tpu.vector_store %arg14[%c0_136, %c0_137, %c0_138], %434 {strides = array<i32>} : memref<2x16x32xf32, #tpu.memory_space<vmem>>, vector<2x16x32xf32>,
    } else {
    }
    %c0 = arith.constant 0 : index
    %c0_1 = arith.constant 0 : index
    %c0_2 = arith.constant 0 : index
    %4 = vector.load %arg10[%c0, %c0_1, %c0_2] : memref<1x16x32xf32, #tpu.memory_space<vmem>>, vector<1x16x32xf32>
    %5 = vector.shape_cast %4 : vector<1x16x32xf32> to vector<16x32xf32>
    %c0_3 = arith.constant 0 : index
    %c0_4 = arith.constant 0 : index
    %c0_5 = arith.constant 0 : index
    %6 = vector.load %arg5[%c0_3, %c0_4, %c0_5] : memref<1x32x64xbf16, #tpu.memory_space<vmem>>, vector<1x32x64xbf16>
    %7 = vector.shape_cast %6 : vector<1x32x64xbf16> to vector<32x64xbf16>
    %c0_6 = arith.constant 0 : index
    %c0_7 = arith.constant 0 : index
    %c0_8 = arith.constant 0 : index
    %8 = vector.load %arg6[%c0_6, %c0_7, %c0_8] : memref<1x32x32xbf16, #tpu.memory_space<vmem>>, vector<1x32x32xbf16>
    %9 = vector.shape_cast %8 : vector<1x32x32xbf16> to vector<32x32xbf16>
    %c0_9 = arith.constant 0 : index
    %c0_10 = arith.constant 0 : index
    %c0_11 = arith.constant 0 : index
    %10 = vector.load %arg7[%c0_9, %c0_10, %c0_11] : memref<1x32x32xbf16, #tpu.memory_space<vmem>>, vector<1x32x32xbf16>
    %11 = vector.shape_cast %10 : vector<1x32x32xbf16> to vector<32x32xbf16>
    %c0_12 = arith.constant 0 : index
    %c0_13 = arith.constant 0 : index
    %c0_14 = arith.constant 0 : index
    %12 = vector.load %arg8[%c0_12, %c0_13, %c0_14] : memref<1x32x64xbf16, #tpu.memory_space<vmem>>, vector<1x32x64xbf16>
    %13 = vector.shape_cast %12 : vector<1x32x64xbf16> to vector<32x64xbf16>
    %c0_15 = arith.constant 0 : index
    %c0_16 = arith.constant 0 : index
    %c0_17 = arith.constant 0 : index
    %14 = vector.load %arg9[%c0_15, %c0_16, %c0_17] : memref<1x64x32xbf16, #tpu.memory_space<vmem>>, vector<1x64x32xbf16>
    %15 = vector.shape_cast %14 : vector<1x64x32xbf16> to vector<64x32xbf16>
    %c0_18 = arith.constant 0 : index
    %c0_19 = arith.constant 0 : index
    %c0_20 = arith.constant 0 : index
    %16 = vector.load %arg11[%c0_18, %c0_19, %c0_20] : memref<1x1x64xf32, #tpu.memory_space<vmem>>, vector<1x1x64xf32>
    %17 = vector.shape_cast %16 : vector<1x1x64xf32> to vector<1x64xf32>
    %c0_21 = arith.constant 0 : index
    %c0_22 = arith.constant 0 : index
    %c0_23 = arith.constant 0 : index
    %18 = vector.load %arg14[%c0_21, %c0_22, %c0_23] : memref<2x16x32xf32, #tpu.memory_space<vmem>>, vector<2x16x32xf32>
    %19 = vector.shape_cast %18 : vector<2x16x32xf32> to vector<32x32xf32>
    %c0_24 = arith.constant 0 : index
    %c0_25 = arith.constant 0 : index
    %c0_26 = arith.constant 0 : index
    %20 = vector.load %arg3[%c0_24, %c0_25, %c0_26] : memref<2x16x32xbf16, #tpu.memory_space<vmem>>, vector<2x16x32xbf16>
    %21 = arith.extf %20 : vector<2x16x32xbf16> to vector<2x16x32xf32>
    %22 = vector.shape_cast %21 : vector<2x16x32xf32> to vector<32x32xf32>
    %23 = arith.addf %19, %22 : vector<32x32xf32>
    %24 = arith.truncf %23 : vector<32x32xf32> to vector<32x32xbf16>
    %cst = arith.constant dense<0.000000e+00> : vector<32x64xf32>
    %25 = tpu.matmul %24, %7, %cst {dimension_numbers = #tpu.dot_dimension_numbers<[1], [0], [0], [1], [0, 0, 1, 1], [], []>} : vector<32x32xbf16>, vector<32x64xbf16>, vector<32x64xf32> -> vector<32x64xf32>
    %26 = vector.extract_strided_slice %25 {offsets = [0, 0], sizes = [32, 32], strides = [1, 1]} : vector<32x64xf32> to vector<32x32xf32>
    %27 = vector.extract_strided_slice %5 {offsets = [0, 0], sizes = [1, 32], strides = [1, 1]} : vector<16x32xf32> to vector<1x32xf32>
    %28 = vector.broadcast %27 : vector<1x32xf32> to vector<32x32xf32>
    %29 = arith.addf %26, %28 : vector<32x32xf32>
    %30 = arith.truncf %29 : vector<32x32xf32> to vector<32x32xbf16>
    %31 = vector.extract_strided_slice %25 {offsets = [0, 32], sizes = [32, 32], strides = [1, 1]} : vector<32x64xf32> to vector<32x32xf32>
    %32 = vector.extract_strided_slice %5 {offsets = [1, 0], sizes = [1, 32], strides = [1, 1]} : vector<16x32xf32> to vector<1x32xf32>
    %33 = vector.broadcast %32 : vector<1x32xf32> to vector<32x32xf32>
    %34 = arith.addf %31, %33 : vector<32x32xf32>
    %35 = arith.truncf %34 : vector<32x32xf32> to vector<32x32xbf16>
    %36 = arith.truncf %19 : vector<32x32xf32> to vector<32x32xbf16>
    %cst_27 = arith.constant dense<0.000000e+00> : vector<32x32xf32>
    %37 = tpu.matmul %36, %9, %cst_27 {dimension_numbers = #tpu.dot_dimension_numbers<[1], [0], [0], [1], [0, 0, 1, 1], [], []>} : vector<32x32xbf16>, vector<32x32xbf16>, vector<32x32xf32> -> vector<32x32xf32>
    %38 = vector.extract_strided_slice %5 {offsets = [2, 0], sizes = [1, 32], strides = [1, 1]} : vector<16x32xf32> to vector<1x32xf32>
    %39 = vector.broadcast %38 : vector<1x32xf32> to vector<32x32xf32>
    %40 = arith.addf %37, %39 : vector<32x32xf32>
    %41 = arith.truncf %40 : vector<32x32xf32> to vector<32x32xbf16>
    %c0_28 = arith.constant 0 : index
    %c0_29 = arith.constant 0 : index
    %c0_30 = arith.constant 0 : index
    %42 = vector.load %arg4[%c0_28, %c0_29, %c0_30] : memref<2x1x16xf32, #tpu.memory_space<vmem>>, vector<1x1x16xf32>
    %43 = vector.shape_cast %42 : vector<1x1x16xf32> to vector<1x16xf32>
    %44 = vector.extract_strided_slice %30 {offsets = [0, 0], sizes = [16, 32], strides = [1, 1]} : vector<32x32xbf16> to vector<16x32xbf16>
    %45 = vector.extract_strided_slice %44 {offsets = [0, 0], sizes = [16, 8], strides = [1, 1]} : vector<16x32xbf16> to vector<16x8xbf16>
    %cst_31 = arith.constant -1.000000e+30 : f32
    %46 = vector.broadcast %cst_31 : f32 to vector<16x1xf32>
    %cst_32 = arith.constant 0.000000e+00 : f32
    %47 = vector.broadcast %cst_32 : f32 to vector<16x1xf32>
    %cst_33 = arith.constant 0.000000e+00 : f32
    %48 = vector.broadcast %cst_33 : f32 to vector<16x8xf32>
    %49 = vector.extract_strided_slice %35 {offsets = [0, 0], sizes = [16, 8], strides = [1, 1]} : vector<32x32xbf16> to vector<16x8xbf16>
    %50 = vector.extract_strided_slice %41 {offsets = [0, 0], sizes = [16, 8], strides = [1, 1]} : vector<32x32xbf16> to vector<16x8xbf16>
    %cst_34 = arith.constant dense<0.000000e+00> : vector<16x16xf32>
    %51 = tpu.matmul %45, %49, %cst_34 {dimension_numbers = #tpu.dot_dimension_numbers<[1], [1], [0], [0], [0, 0, 1, 0], [], []>} : vector<16x8xbf16>, vector<16x8xbf16>, vector<16x16xf32> -> vector<16x16xf32>
    %52 = vector.broadcast %43 : vector<1x16xf32> to vector<16x16xf32>
    %53 = arith.addf %51, %52 : vector<16x16xf32>
    %cst_35 = arith.constant dense<0xFF800000> : vector<16xf32>
    %54 = vector.multi_reduction <maximumf>, %53, %cst_35 [1] : vector<16x16xf32> to vector<16xf32>
    %55 = vector.shape_cast %54 : vector<16xf32> to vector<16x1xf32>
    %56 = arith.maximumf %46, %55 : vector<16x1xf32>
    %57 = arith.subf %46, %56 : vector<16x1xf32>
    %58 = math.exp %57 : vector<16x1xf32>
    %59 = vector.broadcast %56 : vector<16x1xf32> to vector<16x16xf32>
    %60 = arith.subf %53, %59 : vector<16x16xf32>
    %61 = math.exp %60 : vector<16x16xf32>
    %62 = arith.mulf %58, %47 : vector<16x1xf32>
    %cst_36 = arith.constant dense<0.000000e+00> : vector<16xf32>
    %63 = vector.multi_reduction <add>, %61, %cst_36 [1] : vector<16x16xf32> to vector<16xf32>
    %64 = vector.shape_cast %63 : vector<16xf32> to vector<16x1xf32>
    %65 = arith.addf %62, %64 : vector<16x1xf32>
    %66 = vector.broadcast %58 : vector<16x1xf32> to vector<16x8xf32>
    %67 = arith.mulf %66, %48 : vector<16x8xf32>
    %68 = arith.truncf %61 : vector<16x16xf32> to vector<16x16xbf16>
    %cst_37 = arith.constant dense<0.000000e+00> : vector<16x8xf32>
    %69 = tpu.matmul %68, %50, %cst_37 {dimension_numbers = #tpu.dot_dimension_numbers<[1], [0], [0], [1], [0, 0, 1, 1], [], []>} : vector<16x16xbf16>, vector<16x8xbf16>, vector<16x8xf32> -> vector<16x8xf32>
    %70 = arith.addf %67, %69 : vector<16x8xf32>
    %cst_38 = arith.constant 1.000000e+00 : f32
    %71 = vector.broadcast %cst_38 : f32 to vector<16x1xf32>
    %72 = arith.divf %71, %65 : vector<16x1xf32>
    %73 = vector.broadcast %72 : vector<16x1xf32> to vector<16x8xf32>
    %74 = arith.mulf %70, %73 : vector<16x8xf32>
    %75 = vector.extract_strided_slice %44 {offsets = [0, 8], sizes = [16, 8], strides = [1, 1]} : vector<16x32xbf16> to vector<16x8xbf16>
    %cst_39 = arith.constant -1.000000e+30 : f32
    %76 = vector.broadcast %cst_39 : f32 to vector<16x1xf32>
    %cst_40 = arith.constant 0.000000e+00 : f32
    %77 = vector.broadcast %cst_40 : f32 to vector<16x1xf32>
    %cst_41 = arith.constant 0.000000e+00 : f32
    %78 = vector.broadcast %cst_41 : f32 to vector<16x8xf32>
    %79 = vector.extract_strided_slice %35 {offsets = [0, 8], sizes = [16, 8], strides = [1, 1]} : vector<32x32xbf16> to vector<16x8xbf16>
    %80 = vector.extract_strided_slice %41 {offsets = [0, 8], sizes = [16, 8], strides = [1, 1]} : vector<32x32xbf16> to vector<16x8xbf16>
    %cst_42 = arith.constant dense<0.000000e+00> : vector<16x16xf32>
    %81 = tpu.matmul %75, %79, %cst_42 {dimension_numbers = #tpu.dot_dimension_numbers<[1], [1], [0], [0], [0, 0, 1, 0], [], []>} : vector<16x8xbf16>, vector<16x8xbf16>, vector<16x16xf32> -> vector<16x16xf32>
    %82 = vector.broadcast %43 : vector<1x16xf32> to vector<16x16xf32>
    %83 = arith.addf %81, %82 : vector<16x16xf32>
    %cst_43 = arith.constant dense<0xFF800000> : vector<16xf32>
    %84 = vector.multi_reduction <maximumf>, %83, %cst_43 [1] : vector<16x16xf32> to vector<16xf32>
    %85 = vector.shape_cast %84 : vector<16xf32> to vector<16x1xf32>
    %86 = arith.maximumf %76, %85 : vector<16x1xf32>
    %87 = arith.subf %76, %86 : vector<16x1xf32>
    %88 = math.exp %87 : vector<16x1xf32>
    %89 = vector.broadcast %86 : vector<16x1xf32> to vector<16x16xf32>
    %90 = arith.subf %83, %89 : vector<16x16xf32>
    %91 = math.exp %90 : vector<16x16xf32>
    %92 = arith.mulf %88, %77 : vector<16x1xf32>
    %cst_44 = arith.constant dense<0.000000e+00> : vector<16xf32>
    %93 = vector.multi_reduction <add>, %91, %cst_44 [1] : vector<16x16xf32> to vector<16xf32>
    %94 = vector.shape_cast %93 : vector<16xf32> to vector<16x1xf32>
    %95 = arith.addf %92, %94 : vector<16x1xf32>
    %96 = vector.broadcast %88 : vector<16x1xf32> to vector<16x8xf32>
    %97 = arith.mulf %96, %78 : vector<16x8xf32>
    %98 = arith.truncf %91 : vector<16x16xf32> to vector<16x16xbf16>
    %cst_45 = arith.constant dense<0.000000e+00> : vector<16x8xf32>
    %99 = tpu.matmul %98, %80, %cst_45 {dimension_numbers = #tpu.dot_dimension_numbers<[1], [0], [0], [1], [0, 0, 1, 1], [], []>} : vector<16x16xbf16>, vector<16x8xbf16>, vector<16x8xf32> -> vector<16x8xf32>
    %100 = arith.addf %97, %99 : vector<16x8xf32>
    %cst_46 = arith.constant 1.000000e+00 : f32
    %101 = vector.broadcast %cst_46 : f32 to vector<16x1xf32>
    %102 = arith.divf %101, %95 : vector<16x1xf32>
    %103 = vector.broadcast %102 : vector<16x1xf32> to vector<16x8xf32>
    %104 = arith.mulf %100, %103 : vector<16x8xf32>
    %105 = vector.extract_strided_slice %44 {offsets = [0, 16], sizes = [16, 8], strides = [1, 1]} : vector<16x32xbf16> to vector<16x8xbf16>
    %cst_47 = arith.constant -1.000000e+30 : f32
    %106 = vector.broadcast %cst_47 : f32 to vector<16x1xf32>
    %cst_48 = arith.constant 0.000000e+00 : f32
    %107 = vector.broadcast %cst_48 : f32 to vector<16x1xf32>
    %cst_49 = arith.constant 0.000000e+00 : f32
    %108 = vector.broadcast %cst_49 : f32 to vector<16x8xf32>
    %109 = vector.extract_strided_slice %35 {offsets = [0, 16], sizes = [16, 8], strides = [1, 1]} : vector<32x32xbf16> to vector<16x8xbf16>
    %110 = vector.extract_strided_slice %41 {offsets = [0, 16], sizes = [16, 8], strides = [1, 1]} : vector<32x32xbf16> to vector<16x8xbf16>
    %cst_50 = arith.constant dense<0.000000e+00> : vector<16x16xf32>
    %111 = tpu.matmul %105, %109, %cst_50 {dimension_numbers = #tpu.dot_dimension_numbers<[1], [1], [0], [0], [0, 0, 1, 0], [], []>} : vector<16x8xbf16>, vector<16x8xbf16>, vector<16x16xf32> -> vector<16x16xf32>
    %112 = vector.broadcast %43 : vector<1x16xf32> to vector<16x16xf32>
    %113 = arith.addf %111, %112 : vector<16x16xf32>
    %cst_51 = arith.constant dense<0xFF800000> : vector<16xf32>
    %114 = vector.multi_reduction <maximumf>, %113, %cst_51 [1] : vector<16x16xf32> to vector<16xf32>
    %115 = vector.shape_cast %114 : vector<16xf32> to vector<16x1xf32>
    %116 = arith.maximumf %106, %115 : vector<16x1xf32>
    %117 = arith.subf %106, %116 : vector<16x1xf32>
    %118 = math.exp %117 : vector<16x1xf32>
    %119 = vector.broadcast %116 : vector<16x1xf32> to vector<16x16xf32>
    %120 = arith.subf %113, %119 : vector<16x16xf32>
    %121 = math.exp %120 : vector<16x16xf32>
    %122 = arith.mulf %118, %107 : vector<16x1xf32>
    %cst_52 = arith.constant dense<0.000000e+00> : vector<16xf32>
    %123 = vector.multi_reduction <add>, %121, %cst_52 [1] : vector<16x16xf32> to vector<16xf32>
    %124 = vector.shape_cast %123 : vector<16xf32> to vector<16x1xf32>
    %125 = arith.addf %122, %124 : vector<16x1xf32>
    %126 = vector.broadcast %118 : vector<16x1xf32> to vector<16x8xf32>
    %127 = arith.mulf %126, %108 : vector<16x8xf32>
    %128 = arith.truncf %121 : vector<16x16xf32> to vector<16x16xbf16>
    %cst_53 = arith.constant dense<0.000000e+00> : vector<16x8xf32>
    %129 = tpu.matmul %128, %110, %cst_53 {dimension_numbers = #tpu.dot_dimension_numbers<[1], [0], [0], [1], [0, 0, 1, 1], [], []>} : vector<16x16xbf16>, vector<16x8xbf16>, vector<16x8xf32> -> vector<16x8xf32>
    %130 = arith.addf %127, %129 : vector<16x8xf32>
    %cst_54 = arith.constant 1.000000e+00 : f32
    %131 = vector.broadcast %cst_54 : f32 to vector<16x1xf32>
    %132 = arith.divf %131, %125 : vector<16x1xf32>
    %133 = vector.broadcast %132 : vector<16x1xf32> to vector<16x8xf32>
    %134 = arith.mulf %130, %133 : vector<16x8xf32>
    %135 = vector.extract_strided_slice %44 {offsets = [0, 24], sizes = [16, 8], strides = [1, 1]} : vector<16x32xbf16> to vector<16x8xbf16>
    %cst_55 = arith.constant -1.000000e+30 : f32
    %136 = vector.broadcast %cst_55 : f32 to vector<16x1xf32>
    %cst_56 = arith.constant 0.000000e+00 : f32
    %137 = vector.broadcast %cst_56 : f32 to vector<16x1xf32>
    %cst_57 = arith.constant 0.000000e+00 : f32
    %138 = vector.broadcast %cst_57 : f32 to vector<16x8xf32>
    %139 = vector.extract_strided_slice %35 {offsets = [0, 24], sizes = [16, 8], strides = [1, 1]} : vector<32x32xbf16> to vector<16x8xbf16>
    %140 = vector.extract_strided_slice %41 {offsets = [0, 24], sizes = [16, 8], strides = [1, 1]} : vector<32x32xbf16> to vector<16x8xbf16>
    %cst_58 = arith.constant dense<0.000000e+00> : vector<16x16xf32>
    %141 = tpu.matmul %135, %139, %cst_58 {dimension_numbers = #tpu.dot_dimension_numbers<[1], [1], [0], [0], [0, 0, 1, 0], [], []>} : vector<16x8xbf16>, vector<16x8xbf16>, vector<16x16xf32> -> vector<16x16xf32>
    %142 = vector.broadcast %43 : vector<1x16xf32> to vector<16x16xf32>
    %143 = arith.addf %141, %142 : vector<16x16xf32>
    %cst_59 = arith.constant dense<0xFF800000> : vector<16xf32>
    %144 = vector.multi_reduction <maximumf>, %143, %cst_59 [1] : vector<16x16xf32> to vector<16xf32>
    %145 = vector.shape_cast %144 : vector<16xf32> to vector<16x1xf32>
    %146 = arith.maximumf %136, %145 : vector<16x1xf32>
    %147 = arith.subf %136, %146 : vector<16x1xf32>
    %148 = math.exp %147 : vector<16x1xf32>
    %149 = vector.broadcast %146 : vector<16x1xf32> to vector<16x16xf32>
    %150 = arith.subf %143, %149 : vector<16x16xf32>
    %151 = math.exp %150 : vector<16x16xf32>
    %152 = arith.mulf %148, %137 : vector<16x1xf32>
    %cst_60 = arith.constant dense<0.000000e+00> : vector<16xf32>
    %153 = vector.multi_reduction <add>, %151, %cst_60 [1] : vector<16x16xf32> to vector<16xf32>
    %154 = vector.shape_cast %153 : vector<16xf32> to vector<16x1xf32>
    %155 = arith.addf %152, %154 : vector<16x1xf32>
    %156 = vector.broadcast %148 : vector<16x1xf32> to vector<16x8xf32>
    %157 = arith.mulf %156, %138 : vector<16x8xf32>
    %158 = arith.truncf %151 : vector<16x16xf32> to vector<16x16xbf16>
    %cst_61 = arith.constant dense<0.000000e+00> : vector<16x8xf32>
    %159 = tpu.matmul %158, %140, %cst_61 {dimension_numbers = #tpu.dot_dimension_numbers<[1], [0], [0], [1], [0, 0, 1, 1], [], []>} : vector<16x16xbf16>, vector<16x8xbf16>, vector<16x8xf32> -> vector<16x8xf32>
    %160 = arith.addf %157, %159 : vector<16x8xf32>
    %cst_62 = arith.constant 1.000000e+00 : f32
    %161 = vector.broadcast %cst_62 : f32 to vector<16x1xf32>
    %162 = arith.divf %161, %155 : vector<16x1xf32>
    %163 = vector.broadcast %162 : vector<16x1xf32> to vector<16x8xf32>
    %164 = arith.mulf %160, %163 : vector<16x8xf32>
    %165 = tpu.concatenate %74, %104, %134, %164 in 1 : vector<16x8xf32>, vector<16x8xf32>, vector<16x8xf32>, vector<16x8xf32> -> vector<16x32xf32>
    %166 = arith.truncf %165 : vector<16x32xf32> to vector<16x32xbf16>
    %cst_63 = arith.constant dense<0.000000e+00> : vector<16x32xf32>
    %167 = tpu.matmul %166, %11, %cst_63 {dimension_numbers = #tpu.dot_dimension_numbers<[1], [0], [0], [1], [0, 0, 1, 1], [], []>} : vector<16x32xbf16>, vector<32x32xbf16>, vector<16x32xf32> -> vector<16x32xf32>
    %168 = vector.extract_strided_slice %5 {offsets = [3, 0], sizes = [1, 32], strides = [1, 1]} : vector<16x32xf32> to vector<1x32xf32>
    %169 = vector.broadcast %168 : vector<1x32xf32> to vector<16x32xf32>
    %170 = arith.addf %167, %169 : vector<16x32xf32>
    %171 = vector.extract_strided_slice %19 {offsets = [0, 0], sizes = [16, 32], strides = [1, 1]} : vector<32x32xf32> to vector<16x32xf32>
    %172 = arith.addf %171, %170 : vector<16x32xf32>
    %173 = vector.extract_strided_slice %5 {offsets = [4, 0], sizes = [1, 32], strides = [1, 1]} : vector<16x32xf32> to vector<1x32xf32>
    %174 = vector.extract_strided_slice %5 {offsets = [5, 0], sizes = [1, 32], strides = [1, 1]} : vector<16x32xf32> to vector<1x32xf32>
    %cst_64 = arith.constant dense<0.000000e+00> : vector<16xf32>
    %175 = vector.multi_reduction <add>, %172, %cst_64 [1] : vector<16x32xf32> to vector<16xf32>
    %176 = vector.shape_cast %175 : vector<16xf32> to vector<16x1xf32>
    %cst_65 = arith.constant 3.200000e+01 : f32
    %177 = vector.broadcast %cst_65 : f32 to vector<16x1xf32>
    %178 = arith.divf %176, %177 : vector<16x1xf32>
    %179 = vector.broadcast %178 : vector<16x1xf32> to vector<16x32xf32>
    %180 = arith.subf %172, %179 : vector<16x32xf32>
    %181 = arith.mulf %180, %180 : vector<16x32xf32>
    %cst_66 = arith.constant dense<0.000000e+00> : vector<16xf32>
    %182 = vector.multi_reduction <add>, %181, %cst_66 [1] : vector<16x32xf32> to vector<16xf32>
    %183 = vector.shape_cast %182 : vector<16xf32> to vector<16x1xf32>
    %cst_67 = arith.constant 3.200000e+01 : f32
    %184 = vector.broadcast %cst_67 : f32 to vector<16x1xf32>
    %185 = arith.divf %183, %184 : vector<16x1xf32>
    %186 = vector.broadcast %178 : vector<16x1xf32> to vector<16x32xf32>
    %187 = arith.subf %172, %186 : vector<16x32xf32>
    %cst_68 = arith.constant 9.99999974E-6 : f32
    %188 = vector.broadcast %cst_68 : f32 to vector<16x1xf32>
    %189 = arith.addf %185, %188 : vector<16x1xf32>
    %190 = math.rsqrt %189 : vector<16x1xf32>
    %191 = vector.broadcast %190 : vector<16x1xf32> to vector<16x32xf32>
    %192 = arith.mulf %187, %191 : vector<16x32xf32>
    %193 = vector.broadcast %173 : vector<1x32xf32> to vector<16x32xf32>
    %194 = arith.mulf %192, %193 : vector<16x32xf32>
    %195 = vector.broadcast %174 : vector<1x32xf32> to vector<16x32xf32>
    %196 = arith.addf %194, %195 : vector<16x32xf32>
    %197 = arith.truncf %196 : vector<16x32xf32> to vector<16x32xbf16>
    %cst_69 = arith.constant dense<0.000000e+00> : vector<16x64xf32>
    %198 = tpu.matmul %197, %13, %cst_69 {dimension_numbers = #tpu.dot_dimension_numbers<[1], [0], [0], [1], [0, 0, 1, 1], [], []>} : vector<16x32xbf16>, vector<32x64xbf16>, vector<16x64xf32> -> vector<16x64xf32>
    %199 = vector.broadcast %17 : vector<1x64xf32> to vector<16x64xf32>
    %200 = arith.addf %198, %199 : vector<16x64xf32>
    %cst_70 = arith.constant 0.000000e+00 : f32
    %201 = vector.broadcast %cst_70 : f32 to vector<16x64xf32>
    %202 = arith.maximumf %200, %201 : vector<16x64xf32>
    %203 = arith.truncf %202 : vector<16x64xf32> to vector<16x64xbf16>
    %cst_71 = arith.constant dense<0.000000e+00> : vector<16x32xf32>
    %204 = tpu.matmul %203, %15, %cst_71 {dimension_numbers = #tpu.dot_dimension_numbers<[1], [0], [0], [1], [0, 0, 1, 1], [], []>} : vector<16x64xbf16>, vector<64x32xbf16>, vector<16x32xf32> -> vector<16x32xf32>
    %205 = vector.extract_strided_slice %5 {offsets = [8, 0], sizes = [1, 32], strides = [1, 1]} : vector<16x32xf32> to vector<1x32xf32>
    %206 = vector.broadcast %205 : vector<1x32xf32> to vector<16x32xf32>
    %207 = arith.addf %204, %206 : vector<16x32xf32>
    %208 = arith.addf %196, %207 : vector<16x32xf32>
    %209 = vector.extract_strided_slice %5 {offsets = [6, 0], sizes = [1, 32], strides = [1, 1]} : vector<16x32xf32> to vector<1x32xf32>
    %210 = vector.extract_strided_slice %5 {offsets = [7, 0], sizes = [1, 32], strides = [1, 1]} : vector<16x32xf32> to vector<1x32xf32>
    %cst_72 = arith.constant dense<0.000000e+00> : vector<16xf32>
    %211 = vector.multi_reduction <add>, %208, %cst_72 [1] : vector<16x32xf32> to vector<16xf32>
    %212 = vector.shape_cast %211 : vector<16xf32> to vector<16x1xf32>
    %cst_73 = arith.constant 3.200000e+01 : f32
    %213 = vector.broadcast %cst_73 : f32 to vector<16x1xf32>
    %214 = arith.divf %212, %213 : vector<16x1xf32>
    %215 = vector.broadcast %214 : vector<16x1xf32> to vector<16x32xf32>
    %216 = arith.subf %208, %215 : vector<16x32xf32>
    %217 = arith.mulf %216, %216 : vector<16x32xf32>
    %cst_74 = arith.constant dense<0.000000e+00> : vector<16xf32>
    %218 = vector.multi_reduction <add>, %217, %cst_74 [1] : vector<16x32xf32> to vector<16xf32>
    %219 = vector.shape_cast %218 : vector<16xf32> to vector<16x1xf32>
    %cst_75 = arith.constant 3.200000e+01 : f32
    %220 = vector.broadcast %cst_75 : f32 to vector<16x1xf32>
    %221 = arith.divf %219, %220 : vector<16x1xf32>
    %222 = vector.broadcast %214 : vector<16x1xf32> to vector<16x32xf32>
    %223 = arith.subf %208, %222 : vector<16x32xf32>
    %cst_76 = arith.constant 9.99999974E-6 : f32
    %224 = vector.broadcast %cst_76 : f32 to vector<16x1xf32>
    %225 = arith.addf %221, %224 : vector<16x1xf32>
    %226 = math.rsqrt %225 : vector<16x1xf32>
    %227 = vector.broadcast %226 : vector<16x1xf32> to vector<16x32xf32>
    %228 = arith.mulf %223, %227 : vector<16x32xf32>
    %229 = vector.broadcast %209 : vector<1x32xf32> to vector<16x32xf32>
    %230 = arith.mulf %228, %229 : vector<16x32xf32>
    %231 = vector.broadcast %210 : vector<1x32xf32> to vector<16x32xf32>
    %232 = arith.addf %230, %231 : vector<16x32xf32>
    %c0_77 = arith.constant 0 : index
    %c0_78 = arith.constant 0 : index
    %c0_79 = arith.constant 0 : index
    %233 = vector.load %arg14[%c0_77, %c0_78, %c0_79] : memref<2x16x32xf32, #tpu.memory_space<vmem>>, vector<1x16x32xf32>
    %234 = vector.shape_cast %233 : vector<1x16x32xf32> to vector<16x32xf32>
    %235 = vector.shape_cast %232 : vector<16x32xf32> to vector<1x16x32xf32>
    tpu.vector_store %arg14[%c0_77, %c0_78, %c0_79], %235 {strides = array<i32>} : memref<2x16x32xf32, #tpu.memory_space<vmem>>, vector<1x16x32xf32>,
    %236 = arith.extui %0 : i1 to i32
    %c0_i32_80 = arith.constant 0 : i32
    %237 = arith.cmpi ne, %236, %c0_i32_80 : i32
    scf.if %237 {
      %c0_133 = arith.constant 0 : index
      %c0_134 = arith.constant 0 : index
      %434 = vector.load %arg12[%c0_133, %c0_134] : memref<2x32xf32, #tpu.memory_space<vmem>>, vector<2x32xf32>
      %435 = vector.extract_strided_slice %434 {offsets = [0, 0], sizes = [1, 32], strides = [1, 1]} : vector<2x32xf32> to vector<1x32xf32>
      %436 = vector.extract_strided_slice %434 {offsets = [1, 0], sizes = [1, 32], strides = [1, 1]} : vector<2x32xf32> to vector<1x32xf32>
      %cst_135 = arith.constant dense<0.000000e+00> : vector<16xf32>
      %437 = vector.multi_reduction <add>, %232, %cst_135 [1] : vector<16x32xf32> to vector<16xf32>
      %438 = vector.shape_cast %437 : vector<16xf32> to vector<16x1xf32>
      %cst_136 = arith.constant 3.200000e+01 : f32
      %439 = vector.broadcast %cst_136 : f32 to vector<16x1xf32>
      %440 = arith.divf %438, %439 : vector<16x1xf32>
      %441 = vector.broadcast %440 : vector<16x1xf32> to vector<16x32xf32>
      %442 = arith.subf %232, %441 : vector<16x32xf32>
      %443 = arith.mulf %442, %442 : vector<16x32xf32>
      %cst_137 = arith.constant dense<0.000000e+00> : vector<16xf32>
      %444 = vector.multi_reduction <add>, %443, %cst_137 [1] : vector<16x32xf32> to vector<16xf32>
      %445 = vector.shape_cast %444 : vector<16xf32> to vector<16x1xf32>
      %cst_138 = arith.constant 3.200000e+01 : f32
      %446 = vector.broadcast %cst_138 : f32 to vector<16x1xf32>
      %447 = arith.divf %445, %446 : vector<16x1xf32>
      %448 = vector.broadcast %440 : vector<16x1xf32> to vector<16x32xf32>
      %449 = arith.subf %232, %448 : vector<16x32xf32>
      %cst_139 = arith.constant 9.99999974E-6 : f32
      %450 = vector.broadcast %cst_139 : f32 to vector<16x1xf32>
      %451 = arith.addf %447, %450 : vector<16x1xf32>
      %452 = math.rsqrt %451 : vector<16x1xf32>
      %453 = vector.broadcast %452 : vector<16x1xf32> to vector<16x32xf32>
      %454 = arith.mulf %449, %453 : vector<16x32xf32>
      %455 = vector.broadcast %435 : vector<1x32xf32> to vector<16x32xf32>
      %456 = arith.mulf %454, %455 : vector<16x32xf32>
      %457 = vector.broadcast %436 : vector<1x32xf32> to vector<16x32xf32>
      %458 = arith.addf %456, %457 : vector<16x32xf32>
      %c0_140 = arith.constant 0 : index
      %c0_141 = arith.constant 0 : index
      %c0_142 = arith.constant 0 : index
      %459 = vector.load %arg13[%c0_140, %c0_141, %c0_142] : memref<2x16x32xf32, #tpu.memory_space<vmem>>, vector<1x16x32xf32>
      %460 = vector.shape_cast %459 : vector<1x16x32xf32> to vector<16x32xf32>
      %461 = vector.shape_cast %458 : vector<16x32xf32> to vector<1x16x32xf32>
      tpu.vector_store %arg13[%c0_140, %c0_141, %c0_142], %461 {strides = array<i32>} : memref<2x16x32xf32, #tpu.memory_space<vmem>>, vector<1x16x32xf32>,
    } else {
    }
    %c1 = arith.constant 1 : index
    %c0_81 = arith.constant 0 : index
    %c0_82 = arith.constant 0 : index
    %238 = vector.load %arg4[%c1, %c0_81, %c0_82] : memref<2x1x16xf32, #tpu.memory_space<vmem>>, vector<1x1x16xf32>
    %239 = vector.shape_cast %238 : vector<1x1x16xf32> to vector<1x16xf32>
    %240 = vector.extract_strided_slice %30 {offsets = [16, 0], sizes = [16, 32], strides = [1, 1]} : vector<32x32xbf16> to vector<16x32xbf16>
    %241 = vector.extract_strided_slice %240 {offsets = [0, 0], sizes = [16, 8], strides = [1, 1]} : vector<16x32xbf16> to vector<16x8xbf16>
    %cst_83 = arith.constant -1.000000e+30 : f32
    %242 = vector.broadcast %cst_83 : f32 to vector<16x1xf32>
    %cst_84 = arith.constant 0.000000e+00 : f32
    %243 = vector.broadcast %cst_84 : f32 to vector<16x1xf32>
    %cst_85 = arith.constant 0.000000e+00 : f32
    %244 = vector.broadcast %cst_85 : f32 to vector<16x8xf32>
    %245 = vector.extract_strided_slice %35 {offsets = [16, 0], sizes = [16, 8], strides = [1, 1]} : vector<32x32xbf16> to vector<16x8xbf16>
    %246 = vector.extract_strided_slice %41 {offsets = [16, 0], sizes = [16, 8], strides = [1, 1]} : vector<32x32xbf16> to vector<16x8xbf16>
    %cst_86 = arith.constant dense<0.000000e+00> : vector<16x16xf32>
    %247 = tpu.matmul %241, %245, %cst_86 {dimension_numbers = #tpu.dot_dimension_numbers<[1], [1], [0], [0], [0, 0, 1, 0], [], []>} : vector<16x8xbf16>, vector<16x8xbf16>, vector<16x16xf32> -> vector<16x16xf32>
    %248 = vector.broadcast %239 : vector<1x16xf32> to vector<16x16xf32>
    %249 = arith.addf %247, %248 : vector<16x16xf32>
    %cst_87 = arith.constant dense<0xFF800000> : vector<16xf32>
    %250 = vector.multi_reduction <maximumf>, %249, %cst_87 [1] : vector<16x16xf32> to vector<16xf32>
    %251 = vector.shape_cast %250 : vector<16xf32> to vector<16x1xf32>
    %252 = arith.maximumf %242, %251 : vector<16x1xf32>
    %253 = arith.subf %242, %252 : vector<16x1xf32>
    %254 = math.exp %253 : vector<16x1xf32>
    %255 = vector.broadcast %252 : vector<16x1xf32> to vector<16x16xf32>
    %256 = arith.subf %249, %255 : vector<16x16xf32>
    %257 = math.exp %256 : vector<16x16xf32>
    %258 = arith.mulf %254, %243 : vector<16x1xf32>
    %cst_88 = arith.constant dense<0.000000e+00> : vector<16xf32>
    %259 = vector.multi_reduction <add>, %257, %cst_88 [1] : vector<16x16xf32> to vector<16xf32>
    %260 = vector.shape_cast %259 : vector<16xf32> to vector<16x1xf32>
    %261 = arith.addf %258, %260 : vector<16x1xf32>
    %262 = vector.broadcast %254 : vector<16x1xf32> to vector<16x8xf32>
    %263 = arith.mulf %262, %244 : vector<16x8xf32>
    %264 = arith.truncf %257 : vector<16x16xf32> to vector<16x16xbf16>
    %cst_89 = arith.constant dense<0.000000e+00> : vector<16x8xf32>
    %265 = tpu.matmul %264, %246, %cst_89 {dimension_numbers = #tpu.dot_dimension_numbers<[1], [0], [0], [1], [0, 0, 1, 1], [], []>} : vector<16x16xbf16>, vector<16x8xbf16>, vector<16x8xf32> -> vector<16x8xf32>
    %266 = arith.addf %263, %265 : vector<16x8xf32>
    %cst_90 = arith.constant 1.000000e+00 : f32
    %267 = vector.broadcast %cst_90 : f32 to vector<16x1xf32>
    %268 = arith.divf %267, %261 : vector<16x1xf32>
    %269 = vector.broadcast %268 : vector<16x1xf32> to vector<16x8xf32>
    %270 = arith.mulf %266, %269 : vector<16x8xf32>
    %271 = vector.extract_strided_slice %240 {offsets = [0, 8], sizes = [16, 8], strides = [1, 1]} : vector<16x32xbf16> to vector<16x8xbf16>
    %cst_91 = arith.constant -1.000000e+30 : f32
    %272 = vector.broadcast %cst_91 : f32 to vector<16x1xf32>
    %cst_92 = arith.constant 0.000000e+00 : f32
    %273 = vector.broadcast %cst_92 : f32 to vector<16x1xf32>
    %cst_93 = arith.constant 0.000000e+00 : f32
    %274 = vector.broadcast %cst_93 : f32 to vector<16x8xf32>
    %275 = vector.extract_strided_slice %35 {offsets = [16, 8], sizes = [16, 8], strides = [1, 1]} : vector<32x32xbf16> to vector<16x8xbf16>
    %276 = vector.extract_strided_slice %41 {offsets = [16, 8], sizes = [16, 8], strides = [1, 1]} : vector<32x32xbf16> to vector<16x8xbf16>
    %cst_94 = arith.constant dense<0.000000e+00> : vector<16x16xf32>
    %277 = tpu.matmul %271, %275, %cst_94 {dimension_numbers = #tpu.dot_dimension_numbers<[1], [1], [0], [0], [0, 0, 1, 0], [], []>} : vector<16x8xbf16>, vector<16x8xbf16>, vector<16x16xf32> -> vector<16x16xf32>
    %278 = vector.broadcast %239 : vector<1x16xf32> to vector<16x16xf32>
    %279 = arith.addf %277, %278 : vector<16x16xf32>
    %cst_95 = arith.constant dense<0xFF800000> : vector<16xf32>
    %280 = vector.multi_reduction <maximumf>, %279, %cst_95 [1] : vector<16x16xf32> to vector<16xf32>
    %281 = vector.shape_cast %280 : vector<16xf32> to vector<16x1xf32>
    %282 = arith.maximumf %272, %281 : vector<16x1xf32>
    %283 = arith.subf %272, %282 : vector<16x1xf32>
    %284 = math.exp %283 : vector<16x1xf32>
    %285 = vector.broadcast %282 : vector<16x1xf32> to vector<16x16xf32>
    %286 = arith.subf %279, %285 : vector<16x16xf32>
    %287 = math.exp %286 : vector<16x16xf32>
    %288 = arith.mulf %284, %273 : vector<16x1xf32>
    %cst_96 = arith.constant dense<0.000000e+00> : vector<16xf32>
    %289 = vector.multi_reduction <add>, %287, %cst_96 [1] : vector<16x16xf32> to vector<16xf32>
    %290 = vector.shape_cast %289 : vector<16xf32> to vector<16x1xf32>
    %291 = arith.addf %288, %290 : vector<16x1xf32>
    %292 = vector.broadcast %284 : vector<16x1xf32> to vector<16x8xf32>
    %293 = arith.mulf %292, %274 : vector<16x8xf32>
    %294 = arith.truncf %287 : vector<16x16xf32> to vector<16x16xbf16>
    %cst_97 = arith.constant dense<0.000000e+00> : vector<16x8xf32>
    %295 = tpu.matmul %294, %276, %cst_97 {dimension_numbers = #tpu.dot_dimension_numbers<[1], [0], [0], [1], [0, 0, 1, 1], [], []>} : vector<16x16xbf16>, vector<16x8xbf16>, vector<16x8xf32> -> vector<16x8xf32>
    %296 = arith.addf %293, %295 : vector<16x8xf32>
    %cst_98 = arith.constant 1.000000e+00 : f32
    %297 = vector.broadcast %cst_98 : f32 to vector<16x1xf32>
    %298 = arith.divf %297, %291 : vector<16x1xf32>
    %299 = vector.broadcast %298 : vector<16x1xf32> to vector<16x8xf32>
    %300 = arith.mulf %296, %299 : vector<16x8xf32>
    %301 = vector.extract_strided_slice %240 {offsets = [0, 16], sizes = [16, 8], strides = [1, 1]} : vector<16x32xbf16> to vector<16x8xbf16>
    %cst_99 = arith.constant -1.000000e+30 : f32
    %302 = vector.broadcast %cst_99 : f32 to vector<16x1xf32>
    %cst_100 = arith.constant 0.000000e+00 : f32
    %303 = vector.broadcast %cst_100 : f32 to vector<16x1xf32>
    %cst_101 = arith.constant 0.000000e+00 : f32
    %304 = vector.broadcast %cst_101 : f32 to vector<16x8xf32>
    %305 = vector.extract_strided_slice %35 {offsets = [16, 16], sizes = [16, 8], strides = [1, 1]} : vector<32x32xbf16> to vector<16x8xbf16>
    %306 = vector.extract_strided_slice %41 {offsets = [16, 16], sizes = [16, 8], strides = [1, 1]} : vector<32x32xbf16> to vector<16x8xbf16>
    %cst_102 = arith.constant dense<0.000000e+00> : vector<16x16xf32>
    %307 = tpu.matmul %301, %305, %cst_102 {dimension_numbers = #tpu.dot_dimension_numbers<[1], [1], [0], [0], [0, 0, 1, 0], [], []>} : vector<16x8xbf16>, vector<16x8xbf16>, vector<16x16xf32> -> vector<16x16xf32>
    %308 = vector.broadcast %239 : vector<1x16xf32> to vector<16x16xf32>
    %309 = arith.addf %307, %308 : vector<16x16xf32>
    %cst_103 = arith.constant dense<0xFF800000> : vector<16xf32>
    %310 = vector.multi_reduction <maximumf>, %309, %cst_103 [1] : vector<16x16xf32> to vector<16xf32>
    %311 = vector.shape_cast %310 : vector<16xf32> to vector<16x1xf32>
    %312 = arith.maximumf %302, %311 : vector<16x1xf32>
    %313 = arith.subf %302, %312 : vector<16x1xf32>
    %314 = math.exp %313 : vector<16x1xf32>
    %315 = vector.broadcast %312 : vector<16x1xf32> to vector<16x16xf32>
    %316 = arith.subf %309, %315 : vector<16x16xf32>
    %317 = math.exp %316 : vector<16x16xf32>
    %318 = arith.mulf %314, %303 : vector<16x1xf32>
    %cst_104 = arith.constant dense<0.000000e+00> : vector<16xf32>
    %319 = vector.multi_reduction <add>, %317, %cst_104 [1] : vector<16x16xf32> to vector<16xf32>
    %320 = vector.shape_cast %319 : vector<16xf32> to vector<16x1xf32>
    %321 = arith.addf %318, %320 : vector<16x1xf32>
    %322 = vector.broadcast %314 : vector<16x1xf32> to vector<16x8xf32>
    %323 = arith.mulf %322, %304 : vector<16x8xf32>
    %324 = arith.truncf %317 : vector<16x16xf32> to vector<16x16xbf16>
    %cst_105 = arith.constant dense<0.000000e+00> : vector<16x8xf32>
    %325 = tpu.matmul %324, %306, %cst_105 {dimension_numbers = #tpu.dot_dimension_numbers<[1], [0], [0], [1], [0, 0, 1, 1], [], []>} : vector<16x16xbf16>, vector<16x8xbf16>, vector<16x8xf32> -> vector<16x8xf32>
    %326 = arith.addf %323, %325 : vector<16x8xf32>
    %cst_106 = arith.constant 1.000000e+00 : f32
    %327 = vector.broadcast %cst_106 : f32 to vector<16x1xf32>
    %328 = arith.divf %327, %321 : vector<16x1xf32>
    %329 = vector.broadcast %328 : vector<16x1xf32> to vector<16x8xf32>
    %330 = arith.mulf %326, %329 : vector<16x8xf32>
    %331 = vector.extract_strided_slice %240 {offsets = [0, 24], sizes = [16, 8], strides = [1, 1]} : vector<16x32xbf16> to vector<16x8xbf16>
    %cst_107 = arith.constant -1.000000e+30 : f32
    %332 = vector.broadcast %cst_107 : f32 to vector<16x1xf32>
    %cst_108 = arith.constant 0.000000e+00 : f32
    %333 = vector.broadcast %cst_108 : f32 to vector<16x1xf32>
    %cst_109 = arith.constant 0.000000e+00 : f32
    %334 = vector.broadcast %cst_109 : f32 to vector<16x8xf32>
    %335 = vector.extract_strided_slice %35 {offsets = [16, 24], sizes = [16, 8], strides = [1, 1]} : vector<32x32xbf16> to vector<16x8xbf16>
    %336 = vector.extract_strided_slice %41 {offsets = [16, 24], sizes = [16, 8], strides = [1, 1]} : vector<32x32xbf16> to vector<16x8xbf16>
    %cst_110 = arith.constant dense<0.000000e+00> : vector<16x16xf32>
    %337 = tpu.matmul %331, %335, %cst_110 {dimension_numbers = #tpu.dot_dimension_numbers<[1], [1], [0], [0], [0, 0, 1, 0], [], []>} : vector<16x8xbf16>, vector<16x8xbf16>, vector<16x16xf32> -> vector<16x16xf32>
    %338 = vector.broadcast %239 : vector<1x16xf32> to vector<16x16xf32>
    %339 = arith.addf %337, %338 : vector<16x16xf32>
    %cst_111 = arith.constant dense<0xFF800000> : vector<16xf32>
    %340 = vector.multi_reduction <maximumf>, %339, %cst_111 [1] : vector<16x16xf32> to vector<16xf32>
    %341 = vector.shape_cast %340 : vector<16xf32> to vector<16x1xf32>
    %342 = arith.maximumf %332, %341 : vector<16x1xf32>
    %343 = arith.subf %332, %342 : vector<16x1xf32>
    %344 = math.exp %343 : vector<16x1xf32>
    %345 = vector.broadcast %342 : vector<16x1xf32> to vector<16x16xf32>
    %346 = arith.subf %339, %345 : vector<16x16xf32>
    %347 = math.exp %346 : vector<16x16xf32>
    %348 = arith.mulf %344, %333 : vector<16x1xf32>
    %cst_112 = arith.constant dense<0.000000e+00> : vector<16xf32>
    %349 = vector.multi_reduction <add>, %347, %cst_112 [1] : vector<16x16xf32> to vector<16xf32>
    %350 = vector.shape_cast %349 : vector<16xf32> to vector<16x1xf32>
    %351 = arith.addf %348, %350 : vector<16x1xf32>
    %352 = vector.broadcast %344 : vector<16x1xf32> to vector<16x8xf32>
    %353 = arith.mulf %352, %334 : vector<16x8xf32>
    %354 = arith.truncf %347 : vector<16x16xf32> to vector<16x16xbf16>
    %cst_113 = arith.constant dense<0.000000e+00> : vector<16x8xf32>
    %355 = tpu.matmul %354, %336, %cst_113 {dimension_numbers = #tpu.dot_dimension_numbers<[1], [0], [0], [1], [0, 0, 1, 1], [], []>} : vector<16x16xbf16>, vector<16x8xbf16>, vector<16x8xf32> -> vector<16x8xf32>
    %356 = arith.addf %353, %355 : vector<16x8xf32>
    %cst_114 = arith.constant 1.000000e+00 : f32
    %357 = vector.broadcast %cst_114 : f32 to vector<16x1xf32>
    %358 = arith.divf %357, %351 : vector<16x1xf32>
    %359 = vector.broadcast %358 : vector<16x1xf32> to vector<16x8xf32>
    %360 = arith.mulf %356, %359 : vector<16x8xf32>
    %361 = tpu.concatenate %270, %300, %330, %360 in 1 : vector<16x8xf32>, vector<16x8xf32>, vector<16x8xf32>, vector<16x8xf32> -> vector<16x32xf32>
    %362 = arith.truncf %361 : vector<16x32xf32> to vector<16x32xbf16>
    %cst_115 = arith.constant dense<0.000000e+00> : vector<16x32xf32>
    %363 = tpu.matmul %362, %11, %cst_115 {dimension_numbers = #tpu.dot_dimension_numbers<[1], [0], [0], [1], [0, 0, 1, 1], [], []>} : vector<16x32xbf16>, vector<32x32xbf16>, vector<16x32xf32> -> vector<16x32xf32>
    %364 = vector.extract_strided_slice %5 {offsets = [3, 0], sizes = [1, 32], strides = [1, 1]} : vector<16x32xf32> to vector<1x32xf32>
    %365 = vector.broadcast %364 : vector<1x32xf32> to vector<16x32xf32>
    %366 = arith.addf %363, %365 : vector<16x32xf32>
    %367 = vector.extract_strided_slice %19 {offsets = [16, 0], sizes = [16, 32], strides = [1, 1]} : vector<32x32xf32> to vector<16x32xf32>
    %368 = arith.addf %367, %366 : vector<16x32xf32>
    %369 = vector.extract_strided_slice %5 {offsets = [4, 0], sizes = [1, 32], strides = [1, 1]} : vector<16x32xf32> to vector<1x32xf32>
    %370 = vector.extract_strided_slice %5 {offsets = [5, 0], sizes = [1, 32], strides = [1, 1]} : vector<16x32xf32> to vector<1x32xf32>
    %cst_116 = arith.constant dense<0.000000e+00> : vector<16xf32>
    %371 = vector.multi_reduction <add>, %368, %cst_116 [1] : vector<16x32xf32> to vector<16xf32>
    %372 = vector.shape_cast %371 : vector<16xf32> to vector<16x1xf32>
    %cst_117 = arith.constant 3.200000e+01 : f32
    %373 = vector.broadcast %cst_117 : f32 to vector<16x1xf32>
    %374 = arith.divf %372, %373 : vector<16x1xf32>
    %375 = vector.broadcast %374 : vector<16x1xf32> to vector<16x32xf32>
    %376 = arith.subf %368, %375 : vector<16x32xf32>
    %377 = arith.mulf %376, %376 : vector<16x32xf32>
    %cst_118 = arith.constant dense<0.000000e+00> : vector<16xf32>
    %378 = vector.multi_reduction <add>, %377, %cst_118 [1] : vector<16x32xf32> to vector<16xf32>
    %379 = vector.shape_cast %378 : vector<16xf32> to vector<16x1xf32>
    %cst_119 = arith.constant 3.200000e+01 : f32
    %380 = vector.broadcast %cst_119 : f32 to vector<16x1xf32>
    %381 = arith.divf %379, %380 : vector<16x1xf32>
    %382 = vector.broadcast %374 : vector<16x1xf32> to vector<16x32xf32>
    %383 = arith.subf %368, %382 : vector<16x32xf32>
    %cst_120 = arith.constant 9.99999974E-6 : f32
    %384 = vector.broadcast %cst_120 : f32 to vector<16x1xf32>
    %385 = arith.addf %381, %384 : vector<16x1xf32>
    %386 = math.rsqrt %385 : vector<16x1xf32>
    %387 = vector.broadcast %386 : vector<16x1xf32> to vector<16x32xf32>
    %388 = arith.mulf %383, %387 : vector<16x32xf32>
    %389 = vector.broadcast %369 : vector<1x32xf32> to vector<16x32xf32>
    %390 = arith.mulf %388, %389 : vector<16x32xf32>
    %391 = vector.broadcast %370 : vector<1x32xf32> to vector<16x32xf32>
    %392 = arith.addf %390, %391 : vector<16x32xf32>
    %393 = arith.truncf %392 : vector<16x32xf32> to vector<16x32xbf16>
    %cst_121 = arith.constant dense<0.000000e+00> : vector<16x64xf32>
    %394 = tpu.matmul %393, %13, %cst_121 {dimension_numbers = #tpu.dot_dimension_numbers<[1], [0], [0], [1], [0, 0, 1, 1], [], []>} : vector<16x32xbf16>, vector<32x64xbf16>, vector<16x64xf32> -> vector<16x64xf32>
    %395 = vector.broadcast %17 : vector<1x64xf32> to vector<16x64xf32>
    %396 = arith.addf %394, %395 : vector<16x64xf32>
    %cst_122 = arith.constant 0.000000e+00 : f32
    %397 = vector.broadcast %cst_122 : f32 to vector<16x64xf32>
    %398 = arith.maximumf %396, %397 : vector<16x64xf32>
    %399 = arith.truncf %398 : vector<16x64xf32> to vector<16x64xbf16>
    %cst_123 = arith.constant dense<0.000000e+00> : vector<16x32xf32>
    %400 = tpu.matmul %399, %15, %cst_123 {dimension_numbers = #tpu.dot_dimension_numbers<[1], [0], [0], [1], [0, 0, 1, 1], [], []>} : vector<16x64xbf16>, vector<64x32xbf16>, vector<16x32xf32> -> vector<16x32xf32>
    %401 = vector.extract_strided_slice %5 {offsets = [8, 0], sizes = [1, 32], strides = [1, 1]} : vector<16x32xf32> to vector<1x32xf32>
    %402 = vector.broadcast %401 : vector<1x32xf32> to vector<16x32xf32>
    %403 = arith.addf %400, %402 : vector<16x32xf32>
    %404 = arith.addf %392, %403 : vector<16x32xf32>
    %405 = vector.extract_strided_slice %5 {offsets = [6, 0], sizes = [1, 32], strides = [1, 1]} : vector<16x32xf32> to vector<1x32xf32>
    %406 = vector.extract_strided_slice %5 {offsets = [7, 0], sizes = [1, 32], strides = [1, 1]} : vector<16x32xf32> to vector<1x32xf32>
    %cst_124 = arith.constant dense<0.000000e+00> : vector<16xf32>
    %407 = vector.multi_reduction <add>, %404, %cst_124 [1] : vector<16x32xf32> to vector<16xf32>
    %408 = vector.shape_cast %407 : vector<16xf32> to vector<16x1xf32>
    %cst_125 = arith.constant 3.200000e+01 : f32
    %409 = vector.broadcast %cst_125 : f32 to vector<16x1xf32>
    %410 = arith.divf %408, %409 : vector<16x1xf32>
    %411 = vector.broadcast %410 : vector<16x1xf32> to vector<16x32xf32>
    %412 = arith.subf %404, %411 : vector<16x32xf32>
    %413 = arith.mulf %412, %412 : vector<16x32xf32>
    %cst_126 = arith.constant dense<0.000000e+00> : vector<16xf32>
    %414 = vector.multi_reduction <add>, %413, %cst_126 [1] : vector<16x32xf32> to vector<16xf32>
    %415 = vector.shape_cast %414 : vector<16xf32> to vector<16x1xf32>
    %cst_127 = arith.constant 3.200000e+01 : f32
    %416 = vector.broadcast %cst_127 : f32 to vector<16x1xf32>
    %417 = arith.divf %415, %416 : vector<16x1xf32>
    %418 = vector.broadcast %410 : vector<16x1xf32> to vector<16x32xf32>
    %419 = arith.subf %404, %418 : vector<16x32xf32>
    %cst_128 = arith.constant 9.99999974E-6 : f32
    %420 = vector.broadcast %cst_128 : f32 to vector<16x1xf32>
    %421 = arith.addf %417, %420 : vector<16x1xf32>
    %422 = math.rsqrt %421 : vector<16x1xf32>
    %423 = vector.broadcast %422 : vector<16x1xf32> to vector<16x32xf32>
    %424 = arith.mulf %419, %423 : vector<16x32xf32>
    %425 = vector.broadcast %405 : vector<1x32xf32> to vector<16x32xf32>
    %426 = arith.mulf %424, %425 : vector<16x32xf32>
    %427 = vector.broadcast %406 : vector<1x32xf32> to vector<16x32xf32>
    %428 = arith.addf %426, %427 : vector<16x32xf32>
    %c1_129 = arith.constant 1 : index
    %c0_130 = arith.constant 0 : index
    %c0_131 = arith.constant 0 : index
    %429 = vector.load %arg14[%c1_129, %c0_130, %c0_131] : memref<2x16x32xf32, #tpu.memory_space<vmem>>, vector<1x16x32xf32>
    %430 = vector.shape_cast %429 : vector<1x16x32xf32> to vector<16x32xf32>
    %431 = vector.shape_cast %428 : vector<16x32xf32> to vector<1x16x32xf32>
    tpu.vector_store %arg14[%c1_129, %c0_130, %c0_131], %431 {strides = array<i32>} : memref<2x16x32xf32, #tpu.memory_space<vmem>>, vector<1x16x32xf32>,
    %432 = arith.extui %0 : i1 to i32
    %c0_i32_132 = arith.constant 0 : i32
    %433 = arith.cmpi ne, %432, %c0_i32_132 : i32
    scf.if %433 {
      %c0_133 = arith.constant 0 : index
      %c0_134 = arith.constant 0 : index
      %434 = vector.load %arg12[%c0_133, %c0_134] : memref<2x32xf32, #tpu.memory_space<vmem>>, vector<2x32xf32>
      %435 = vector.extract_strided_slice %434 {offsets = [0, 0], sizes = [1, 32], strides = [1, 1]} : vector<2x32xf32> to vector<1x32xf32>
      %436 = vector.extract_strided_slice %434 {offsets = [1, 0], sizes = [1, 32], strides = [1, 1]} : vector<2x32xf32> to vector<1x32xf32>
      %cst_135 = arith.constant dense<0.000000e+00> : vector<16xf32>
      %437 = vector.multi_reduction <add>, %428, %cst_135 [1] : vector<16x32xf32> to vector<16xf32>
      %438 = vector.shape_cast %437 : vector<16xf32> to vector<16x1xf32>
      %cst_136 = arith.constant 3.200000e+01 : f32
      %439 = vector.broadcast %cst_136 : f32 to vector<16x1xf32>
      %440 = arith.divf %438, %439 : vector<16x1xf32>
      %441 = vector.broadcast %440 : vector<16x1xf32> to vector<16x32xf32>
      %442 = arith.subf %428, %441 : vector<16x32xf32>
      %443 = arith.mulf %442, %442 : vector<16x32xf32>
      %cst_137 = arith.constant dense<0.000000e+00> : vector<16xf32>
      %444 = vector.multi_reduction <add>, %443, %cst_137 [1] : vector<16x32xf32> to vector<16xf32>
      %445 = vector.shape_cast %444 : vector<16xf32> to vector<16x1xf32>
      %cst_138 = arith.constant 3.200000e+01 : f32
      %446 = vector.broadcast %cst_138 : f32 to vector<16x1xf32>
      %447 = arith.divf %445, %446 : vector<16x1xf32>
      %448 = vector.broadcast %440 : vector<16x1xf32> to vector<16x32xf32>
      %449 = arith.subf %428, %448 : vector<16x32xf32>
      %cst_139 = arith.constant 9.99999974E-6 : f32
      %450 = vector.broadcast %cst_139 : f32 to vector<16x1xf32>
      %451 = arith.addf %447, %450 : vector<16x1xf32>
      %452 = math.rsqrt %451 : vector<16x1xf32>
      %453 = vector.broadcast %452 : vector<16x1xf32> to vector<16x32xf32>
      %454 = arith.mulf %449, %453 : vector<16x32xf32>
      %455 = vector.broadcast %435 : vector<1x32xf32> to vector<16x32xf32>
      %456 = arith.mulf %454, %455 : vector<16x32xf32>
      %457 = vector.broadcast %436 : vector<1x32xf32> to vector<16x32xf32>
      %458 = arith.addf %456, %457 : vector<16x32xf32>
      %c1_140 = arith.constant 1 : index
      %c0_141 = arith.constant 0 : index
      %c0_142 = arith.constant 0 : index
      %459 = vector.load %arg13[%c1_140, %c0_141, %c0_142] : memref<2x16x32xf32, #tpu.memory_space<vmem>>, vector<1x16x32xf32>
      %460 = vector.shape_cast %459 : vector<1x16x32xf32> to vector<16x32xf32>
      %461 = vector.shape_cast %458 : vector<16x32xf32> to vector<1x16x32xf32>
      tpu.vector_store %arg13[%c1_140, %c0_141, %c0_142], %461 {strides = array<i32>} : memref<2x16x32xf32, #tpu.memory_space<vmem>>, vector<1x16x32xf32>,
    } else {
    }
    return
  }
  func.func @transform_0(%arg0: i32, %arg1: i32) -> (i32, i32, i32) {
    %c0_i32 = arith.constant 0 : i32
    %c0_i32_0 = arith.constant 0 : i32
    %c0_i32_1 = arith.constant 0 : i32
    return %arg0, %c0_i32, %c0_i32_0 : i32, i32, i32
  }
  func.func @transform_1(%arg0: i32, %arg1: i32) -> (i32, i32, i32) {
    %c0_i32 = arith.constant 0 : i32
    %c0_i32_0 = arith.constant 0 : i32
    %c0_i32_1 = arith.constant 0 : i32
    return %arg0, %c0_i32, %c0_i32_0 : i32, i32, i32
  }
  func.func @transform_2(%arg0: i32, %arg1: i32) -> (i32, i32, i32) {
    %c0_i32 = arith.constant 0 : i32
    %c0_i32_0 = arith.constant 0 : i32
    %c0_i32_1 = arith.constant 0 : i32
    return %arg0, %c0_i32, %c0_i32_0 : i32, i32, i32
  }
  func.func @transform_3(%arg0: i32, %arg1: i32) -> (i32, i32, i32) {
    %c0_i32 = arith.constant 0 : i32
    %c0_i32_0 = arith.constant 0 : i32
    %c0_i32_1 = arith.constant 0 : i32
    return %arg1, %c0_i32, %c0_i32_0 : i32, i32, i32
  }
  func.func @transform_4(%arg0: i32, %arg1: i32) -> (i32, i32, i32) {
    %c0_i32 = arith.constant 0 : i32
    %c0_i32_0 = arith.constant 0 : i32
    %c0_i32_1 = arith.constant 0 : i32
    return %arg1, %c0_i32, %c0_i32_0 : i32, i32, i32
  }
  func.func @transform_5(%arg0: i32, %arg1: i32) -> (i32, i32, i32) {
    %c0_i32 = arith.constant 0 : i32
    %c0_i32_0 = arith.constant 0 : i32
    %c0_i32_1 = arith.constant 0 : i32
    return %arg1, %c0_i32, %c0_i32_0 : i32, i32, i32
  }
  func.func @transform_6(%arg0: i32, %arg1: i32) -> (i32, i32, i32) {
    %c0_i32 = arith.constant 0 : i32
    %c0_i32_0 = arith.constant 0 : i32
    %c0_i32_1 = arith.constant 0 : i32
    return %arg1, %c0_i32, %c0_i32_0 : i32, i32, i32
  }
  func.func @transform_7(%arg0: i32, %arg1: i32) -> (i32, i32, i32) {
    %c0_i32 = arith.constant 0 : i32
    %c0_i32_0 = arith.constant 0 : i32
    %c0_i32_1 = arith.constant 0 : i32
    return %arg1, %c0_i32, %c0_i32_0 : i32, i32, i32
  }
  func.func @transform_8(%arg0: i32, %arg1: i32) -> (i32, i32, i32) {
    %c0_i32 = arith.constant 0 : i32
    %c0_i32_0 = arith.constant 0 : i32
    %c0_i32_1 = arith.constant 0 : i32
    return %arg1, %c0_i32, %c0_i32_0 : i32, i32, i32
  }
  func.func @transform_9(%arg0: i32, %arg1: i32) -> (i32, i32, i32) {
    %c0_i32 = arith.constant 0 : i32
    %c0_i32_0 = arith.constant 0 : i32
    %c0_i32_1 = arith.constant 0 : i32
    return %arg1, %c0_i32, %c0_i32_0 : i32, i32, i32
  }
  func.func @transform_10(%arg0: i32, %arg1: i32) -> (i32, i32) {
    %c0_i32 = arith.constant 0 : i32
    %c0_i32_0 = arith.constant 0 : i32
    %c0_i32_1 = arith.constant 0 : i32
    return %c0_i32, %c0_i32_0 : i32, i32
  }
  func.func @transform_11(%arg0: i32, %arg1: i32) -> (i32, i32, i32) {
    %c0_i32 = arith.constant 0 : i32
    %c0_i32_0 = arith.constant 0 : i32
    %c0_i32_1 = arith.constant 0 : i32
    return %arg0, %c0_i32, %c0_i32_0 : i32, i32, i32
  }
}

</mosaic_0001>

<bundles_post_ra>
// kernel: tpu_custom_call.1
= control target key start
LH: loop header
LB: loop body
LE: loop exit
PB: predicated region body
PF: predicated region fallthrough
CT: control target
= control target key end

     0   :  { %s4090_s0 = inlined_call_operand.vmem [shape: f32[2,16,32], index: 0, kind: input, shape index: {}]   ;;  %s4091_s1 = inlined_call_operand.hbm [shape: bf16[2,16,32], index: 1, kind: input, shape index: {}]   ;;  %s4092_s2 = inlined_call_operand.hbm [shape: f32[2,1,16], index: 2, kind: input, shape index: {}]   ;;  %s4093_s3 = inlined_call_operand.vmem [shape: bf16[2,32,64], index: 3, kind: input, shape index: {}]   ;;  %s4094_s4 = inlined_call_operand.vmem [shape: bf16[2,32,32], index: 4, kind: input, shape index: {}]   ;;  %s4095_s5 = inlined_call_operand.hbm [shape: bf16[2,32,32], index: 5, kind: input, shape index: {}]   ;;  %s4096_s6 = inlined_call_operand.hbm [shape: bf16[2,32,64], index: 6, kind: input, shape index: {}]   ;;  %s4097_s7 = inlined_call_operand.vmem [shape: bf16[2,64,32], index: 7, kind: input, shape index: {}]   ;;  %s4098_s8 = inlined_call_operand.hbm [shape: f32[2,16,32], index: 8, kind: input, shape index: {}]   ;;  %s4099_s9 = inlined_call_operand.vmem [shape: f32[2,1,64], index: 9, kind: input, shape index: {}]   ;;  %s4100_s10 = inlined_call_operand.vmem [shape: f32[2,32], index: 10, kind: input, shape index: {}]   ;;  %s4101_s11 = inlined_call_operand.hbm [shape: f32[2,16,32], index: 11, kind: output, shape index: {}]  }
   0x1   :  { %4110 = sst [smem:[#allocation20_spill]] %s4090_s0 }
   0x2   :  { %4111 = sst [smem:[#allocation21_spill]] %s4091_s1 }
   0x3   :  { %4112 = sst [smem:[#allocation22_spill]] %s4092_s2 }
   0x4   :  { %4113 = sst [smem:[#allocation23_spill]] %s4095_s5 }
   0x5   :  { %4114 = sst [smem:[#allocation24_spill]] %s4096_s6 }
   0x6   :  { %4115 = sst [smem:[#allocation25_spill]] %s4099_s9 }
   0x7   :  { %4116 = sst [smem:[#allocation26_spill]] %s4100_s10 }
   0x8   :  { %4117 = sst [smem:[#allocation27_spill]] %s4101_s11 }
   0x9   :  { %16 = vsyncpa [#allocation4], 0 }
   0xa   :  { %17 = vsyncpa [#allocation7], 0 }
   0xb   :  { %18 = vsyncpa [#allocation5], 0  ;;  %s3190_s17 = smov 0   ;;  %s3192_s18 = smov 0  }
   0xc   :  { %s3194_s19 = smov 0   ;;  %s3196_s20 = smov 0  }
   0xd   :  { %s3198_s21 = smov 0   ;;  %s3200_s22 = smov 0  }
   0xe LB: > { %4118 = sst [smem:[#allocation16_spill]] %s3094_s19  ;;  %s3219_s23 = sadd.s32 4294967295, %s3106_s22   ;;  %s3106_s22 = sphi %s3200_s22, %s24_s22   ;;  %s3102_s21 = sphi %s3198_s21, %s4172_s21   ;;  %s3098_s20 = sphi %s3196_s20, %s4171_s20   ;;  %s3094_s19 = sphi %s3194_s19, %s4170_s19   ;;  %s3090_s18 = sphi %s3192_s18, %s4174_s18   ;;  %s3086_s17 = sphi %s3190_s17, %s4173_s17  }
   0xf   : > { %4119 = sst [smem:[#allocation17_spill]] %s3102_s21  ;;  %p186_p0 = scmp.ne.s32.totalorder %s3090_s18, %s3086_s17 }
  0x10   : > { %p187_p1 = scmp.eq.s32.totalorder %s3219_s23, 0  ;;  %p2464_p2 = scmp.ge.s32.totalorder %s3106_s22, 1 }
  0x11   : > { %p348_p3 = scmp.lt.s32.totalorder %s3106_s22, 3  ;;  %s4121_s1 = sld [smem:[#allocation21_spill]] }
  0x12   : > { %p3227_p4 = por %p187_p1, %p186_p0  ;;  %s3108_s29 = smov [#allocation3]  }
  0x13   : > { %p3234_p5 = pnand %p2464_p2, %p348_p3  ;;  %s375_s30 = sshll.u32 %s3108_s29, 4  ;;  %s376_s30 = int_to_ptr.vmem [resolvable:$true] %s375_s30 }
  0x14   : > { %s4102_s13 = smov 64   ;;  %s4104_s14 = smov 4  }
  0x15   : > { %p2616_p6 = pneg %p3234_p5  ;;  %s33_s15 = sadd.s32 1, %s3102_s21 }
  0x16   : > { %p34_p8 = scmp.ge.s32.totalorder %s33_s15, 2  ;;  %s173_s16 = sadd.s32 1, %s3094_s19 }
  0x17   : > { %s373_s27 = sshll.u32 %s4121_s1, 4  ;;  %p3242_p7 = pnand %p2616_p6, %p187_p1  ;;  %s374_s27 = int_to_ptr.hbm [resolvable:$true] %s373_s27 }
  0x18   : > { %p180_p9 = scmp.ne.s32.totalorder %s3094_s19, %s3090_s18  ;;  %p181_p10 = scmp.eq.s32.totalorder %s3106_s22, 0 }
  0x19   : > { %2619 = dma.hbm_to_vmem [thread:$0]  (!%p3242_p7), %s374_s27, 256, %s376_s30, [#allocation4], %s4102_s13, %s4102_s13, %s4104_s14  }
  0x1a   : > { %s4176_s15 = smov (%p34_p8, %s33_s15), 0  ;;  %p3258_p11 = por %p181_p10, %p180_p9 }
  0x1b   : > { %4124 = sst [smem:[#allocation18_spill]] %s4176_s15  ;;  %p2635_p12 = scmp.lt.s32.totalorder %s3106_s22, 2 }
  0x1c   : > { %s170_s25 = ssub.s32 %s3102_s21, %s4176_s15  ;;  %s424_s26 = sand.u32 1, %s3106_s22  }
  0x1d   : > { %p171_p13 = scmp.eq.s32.totalorder %s170_s25, 0  ;;  %s426_s29 = sand.u32 1, %s3094_s19  }
  0x1e   : > { %s3268_s27 = sshll.u32 %s3102_s21, 4  ;;  %s2469_s13 = sshll.u32 %s426_s29, 4 }
  0x1f   : > { %s3271_s30 = scalar_select %p171_p13, %s3094_s19, %s173_s16  }
  0x20   : > { %s4127_s5 = sld [smem:[#allocation23_spill]]  ;;  %s428_s0 = scalar_lea.vmem [#allocation8], %s2469_s13 }
  0x21   : > { %4126 = sst [smem:[#allocation19_spill]] %s3271_s30  ;;  %s436_s9 = sshll.u32 %s428_s0, 4  ;;  %s437_s9 = int_to_ptr.vmem [resolvable:$true] %s436_s9 }
  0x22   : > { %p3281_p0 = pnand %p2635_p12, %p3258_p11  ;;  %s4129_s6 = sld [smem:[#allocation24_spill]] }
  0x23   : > { %s4130_s14 = smov 4   ;;  %s4131_s0 = smov 64  }
  0x24   : > { %s450_s17 = scalar_lea.vmem [#allocation9], %s2469_s13  ;;  %s4132_s2 = sld [smem:[#allocation22_spill]] }
  0x25   : > { %s458_s29 = sshll.u32 %s450_s17, 4  ;;  %s3111_s15 = smov [#allocation6]   ;;  %s459_s29 = int_to_ptr.vmem [resolvable:$true] %s458_s29 }
  0x26   : > { %s433_s11 = scalar_lea.hbm %s4127_s5, %s3268_s27  ;;  %s480_s30 = scalar_lea.vmem [#allocation10], %s2469_s13 }
  0x27   : > { %s434_s10 = sshll.u32 %s433_s11, 4  ;;  %s425_s11 = scalar_lea.sflag [#allocation4], %s424_s26  ;;  %s435_s10 = int_to_ptr.hbm [resolvable:$true] %s434_s10 }
  0x28   : > { %s455_s16 = scalar_lea.hbm %s4129_s6, %s3268_s27  ;;  %s391_s26 = sshll.u32 %s3111_s15, 4  ;;  %s392_s26 = int_to_ptr.vmem [resolvable:$true] %s391_s26 }
  0x29   : > { %s456_s1 = sshll.u32 %s455_s16, 4  ;;  %s3112_s16 = smov 16   ;;  %s457_s1 = int_to_ptr.hbm [resolvable:$true] %s456_s1 }
  0x2a   : > { %2626 = dma.hbm_to_vmem [thread:$0]  (!%p3281_p0), %s435_s10, 256, %s437_s9, %s425_s11, %s4131_s0, %s4131_s0, %s4130_s14  }
  0x2b   : > { %s389_s21 = sshll.u32 %s4132_s2, 4  ;;  %s3113_s9 = smov 1   ;;  %s390_s21 = int_to_ptr.hbm [resolvable:$true] %s389_s21 }
  0x2c   : > { %2629 = dma.hbm_to_vmem [thread:$0]  (!%p3281_p0), %s457_s1, 256, %s459_s29, %s425_s11, %s4131_s0, %s4131_s0, %s4130_s14  }
  0x2d   : > { %2622 = dma.hbm_to_vmem [thread:$0]  (!%p3242_p7), %s390_s21, 32, %s392_s26, [#allocation7], %s3112_s16, %s3112_s16, %s3113_s9  }
  0x2e   : > { %s485_s6 = scalar_lea.hbm %s4098_s8, %s3268_s27  ;;  %s488_s2 = sshll.u32 %s480_s30, 4  ;;  %s489_s2 = int_to_ptr.vmem [resolvable:$true] %s488_s2 }
  0x2f   : > { %s486_s5 = sshll.u32 %s485_s6, 4  ;;  %s3114_s19 = smov 128   ;;  %s487_s5 = int_to_ptr.hbm [resolvable:$true] %s486_s5 }
  0x30   : > { %s3115_s1 = smov 8   ;;  %506 = sbr.rel (%p3234_p5) target bundleno = 4390 (0x1126), region = 64 }
  0x31   : > { %2632 = dma.hbm_to_vmem [thread:$0]  (!%p3281_p0), %s487_s5, 256, %s489_s2, %s425_s11, %s3114_s19, %s3114_s19, %s3115_s1  }
  0x35   : > { %3069 = dma.done.wait (%p187_p1), [#allocation4], 256  }
  0x36   : > { %3071 = vsyncadd (%p187_p1), [#allocation4], 4294967040 }
  0x37   : > { %3073 = dma.done.wait (%p187_p1), [#allocation7], 32  }
  0x38   : > { %3075 = vsyncadd (%p187_p1), [#allocation7], 4294967264  ;;  %s518_s6 = sand.u32 1, %s3219_s23   ;;  %s520_s2 = sand.u32 1, %s3090_s18  }
  0x39   : > { %s3322_s19 = sshll.u32 %s520_s2, 4  ;;  %s519_s28 = scalar_lea.sflag [#allocation4], %s518_s6 }
  0x3a   : > { %s522_s12 = scalar_lea.vmem [#allocation8], %s3322_s19 }
  0x3b   : > { %3077 = dma.done.wait (%p3227_p4), %s519_s28, 768  }
  0x3c   : > { %3079 = vsyncadd (%p3227_p4), %s519_s28, 4294966528  ;;  %p620_p1 = scmp.lt.s32.totalorder %s3098_s20, 1  ;;  %s4133_s17 = sld [smem:[#allocation25_spill]] }
  0x3d   : > { %s532_s30 = scalar_lea.vmem [#allocation9], %s3322_s19  ;;  %s3354_s1 = scalar_lea.vmem [#allocation10], %s3322_s19 }
  0x3e   : > { %s3331_s13 = scalar_select %p620_p1, %s3098_s20, 1 }
  0x3f   : > { %p2490_p2 = scmp.ne.s32.totalorder %s3098_s20, 0 }
  0x40   : > { %s2574_s27 = sshll.u32 %s3331_s13, 4  ;;  %s2576_s25 = sshll.u32 %s3331_s13, 5 }
  0x41   : > { %s624_s0 = scalar_lea.vmem %s4093_s3, %s2574_s27  ;;  %s3341_s24 = scalar_lea.vmem %s4094_s4, %s2574_s27 }
  0x42   : > { %s3346_s16 = scalar_lea.vmem %s4097_s7, %s2576_s25  ;;  %s637_s5 = scalar_lea.vmem %s4133_s17, %s3331_s13 }
  0x43   : > { %644 = sbr.rel (%p2490_p2) target bundleno = 78 (0x4e), region = 88  ;;  %s4134_s28 = sld [smem:[#allocation20_spill]] (!%p2490_p2) }
  0x48   : > { %vm649_vm0 = vcmask 261120  }
  0x49   : > { %v645_v0 = vld [vmem:[%s4134_s28] sm:$0xff]  ;;  %v646_v1 = vld [vmem:[%s4134_s28 + $0x8] sm:$0xff]  ;;  %v647_v2 = vld [vmem:[%s4134_s28 + $0x10] sm:$0xff] }
  0x4a   : > { %650 = vst.msk [vmem:[#allocation2] sm:$0xff] %vm649_vm0, %v645_v0  ;;  %v648_v3 = vld [vmem:[%s4134_s28 + $0x18] sm:$0xff] }
  0x4b   : > { %651 = vst.msk [vmem:[#allocation2 + $0x8] sm:$0xff] %vm649_vm0, %v646_v1 }
  0x4c   : > { %652 = vst.msk [vmem:[#allocation2 + $0x10] sm:$0xff] %vm649_vm0, %v647_v2 }
  0x4d   : > { %653 = vst.msk [vmem:[#allocation2 + $0x18] sm:$0xff] %vm649_vm0, %v648_v3 }
  0x4e PF: > { %v2578_v4 = vld [vmem:[%s624_s0 + $0x8] sm:$0xff]  ;;  %v2590_v7 = vld [vmem:[#allocation3] sm:$0xff]   ;;  %s3116_s15 = smov 32   ;;  %vm711_vm1 = vcmask 261120   ;;  %s3119_s26 = smov 80   ;;  %vm819_vm2 = vcmask 64512  }
  0x4f   : > { %v3374_v8 = vld [vmem:[%s3354_s1] sm:$0xff]  ;;  %724 = vmatpush.bf16.msra.mxu0 %v2578_v4  ;;  %v2591_v10 = vunpack.c.l.bf16 %v2590_v7  ;;  %v2592_v11 = vunpack.c.h.bf16 %v2590_v7  ;;  %s3120_s9 = smov 120   ;;  %s3121_s10 = smov 104   ;;  %v3426_v7 = vld [vmem:[#allocation6] ss:$0 sm:$0xff]  ;;  %vm840_vm3 = vcmask 130048  }
  0x50   : > { %v2577_v9 = vld [vmem:[%s624_s0] sm:$0xff]  ;;  %v746_v12 = vperm.slane %v3374_v8, 1  ;;  %v2580_v13 = vld [vmem:[%s3341_s24 + $0x8] sm:$0xff]  ;;  %v3393_v29 = vperm.slane %v3374_v8, 2  ;;  %v737_v34 = vperm.slane %v3374_v8, 0  ;;  %s3117_s0 = smov 88  }
  0x51   : > { %v3369_v5 = vld [vmem:[#allocation2] sm:$0xff]  ;;  %786 = vmatpush.bf16.msra.mxu1 %v2580_v13  ;;  %v2597_v19 = vld [vmem:[#allocation3 + $0x8] sm:$0xff]   ;;  %s3122_s17 = smov 112   ;;  %s3123_s6 = smov 72  }
  0x52   : > { %v3371_v6 = vld [vmem:[#allocation2 + $0x8] sm:$0xff]  ;;  %v693_v14 = vadd.f32 %v2591_v10, %v3369_v5  ;;  %748 = vrot.lane.b32.xlu0 %v746_v12, %s3116_s15  ;;  %v2579_v16 = vld [vmem:[%s3341_s24] sm:$0xff]  ;;  %v2595_v20 = vunpack.c.l.bf16 %v2597_v19  ;;  %v2596_v21 = vunpack.c.h.bf16 %v2597_v19  ;;  %s3118_s24 = smov 96   ;;  %s3124_s2 = smov 8  }
  0x53   : > { %v694_v15 = vadd.f32 %v2592_v11, %v3371_v6  ;;  %725 = vmatpush.bf16.msra.mxu0 %v2577_v9  ;;  %v759_v18 = vpack.c.bf16 %v3371_v6, %v3369_v5  ;;  %v3385_v22 = vld [vmem:[#allocation2 + $0x10] sm:$0xff]  ;;  %s3125_s27 = smov 16   ;;  %s3126_s11 = smov 24  }
  0x54   : > { %v3387_v23 = vld [vmem:[#allocation2 + $0x18] sm:$0xff]  ;;  %v695_v24 = vadd.f32 %v2595_v20, %v3385_v22  ;;  %p2554_p3 = scmp.ne.s32.totalorder %s3098_s20, 1 }
  0x55   : > { %v697_v17 = vpack.c.bf16 %v694_v15, %v693_v14  ;;  %787 = vmatpush.bf16.msra.mxu1 %v2579_v16  ;;  %v696_v25 = vadd.f32 %v2596_v21, %v3387_v23  ;;  %v760_v15 = vpack.c.bf16 %v3387_v23, %v3385_v22 }
  0x57   : > { %2499 = vmatmul.msk.bf16.vlgmr.msra.gmra.mxu0 %vm711_vm1, %v697_v17  ;;  %v698_v26 = vpack.c.bf16 %v696_v25, %v695_v24 }
  0x58   : > { %2509 = vmatmul.msk.bf16.vlgmr.msra.gmra.mxu1 %vm711_vm1, %v759_v18 }
  0x67   : > { %2500 = vmatmul.msk.bf16.gmra.mxu0 %vm711_vm1, %v698_v26 }
  0x68   : > { %2510 = vmatmul.msk.bf16.gmra.mxu1 %vm711_vm1, %v760_v15 }
  0xc4   : > { %v749_v28 = vpop.permute.xlu0 %748 }
  0xd4   : > { %v727_v27 = vpop.f32.mrf.mxu0 }
  0xd5   : > { %v789_v30 = vpop.f32.mrf.mxu1  ;;  %v751_v31 = vadd.f32 %v749_v28, %v727_v27  ;;  %v738_v42 = vadd.f32 %v737_v34, %v727_v27 }
  0xd6   : > { %v790_v32 = vadd.f32 %v789_v30, %v3393_v29 }
  0xd7   : > { %v755_v35 = vpack.c.bf16 %v751_v31, %v751_v31  ;;  %v742_v51 = vpack.c.bf16 %v738_v42, %v738_v42 }
  0xd8   : > { %v799_v37 = vpack.c.bf16 %v790_v32, %v790_v32 }
  0xd9   : > { %v814_v43 = vunpack.c.l.b16 %v755_v35  ;;  %v809_v58 = vunpack.c.l.b16 %v742_v51 }
  0xda   : > { %v874_v45 = vunpack.c.l.b16 %v799_v37 }
  0xdc   : > { %v729_v33 = vpop.f32.mrf.mxu0 }
  0xdd   : > { %v752_v36 = vadd.f32 %v749_v28, %v729_v33  ;;  %v739_v38 = vadd.f32 %v737_v34, %v729_v33  ;;  %v791_v40 = vpop.f32.mrf.mxu1 }
  0xde   : > { %v792_v41 = vadd.f32 %v791_v40, %v3393_v29 }
  0xdf   : > { %v756_v39 = vpack.c.bf16 %v752_v36, %v752_v36  ;;  %v743_v47 = vpack.c.bf16 %v739_v38, %v739_v38 }
  0xe0   : > { %v800_v46 = vpack.c.bf16 %v792_v41, %v792_v41 }
  0xe1   : > { %v815_v44 = vunpack.c.l.b16 %v756_v39  ;;  %v810_v55 = vunpack.c.l.b16 %v743_v47 }
  0xe2   : > { %v875_v50 = vunpack.c.l.b16 %v800_v46 }
  0xe3   : > { %v816_v48 = vpack.c.b16 %v815_v44, %v814_v43  ;;  %v811_v59 = vpack.c.b16 %v810_v55, %v809_v58 }
  0xe4   : > { %v732_v49 = vpop.f32.mrf.mxu0  ;;  %v3404_v54 = vpack.c.b16 %v875_v50, %v874_v45 }
  0xe5   : > { %v3398_v52 = vadd.f32 %v737_v34, %v732_v49  ;;  %v3400_v53 = vadd.f32 %v749_v28, %v732_v49  ;;  %931 = vrot.lane.b32.xlu2 %v816_v48, %s3117_s0  ;;  %817 = vrot.lane.b32.xlu0 %v816_v48, %s3118_s24  ;;  %v794_v38 = vpop.f32.mrf.mxu1 }
  0xe6   : > { %888 = vmatpush.bf16.msra.mxu3 %v3404_v54  ;;  %v3451_v39 = vadd.f32 %v794_v38, %v3393_v29 }
  0xe7   : > { %v744_v56 = vpack.c.bf16 %v3398_v52, %v3398_v52  ;;  %v757_v57 = vpack.c.bf16 %v3400_v53, %v3400_v53 }
  0xe8   : > { %v801_v40 = vpack.c.bf16 %v3451_v39, %v3451_v39 }
  0xec   : > { %v734_v60 = vpop.f32.mrf.mxu0 }
  0xed   : > { %v3411_v61 = vadd.f32 %v737_v34, %v734_v60  ;;  %v3413_v62 = vadd.f32 %v749_v28, %v734_v60  ;;  %1040 = vrot.lane.b32.xlu0 %v816_v48, %s3119_s26  ;;  %929 = vrot.lane.b32.xlu2 %v811_v59, %s3120_s9  ;;  %v796_v41 = vpop.f32.mrf.mxu1 }
  0xee   : > { %v3456_v42 = vadd.f32 %v796_v41, %v3393_v29 }
  0xef   : > { %v745_v63 = vpack.c.bf16 %v3411_v61, %v3411_v61  ;;  %v758_v0 = vpack.c.bf16 %v3413_v62, %v3413_v62 }
  0xf0   : > { %v802_v43 = vpack.c.bf16 %v3456_v42, %v3456_v42 }
  0xf5   : > { %1147 = vrot.lane.b32.xlu0 %v811_v59, %s3121_s10  ;;  %1038 = vrot.lane.b32.xlu2 %v811_v59, %s3122_s17 }
 0x13f   : > { %v932_v1 = vpop.permute.xlu2 %931 }
 0x140   : > { %v937_v2 = vsel %vm819_vm2, %v932_v1, 0 }
 0x141   : > { %946 = vmatpush.bf16.xpose.msrb.mxu3 %v937_v2 }
 0x147   : > { %v930_v34 = vpop.permute.xlu2 %929 }
 0x14f   : > { %v1039_v37 = vpop.permute.xlu2 %1038 }
 0x157   : > { %v818_v3 = vpop.permute.xlu0 %817 }
 0x158   : > { %v824_v4 = vsel %vm819_vm2, %v818_v3, 0 }
 0x159   : > { %833 = vmatpush.bf16.xpose.msra.mxu2 %v824_v4 }
 0x15f   : > { %v1041_v28 = vpop.permute.xlu0 %1040 }
 0x160   : > { %2511 = vmatmul.msk.bf16.vlgmr.msra.gmra.mxu2 %vm819_vm2, %v811_v59  ;;  %v1046_v31 = vsel %vm819_vm2, %v1041_v28, 0 }
 0x167   : > { %v1148_v35 = vpop.permute.xlu0 %1147 }
 0x1e3   : > { %v835_v9 = vpop.f32.mrf.mxu2 }
 0x1e4   : > { %v836_v10 = vadd.f32 %v3426_v7, %v835_v9 }
 0x1e6   : > { %v841_v11 = vsel %vm840_vm3, %v836_v10, -inf }
 0x1e7   : > { %842 = vmax.xlane.f32.xlu1 %v841_v11 }
 0x1eb   : > { %v837_v12 = vpop.f32.mrf.mxu2 }
 0x1ec   : > { %v838_v13 = vadd.f32 %v3426_v7, %v837_v12 }
 0x1ee   : > { %v844_v14 = vsel %vm840_vm3, %v838_v13, -inf }
 0x1ef   : > { %845 = vmax.xlane.f32.xlu1 %v844_v14 }
 0x208   : > { %1149 = vrot.lane.b32.xlu1 %v816_v48, %s3123_s6 }
 0x210   : > { %984 = vrot.lane.b32.xlu1 %v3404_v54, %s3120_s9 }
 0x25a   : > { %v843_v16 = vpop.xlane.xlu1 %842 }
 0x25b   : > { %v847_v17 = vmax.f32 %v843_v16, -1e+30 }
 0x25d   : > { %v855_v18 = vsub.f32 %v836_v10, %v847_v17  ;;  %v849_v44 = vsub.f32 -1e+30, %v847_v17 }
 0x25f   : > { %v857_v21 = vmul.f32 1.442695, %v855_v18  ;;  %v851_v45 = vmul.f32 1.442695, %v849_v44 }
 0x261   : > { %2727 = vpow2.f32 %v857_v21 }
 0x262   : > { %v846_v19 = vpop.xlane.xlu1 %845 }
 0x263   : > { %v848_v20 = vmax.f32 %v846_v19, -1e+30 }
 0x265   : > { %v856_v24 = vsub.f32 %v838_v13, %v848_v20  ;;  %v850_v46 = vsub.f32 -1e+30, %v848_v20 }
 0x267   : > { %v859_v25 = vmul.f32 1.442695, %v856_v24  ;;  %v3438_v26 = vpop.eup %2727  ;;  %v853_v47 = vmul.f32 1.442695, %v850_v46 }
 0x269   : > { %2729 = vpow2.f32 %v859_v25 }
 0x26a   : > { %2731 = vpow2.f32 %v851_v45 }
 0x26b   : > { %2733 = vpow2.f32 %v853_v47 }
 0x26f   : > { %v3440_v27 = vpop.eup %2729 }
 0x270   : > { %v871_v30 = vpack.c.bf16 %v3440_v27, %v3438_v26  ;;  %v2732_v48 = vpop.eup %2731 }
 0x271   : > { %v3460_v49 = vmul.f32 0.0, %v2732_v48  ;;  %v2734_v55 = vpop.eup %2733 }
 0x272   : > { %2512 = vmatmul.msk.bf16.vlgmr.msra.gmra.mxu3 %vm840_vm3, %v871_v30  ;;  %v3465_v58 = vmul.f32 0.0, %v2734_v55 }
 0x273   : > { %1055 = vmatpush.bf16.xpose.msra.mxu3 %v1046_v31 }
 0x27a   : > { %v1150_v32 = vpop.permute.xlu1 %1149 }
 0x27b   : > { %v1155_v33 = vsel %vm819_vm2, %v1150_v32, 0 }
 0x27c   : > { %1164 = vmatpush.bf16.xpose.msrb.mxu1 %v1155_v33 }
 0x282   : > { %v985_v36 = vpop.permute.xlu1 %984  ;;  %2513 = vmatmul.msk.bf16.vlgmr.msrb.gmra.mxu3 %vm819_vm2, %v930_v34 }
 0x283   : > { %2517 = vmatmul.msk.bf16.vlgmr.msrb.gmra.mxu1 %vm819_vm2, %v1148_v35  ;;  %997 = vmatpush.bf16.msrb.mxu2 %v985_v36 }
 0x292   : > { %2515 = vmatmul.msk.bf16.vlgmr.msra.gmra.mxu3 %vm819_vm2, %v1039_v37 }
 0x2f5   : > { %v890_v50 = vpop.f32.mrf.mxu3 }
 0x2f6   : > { %v3463_v51 = vadd.f32 %v890_v50, %v3460_v49 }
 0x2fd   : > { %v892_v29 = vpop.f32.mrf.mxu3 }
 0x2fe   : > { %v3468_v59 = vadd.f32 %v892_v29, %v3465_v58 }
 0x300   : > { %v1166_v60 = vpop.f32.mrf.mxu1 }
 0x301   : > { %v1167_v1 = vadd.f32 %v3426_v7, %v1166_v60 }
 0x303   : > { %v1171_v2 = vsel %vm840_vm3, %v1167_v1, -inf }
 0x304   : > { %1172 = vmax.xlane.f32.xlu1 %v1171_v2 }
 0x305   : > { %v948_v3 = vpop.f32.mrf.mxu3 }
 0x306   : > { %v949_v12 = vadd.f32 %v3426_v7, %v948_v3 }
 0x308   : > { %v1168_v4 = vpop.f32.mrf.mxu1  ;;  %v953_v15 = vsel %vm840_vm3, %v949_v12, -inf }
 0x309   : > { %v1169_v9 = vadd.f32 %v3426_v7, %v1168_v4 }
 0x30b   : > { %v1174_v10 = vsel %vm840_vm3, %v1169_v9, -inf }
 0x30c   : > { %1175 = vmax.xlane.f32.xlu2 %v1174_v10 }
 0x30d   : > { %v950_v11 = vpop.f32.mrf.mxu3 }
 0x30e   : > { %v951_v13 = vadd.f32 %v3426_v7, %v950_v11 }
 0x310   : > { %v956_v14 = vsel %vm840_vm3, %v951_v13, -inf }
 0x311   : > { %957 = vmax.xlane.f32.xlu0 %v956_v14 }
 0x314   : > { %954 = vmax.xlane.f32.xlu2 %v953_v15 }
 0x315   : > { %v1057_v16 = vpop.f32.mrf.mxu3 }
 0x316   : > { %v1058_v17 = vadd.f32 %v3426_v7, %v1057_v16 }
 0x318   : > { %v1062_v18 = vsel %vm840_vm3, %v1058_v17, -inf }
 0x31c   : > { %1063 = vmax.xlane.f32.xlu2 %v1062_v18 }
 0x31d   : > { %v1059_v19 = vpop.f32.mrf.mxu3 }
 0x31e   : > { %v1060_v20 = vadd.f32 %v3426_v7, %v1059_v19 }
 0x320   : > { %v1065_v21 = vsel %vm840_vm3, %v1060_v20, -inf }
 0x321   : > { %1066 = vmax.xlane.f32.xlu0 %v1065_v21 }
 0x334   : > { %1202 = vrot.lane.b32.xlu2 %v3404_v54, %s3121_s10 }
 0x335   : > { %1093 = vrot.lane.b32.xlu0 %v3404_v54, %s3122_s17 }
 0x377   : > { %v3491_v34 = vpop.xlane.xlu1 %1172 }
 0x378   : > { %v1177_v36 = vmax.f32 %v3491_v34, -1e+30 }
 0x37a   : > { %v1185_v44 = vsub.f32 %v1167_v1, %v1177_v36 }
 0x37c   : > { %v1187_v2 = vmul.f32 1.442695, %v1185_v44 }
 0x37f   : > { %v3486_v24 = vpop.xlane.xlu2 %1175 }
 0x380   : > { %v1178_v54 = vmax.f32 %v3486_v24, -1e+30 }
 0x382   : > { %v1186_v46 = vsub.f32 %v1169_v9, %v1178_v54 }
 0x384   : > { %v3488_v25 = vpop.xlane.xlu0 %957  ;;  %v1189_v4 = vmul.f32 1.442695, %v1186_v46 }
 0x385   : > { %v960_v28 = vmax.f32 %v3488_v25, -1e+30  ;;  %v863_v25 = vsel %vm840_vm3, %v3438_v26, 0.0 }
 0x387   : > { %v955_v30 = vpop.xlane.xlu2 %954  ;;  %v968_v31 = vsub.f32 %v951_v13, %v960_v28 }
 0x388   : > { %v959_v32 = vmax.f32 %v955_v30, -1e+30  ;;  %v866_v30 = vsel %vm840_vm3, %v3440_v27, 0.0 }
 0x389   : > { %v971_v33 = vmul.f32 1.442695, %v968_v31 }
 0x38a   : > { %v967_v7 = vsub.f32 %v949_v12, %v959_v32  ;;  %v961_v31 = vsub.f32 -1e+30, %v959_v32 }
 0x38b   : > { %2735 = vpow2.f32 %v971_v33 }
 0x38c   : > { %v969_v35 = vmul.f32 1.442695, %v967_v7  ;;  %v963_v33 = vmul.f32 1.442695, %v961_v31  ;;  %v962_v7 = vsub.f32 -1e+30, %v960_v28 }
 0x38d   : > { %v1180_v28 = vsub.f32 -1e+30, %v1178_v54 }
 0x38e   : > { %2737 = vpow2.f32 %v969_v35  ;;  %v965_v35 = vmul.f32 1.442695, %v962_v7 }
 0x38f   : > { %v1064_v37 = vpop.xlane.xlu2 %1063 }
 0x390   : > { %v1068_v38 = vmax.f32 %v1064_v37, -1e+30 }
 0x391   : > { %v2736_v45 = vpop.eup %2735 }
 0x392   : > { %v1076_v41 = vsub.f32 %v1058_v17, %v1068_v38  ;;  %v978_v12 = vsel %vm840_vm3, %v2736_v45, 0.0  ;;  %v1070_v34 = vsub.f32 -1e+30, %v1068_v38 }
 0x394   : > { %v1078_v47 = vmul.f32 1.442695, %v1076_v41  ;;  %v2738_v48 = vpop.eup %2737  ;;  %v1067_v50 = vpop.xlane.xlu0 %1066  ;;  %v1072_v37 = vmul.f32 1.442695, %v1070_v34 }
 0x395   : > { %v1069_v55 = vmax.f32 %v1067_v50, -1e+30  ;;  %v975_v29 = vsel %vm840_vm3, %v2738_v48, 0.0  ;;  %v983_v60 = vpack.c.bf16 %v2736_v45, %v2738_v48  ;;  %v1179_v45 = vsub.f32 -1e+30, %v1177_v36 }
 0x396   : > { %2739 = vpow2.f32 %v1078_v47  ;;  %976 = vadd.xlane.f32.xlu1 %v975_v29 }
 0x397   : > { %v1203_v3 = vpop.permute.xlu2 %1202  ;;  %v1077_v10 = vsub.f32 %v1060_v20, %v1069_v55  ;;  %2514 = vmatmul.msk.bf16.vlgmr.msrb.gmra.mxu2 %vm840_vm3, %v983_v60  ;;  %2741 = vpow2.f32 %v1187_v2  ;;  %v1071_v44 = vsub.f32 -1e+30, %v1069_v55  ;;  %v1181_v50 = vmul.f32 1.442695, %v1179_v45 }
 0x398   : > { %1215 = vmatpush.bf16.msra.mxu2 %v1203_v3  ;;  %2743 = vpow2.f32 %v1189_v4  ;;  %v1183_v2 = vmul.f32 1.442695, %v1180_v28 }
 0x399   : > { %v1080_v1 = vmul.f32 1.442695, %v1077_v10  ;;  %v1074_v47 = vmul.f32 1.442695, %v1071_v44 }
 0x39b   : > { %2745 = vpow2.f32 %v1080_v1 }
 0x39c   : > { %v2740_v9 = vpop.eup %2739  ;;  %2747 = vpow2.f32 %v963_v33 }
 0x39d   : > { %v1084_v11 = vsel %vm840_vm3, %v2740_v9, 0.0  ;;  %v2742_v13 = vpop.eup %2741  ;;  %2749 = vpow2.f32 %v965_v35 }
 0x39e   : > { %1085 = vadd.xlane.f32.xlu0 %v1084_v11  ;;  %979 = vadd.xlane.f32.xlu1 %v978_v12  ;;  %v2744_v14 = vpop.eup %2743  ;;  %v1193_v18 = vsel %vm840_vm3, %v2742_v13, 0.0  ;;  %2751 = vpow2.f32 %v1072_v37 }
 0x39f   : > { %v1201_v17 = vpack.c.bf16 %v2744_v14, %v2742_v13  ;;  %v1196_v21 = vsel %vm840_vm3, %v2744_v14, 0.0 }
 0x3a1   : > { %v2746_v15 = vpop.eup %2745 }
 0x3a2   : > { %v1087_v16 = vsel %vm840_vm3, %v2746_v15, 0.0  ;;  %v1092_v20 = vpack.c.bf16 %v2746_v15, %v2740_v9  ;;  %v2748_v41 = vpop.eup %2747 }
 0x3a3   : > { %1088 = vadd.xlane.f32.xlu2 %v1087_v16  ;;  %v973_v46 = vmul.f32 0.0, %v2748_v41  ;;  %v2750_v29 = vpop.eup %2749 }
 0x3a4   : > { %v2752_v27 = vpop.eup %2751  ;;  %v974_v38 = vmul.f32 0.0, %v2750_v29 }
 0x3a5   : > { %v3512_v32 = vmul.f32 0.0, %v2752_v27 }
 0x3a6   : > { %1194 = vadd.xlane.f32.xlu1 %v1193_v18 }
 0x3a7   : > { %v1094_v19 = vpop.permute.xlu0 %1093  ;;  %2518 = vmatmul.msk.bf16.vlgmr.msra.gmra.mxu2 %vm840_vm3, %v1201_v17 }
 0x3a8   : > { %1106 = vmatpush.bf16.msrb.mxu0 %v1094_v19 }
 0x3ab   : > { %2516 = vmatmul.msk.bf16.vlgmr.msrb.gmra.mxu0 %vm840_vm3, %v1092_v20 }
 0x3ae   : > { %1197 = vadd.xlane.f32.xlu1 %v1196_v21 }
 0x3b6   : > { %864 = vadd.xlane.f32.xlu1 %v863_v25 }
 0x3be   : > { %867 = vadd.xlane.f32.xlu1 %v866_v30 }
 0x409   : > { %v977_v26 = vpop.xlane.xlu1 %976 }
 0x40a   : > { %v981_v48 = vadd.f32 %v977_v26, %v973_v46 }
 0x40c   : > { %2753 = vrcp.f32 %v981_v48  ;;  %v1015_v20 = vand.u32 2147483647, %v981_v48  ;;  %v1017_v33 = vand.u32 2147483648, %v981_v48  ;;  %vm1011_vm5 = vweird.f32 %v981_v48 }
 0x40d   : > { %2755 = vpow2.f32 %v1074_v47 }
 0x40e   : > { %2757 = vpow2.f32 %v1181_v50  ;;  %vm3538_vm7 = vcmp.eq.f32.partialorder %v1015_v20, 8.507059e+37  ;;  %v1018_v29 = vor.u32 1.1754944e-38, %v1017_v33 }
 0x411   : > { %v1086_v55 = vpop.xlane.xlu0 %1085  ;;  %v980_v60 = vpop.xlane.xlu1 %979 }
 0x412   : > { %v2754_v36 = vpop.eup %2753  ;;  %v3515_v3 = vadd.f32 %v1086_v55, %v3512_v32  ;;  %v982_v4 = vadd.f32 %v980_v60, %v974_v38 }
 0x413   : > { %v2756_v10 = vpop.eup %2755  ;;  %v1007_v1 = vmul.f32 %v2754_v36, %v981_v48  ;;  %vm1012_vm4 = vweird.f32 %v2754_v36 }
 0x414   : > { %2759 = vrcp.f32 %v3515_v3  ;;  %v2758_v9 = vpop.eup %2757  ;;  %v3518_v24 = vmul.f32 0.0, %v2756_v10  ;;  %v1032_v34 = vand.u32 2147483648, %v982_v4  ;;  %vm3534_vm6 = vmor %vm1011_vm5, %vm1012_vm4  ;;  %v1030_v26 = vand.u32 2147483647, %v982_v4 }
 0x415   : > { %v1008_v11 = vsub.f32 1.0, %v1007_v1  ;;  %2761 = vrcp.f32 %v982_v4  ;;  %v3523_v13 = vmul.f32 0.0, %v2758_v9  ;;  %vm1026_vm9 = vweird.f32 %v982_v4 }
 0x416   : > { %2763 = vpow2.f32 %v1183_v2  ;;  %v1089_v54 = vpop.xlane.xlu2 %1088  ;;  %v1033_v1 = vor.u32 1.1754944e-38, %v1032_v34  ;;  %vm1031_vm11 = vcmp.eq.f32.partialorder %v1030_v26, 8.507059e+37  ;;  %vm1120_vm12 = vweird.f32 %v3515_v3 }
 0x417   : > { %v3521_v12 = vadd.f32 %v1089_v54, %v3518_v24  ;;  %v1009_v14 = vmul.f32 %v2754_v36, %v1008_v11  ;;  %v1126_v34 = vand.u32 2147483648, %v3515_v3 }
 0x419   : > { %v1195_v15 = vpop.xlane.xlu1 %1194  ;;  %2765 = vrcp.f32 %v3521_v12  ;;  %v1010_v30 = vadd.f32 %v2754_v36, %v1009_v14  ;;  %vm1135_vm4 = vweird.f32 %v3521_v12 }
 0x41a   : > { %v3525_v16 = vpop.eup %2759  ;;  %v3529_v17 = vadd.f32 %v1195_v15, %v3523_v13  ;;  %v999_v18 = vpop.f32.mrf.mxu2 }
 0x41b   : > { %v2762_v19 = vpop.eup %2761  ;;  %v1116_v31 = vmul.f32 %v3525_v16, %v3515_v3  ;;  %v1014_v45 = vsel %vm3534_vm6, %v2754_v36, %v1010_v30  ;;  %v1004_v55 = vadd.f32 %v999_v18, %v973_v46  ;;  %v1124_v30 = vand.u32 2147483647, %v3515_v3 }
 0x41c   : > { %v2764_v21 = vpop.eup %2763  ;;  %v1022_v25 = vmul.f32 %v2762_v19, %v982_v4  ;;  %2767 = vrcp.f32 %v3529_v17  ;;  %vm1027_vm8 = vweird.f32 %v2762_v19  ;;  %v1019_v11 = vsel %vm3538_vm7, %v1018_v29, %v1014_v45 }
 0x41d   : > { %v3542_v41 = vmul.f32 0.0, %v2764_v21  ;;  %v1117_v48 = vsub.f32 1.0, %v1116_v31  ;;  %vm1028_vm10 = vmor %vm1026_vm9, %vm1027_vm8  ;;  %v1036_v18 = vmul.f32 %v1019_v11, %v1004_v55  ;;  %vm1121_vm13 = vweird.f32 %v3525_v16 }
 0x41e   : > { %v1023_v7 = vsub.f32 1.0, %v1022_v25  ;;  %v1233_v45 = vand.u32 2147483647, %v3529_v17  ;;  %vm3586_vm15 = vmor %vm1120_vm12, %vm1121_vm13  ;;  %vm3590_vm0 = vcmp.eq.f32.partialorder %v1124_v30, 8.507059e+37  ;;  %vm1229_vm6 = vweird.f32 %v3529_v17 }
 0x41f   : > { %v3544_v44 = vpop.eup %2765  ;;  %v1118_v15 = vmul.f32 %v3525_v16, %v1117_v48  ;;  %v1235_v48 = vand.u32 2147483648, %v3529_v17 }
 0x420   : > { %v1024_v47 = vmul.f32 %v2762_v19, %v1023_v7  ;;  %v1131_v50 = vmul.f32 %v3544_v44, %v3521_v12  ;;  %vm1136_vm14 = vweird.f32 %v3544_v44  ;;  %vm3612_vm9 = vcmp.eq.f32.partialorder %v1233_v45, 8.507059e+37 }
 0x421   : > { %v1198_v27 = vpop.xlane.xlu1 %1197  ;;  %vm3604_vm7 = vmor %vm1135_vm4, %vm1136_vm14 }
 0x422   : > { %v3550_v28 = vpop.eup %2767  ;;  %v3553_v60 = vadd.f32 %v1198_v27, %v3542_v41  ;;  %v1001_v2 = vpop.f32.mrf.mxu2  ;;  %v1025_v10 = vadd.f32 %v2762_v19, %v1024_v47  ;;  %v1132_v36 = vsub.f32 1.0, %v1131_v50  ;;  %v1139_v47 = vand.u32 2147483647, %v3521_v12 }
 0x423   : > { %v1225_v9 = vmul.f32 %v3550_v28, %v3529_v17  ;;  %v1005_v54 = vadd.f32 %v1001_v2, %v974_v38  ;;  %v1119_v38 = vadd.f32 %v3525_v16, %v1118_v15  ;;  %v1141_v27 = vand.u32 2147483648, %v3521_v12 }
 0x424   : > { %2769 = vrcp.f32 %v3553_v60  ;;  %v1029_v4 = vsel %vm1028_vm10, %v2762_v19, %v1025_v10  ;;  %v1133_v21 = vmul.f32 %v3544_v44, %v1132_v36  ;;  %vm1230_vm5 = vweird.f32 %v3550_v28 }
 0x425   : > { %v1226_v46 = vsub.f32 1.0, %v1225_v9  ;;  %v1034_v14 = vsel %vm1031_vm11, %v1033_v1, %v1029_v4  ;;  %v1123_v2 = vsel %vm3586_vm15, %v3525_v16, %v1119_v38  ;;  %v1127_v1 = vor.u32 1.1754944e-38, %v1126_v34  ;;  %vm3622_vm10 = vmor %vm1229_vm6, %vm1230_vm5 }
 0x426   : > { %v1037_v20 = vmul.f32 %v1034_v14, %v1005_v54  ;;  %v1134_v50 = vadd.f32 %v3544_v44, %v1133_v21  ;;  %vm3608_vm8 = vcmp.eq.f32.partialorder %v1139_v47, 8.507059e+37  ;;  %v1236_v16 = vor.u32 1.1754944e-38, %v1235_v48 }
 0x427   : > { %v1227_v33 = vmul.f32 %v3550_v28, %v1226_v46  ;;  %v1128_v17 = vsel %vm3590_vm0, %v1127_v1, %v1123_v2  ;;  %v1142_v46 = vor.u32 1.1754944e-38, %v1141_v27  ;;  %v1248_v14 = vand.u32 2147483647, %v3553_v60 }
 0x428   : > { %v1108_v25 = vpop.f32.mrf.mxu0  ;;  %v2710_v31 = vpack.i.bf16 %v1037_v20, %v1036_v18  ;;  %v1250_v15 = vand.u32 2147483648, %v3553_v60  ;;  %vm1244_vm12 = vweird.f32 %v3553_v60 }
 0x429   : > { %v865_v19 = vpop.xlane.xlu1 %864  ;;  %v1228_v3 = vadd.f32 %v3550_v28, %v1227_v33  ;;  %v1113_v10 = vadd.f32 %v1108_v25, %v3512_v32  ;;  %v1138_v32 = vsel %vm3604_vm7, %v3544_v44, %v1134_v50  ;;  %vm1249_vm14 = vcmp.eq.f32.partialorder %v1248_v14, 8.507059e+37 }
 0x42a   : > { %v3568_v7 = vpop.eup %2769  ;;  %2711 = vrot.lane.b32.xlu1 %v2710_v31, %s3124_s2  ;;  %v3573_v35 = vadd.f32 %v865_v19, %v3460_v49  ;;  %v1217_v37 = vpop.f32.mrf.mxu2  ;;  %v1143_v31 = vsel %vm3608_vm8, %v1142_v46, %v1138_v32  ;;  %v1251_v47 = vor.u32 1.1754944e-38, %v1250_v15 }
 0x42b   : > { %v1240_v26 = vmul.f32 %v3568_v7, %v3553_v60  ;;  %v1232_v18 = vsel %vm3622_vm10, %v3550_v28, %v1228_v3  ;;  %vm1245_vm11 = vweird.f32 %v3568_v7  ;;  %v1145_v30 = vmul.f32 %v1128_v17, %v1113_v10 }
 0x42c   : > { %2771 = vrcp.f32 %v3573_v35  ;;  %v1222_v28 = vadd.f32 %v1217_v37, %v3523_v13  ;;  %v1237_v45 = vsel %vm3612_vm9, %v1236_v16, %v1232_v18  ;;  %vm1246_vm13 = vmor %vm1244_vm12, %vm1245_vm11  ;;  %v906_v60 = vand.u32 2147483647, %v3573_v35 }
 0x42d   : > { %v1241_v55 = vsub.f32 1.0, %v1240_v26  ;;  %v908_v50 = vand.u32 2147483648, %v3573_v35  ;;  %vm902_vm0 = vweird.f32 %v3573_v35  ;;  %vm1284_vm10 = vcmask 195584  }
 0x42e   : > { %v1254_v37 = vmul.f32 %v1237_v45, %v1222_v28  ;;  %vm907_vm5 = vcmp.eq.f32.partialorder %v906_v60, 8.507059e+37 }
 0x42f   : > { %v1242_v11 = vmul.f32 %v3568_v7, %v1241_v55 }
 0x430   : > { %v1110_v4 = vpop.f32.mrf.mxu0 }
 0x431   : > { %v1114_v44 = vadd.f32 %v1110_v4, %v3518_v24  ;;  %v868_v20 = vpop.xlane.xlu1 %867  ;;  %v1243_v21 = vadd.f32 %v3568_v7, %v1242_v11  ;;  %v3653_v4 = vld [vmem:[%s522_s12 + $0x8] sm:$0xff] }
 0x432   : > { %v2772_v25 = vpop.eup %2771  ;;  %v870_v38 = vadd.f32 %v868_v20, %v3465_v58  ;;  %v1219_v19 = vpop.f32.mrf.mxu2  ;;  %1310 = vmatpush.bf16.msrb.mxu3 %v3653_v4 }
 0x433   : > { %v898_v33 = vmul.f32 %v2772_v25, %v3573_v35  ;;  %v1146_v24 = vmul.f32 %v1143_v31, %v1114_v44  ;;  %v1223_v34 = vadd.f32 %v1219_v19, %v3542_v41  ;;  %v1247_v48 = vsel %vm1246_vm13, %v3568_v7, %v1243_v21 }
 0x434   : > { %2773 = vrcp.f32 %v870_v38  ;;  %v1252_v49 = vsel %vm1249_vm14, %v1251_v47, %v1247_v48  ;;  %vm903_vm15 = vweird.f32 %v2772_v25  ;;  %v909_v7 = vor.u32 1.1754944e-38, %v908_v50 }
 0x435   : > { %v899_v26 = vsub.f32 1.0, %v898_v33  ;;  %v2715_v58 = vpack.i.bf16 %v1146_v24, %v1145_v30  ;;  %v1255_v41 = vmul.f32 %v1252_v49, %v1223_v34  ;;  %vm904_vm4 = vmor %vm902_vm0, %vm903_vm15  ;;  %v923_v12 = vand.u32 2147483648, %v870_v38 }
 0x436   : > { %v921_v35 = vand.u32 2147483647, %v870_v38  ;;  %vm917_vm7 = vweird.f32 %v870_v38  ;;  %v3669_v34 = vperm.slane %v3374_v8, 3 }
 0x437   : > { %v900_v13 = vmul.f32 %v2772_v25, %v899_v26  ;;  %2716 = vrot.lane.b32.xlu0 %v2715_v58, %s3125_s27  ;;  %v2720_v27 = vpack.i.bf16 %v1255_v41, %v1254_v37  ;;  %v924_v32 = vor.u32 1.1754944e-38, %v923_v12 }
 0x438   : > { %vm922_vm9 = vcmp.eq.f32.partialorder %v921_v35, 8.507059e+37 }
 0x439   : > { %v901_v29 = vadd.f32 %v2772_v25, %v900_v13  ;;  %2721 = vrot.lane.b32.xlu2 %v2720_v27, %s3126_s11  ;;  %v3127_v13 = vmov 32.0  }
 0x43a   : > { %v2774_v55 = vpop.eup %2773  ;;  %2775 = vrcp.f32 %v3127_v13 }
 0x43b   : > { %v913_v2 = vmul.f32 %v2774_v55, %v870_v38  ;;  %v905_v3 = vsel %vm904_vm4, %v2772_v25, %v901_v29  ;;  %vm918_vm6 = vweird.f32 %v2774_v55 }
 0x43c   : > { %v910_v10 = vsel %vm907_vm5, %v909_v7, %v905_v3  ;;  %vm919_vm8 = vmor %vm917_vm7, %vm918_vm6  ;;  %vm1438_vm5 = vcmask 523264  }
 0x43d   : > { %v914_v1 = vsub.f32 1.0, %v913_v2  ;;  %v927_v36 = vmul.f32 %v910_v10, %v3463_v51  ;;  %v3658_v51 = vld [vmem:[%s522_s12] sm:$0xff] }
 0x43e   : > { %1311 = vmatpush.bf16.msrb.mxu3 %v3658_v51 }
 0x43f   : > { %v915_v9 = vmul.f32 %v2774_v55, %v914_v1 }
 0x440   : > { %v2776_v8 = vpop.eup %2775 }
 0x441   : > { %v916_v16 = vadd.f32 %v2774_v55, %v915_v9  ;;  %v1327_v37 = vmul.f32 32.0, %v2776_v8  ;;  %vm1331_vm11 = vweird.f32 %v2776_v8 }
 0x443   : > { %v920_v11 = vsel %vm919_vm8, %v2774_v55, %v916_v16  ;;  %v1328_v41 = vsub.f32 1.0, %v1327_v37  ;;  %v3710_v37 = vld [vmem:[%s3346_s16 + $0x18] sm:$0xff] }
 0x444   : > { %v925_v17 = vsel %vm922_vm9, %v924_v32, %v920_v11  ;;  %v3686_v11 = vld [vmem:[%s532_s30 + $0x8] sm:$0xff]  ;;  %1446 = vmatpush.bf16.msra.mxu1 %v3710_v37 }
 0x445   : > { %v928_v54 = vmul.f32 %v925_v17, %v3468_v59  ;;  %v1329_v29 = vmul.f32 %v2776_v8, %v1328_v41  ;;  %1402 = vmatpush.bf16.msra.mxu0 %v3686_v11  ;;  %v3691_v17 = vld [vmem:[%s532_s30] sm:$0xff] }
 0x446   : > { %v3714_v41 = vld [vmem:[%s3346_s16 + $0x10] sm:$0xff] }
 0x447   : > { %v1330_v27 = vadd.f32 %v2776_v8, %v1329_v29  ;;  %v3718_v29 = vld [vmem:[%s3346_s16 + $0x8] sm:$0xff] }
 0x448   : > { %1447 = vmatpush.bf16.msra.mxu1 %v3714_v41 }
 0x449   : > { %1403 = vmatpush.bf16.msra.mxu0 %v3691_v17 }
 0x44c   : > { %1448 = vmatpush.bf16.msra.mxu1 %v3718_v29 }
 0x493   : > { %v2722_v18 = vpop.permute.xlu2 %2721 }
 0x494   : > { %v2724_v25 = vunpack.i.h.bf16 %v2722_v18  ;;  %v2723_v59 = vunpack.i.l.bf16 %v2722_v18 }
 0x49c   : > { %v2712_v46 = vpop.permute.xlu1 %2711 }
 0x49d   : > { %v2714_v14 = vunpack.i.h.bf16 %v2712_v46  ;;  %v2713_v15 = vunpack.i.l.bf16 %v2712_v46 }
 0x49f   : > { %v1281_v30 = vsel %vm819_vm2, %v928_v54, %v2714_v14  ;;  %v1280_v31 = vsel %vm819_vm2, %v927_v36, %v2713_v15 }
 0x4a9   : > { %v2717_v44 = vpop.permute.xlu0 %2716 }
 0x4aa   : > { %v2719_v20 = vunpack.i.h.bf16 %v2717_v44  ;;  %v2718_v21 = vunpack.i.l.bf16 %v2717_v44 }
 0x4ac   : > { %v1282_v38 = vsel %vm840_vm3, %v1280_v31, %v2718_v21  ;;  %v1283_v19 = vsel %vm840_vm3, %v1281_v30, %v2719_v20 }
 0x4ad   : > { %v1285_v33 = vsel %vm1284_vm10, %v1282_v38, %v2723_v59  ;;  %v1286_v28 = vsel %vm1284_vm10, %v1283_v19, %v2724_v25 }
 0x4ae   : > { %v1287_v24 = vpack.c.bf16 %v1286_v28, %v1285_v33  ;;  %v3696_v28 = vld [vmem:[%s3354_s1] sm:$0xff] }
 0x4b0   : > { %2527 = vmatmul.msk.bf16.vlgmr.msrb.gmra.mxu3 %vm711_vm1, %v1287_v24  ;;  %v3699_v24 = vperm.slane %v3696_v28, 4 }
 0x533   : > { %v1313_v45 = vpop.f32.mrf.mxu3 }
 0x534   : > { %v1314_v47 = vadd.f32 %v1313_v45, %v3669_v34 }
 0x536   : > { %v1318_v26 = vadd.f32 %v1314_v47, %v3369_v5  ;;  %v3677_v5 = vsel %vm1331_vm11, %v2776_v8, %v1330_v27  ;;  %v3722_v27 = vld [vmem:[%s3346_s16] sm:$0xff] }
 0x537   : > { %1449 = vmatpush.bf16.msra.mxu1 %v3722_v27 }
 0x538   : > { %v1320_v48 = vsel %vm711_vm1, %v1318_v26, 0.0 }
 0x539   : > { %1321 = vadd.xlane.f32.xlu0 %v1320_v48  ;;  %v3702_v48 = vperm.slane %v3696_v28, 5 }
 0x53b   : > { %v1315_v58 = vpop.f32.mrf.mxu3 }
 0x53c   : > { %v1316_v60 = vadd.f32 %v1315_v58, %v3669_v34 }
 0x53e   : > { %v1319_v50 = vadd.f32 %v1316_v60, %v3371_v6 }
 0x540   : > { %v1323_v49 = vsel %vm711_vm1, %v1319_v50, 0.0 }
 0x541   : > { %1324 = vadd.xlane.f32.xlu1 %v1323_v49 }
 0x5ac   : > { %v1322_v55 = vpop.xlane.xlu0 %1321 }
 0x5ad   : > { %v1333_v7 = vmul.f32 %v3677_v5, %v1322_v55 }
 0x5af   : > { %v1335_v2 = vsub.f32 %v1318_v26, %v1333_v7  ;;  %v3730_v7 = vld [vmem:[%s637_s5] ss:$0 sm:$0xff]  ;;  %s4152_s5 = sld [smem:[#allocation26_spill]] (!%p2554_p3) }
 0x5b1   : > { %v1337_v6 = vmul.f32 %v1335_v2, %v1335_v2 }
 0x5b3   : > { %v1339_v3 = vsel %vm711_vm1, %v1337_v6, 0.0 }
 0x5b4   : > { %v1325_v10 = vpop.xlane.xlu1 %1324  ;;  %1340 = vadd.xlane.f32.xlu2 %v1339_v3 }
 0x5b5   : > { %v1334_v1 = vmul.f32 %v3677_v5, %v1325_v10 }
 0x5b7   : > { %v1336_v36 = vsub.f32 %v1319_v50, %v1334_v1 }
 0x5b9   : > { %v1338_v12 = vmul.f32 %v1336_v36, %v1336_v36 }
 0x5bb   : > { %v1342_v9 = vsel %vm711_vm1, %v1338_v12, 0.0  ;;  %v655_v12 = vld [vmem:[%s3354_s1 + $0x8] sm:$0xff] }
 0x5bc   : > { %1343 = vadd.xlane.f32.xlu0 %v1342_v9  ;;  %v3736_v9 = vperm.slane %v655_v12, 0 }
 0x627   : > { %v1341_v35 = vpop.xlane.xlu2 %1340 }
 0x628   : > { %v1345_v16 = vmul.f32 %v1341_v35, %v3677_v5 }
 0x62a   : > { %v1347_v32 = vadd.f32 1e-05, %v1345_v16 }
 0x62c   : > { %2777 = vrsqrt.f32 %v1347_v32  ;;  %vm1355_vm13 = vweird.f32 %v1347_v32 }
 0x62f   : > { %v1344_v54 = vpop.xlane.xlu0 %1343 }
 0x630   : > { %v1346_v46 = vmul.f32 %v1344_v54, %v3677_v5 }
 0x632   : > { %v2778_v14 = vpop.eup %2777  ;;  %v1348_v15 = vadd.f32 1e-05, %v1346_v46 }
 0x633   : > { %v1350_v18 = vmul.f32 %v2778_v14, %v1347_v32  ;;  %vm1356_vm12 = vweird.f32 %v2778_v14 }
 0x634   : > { %2779 = vrsqrt.f32 %v1348_v15  ;;  %vm1357_vm14 = vmor %vm1355_vm13, %vm1356_vm12  ;;  %vm1365_vm0 = vweird.f32 %v1348_v15 }
 0x635   : > { %v1351_v44 = vmul.f32 %v2778_v14, %v1350_v18 }
 0x637   : > { %v1352_v20 = vmul.f32 0.5, %v1351_v44 }
 0x639   : > { %v1353_v21 = vsub.f32 1.5, %v1352_v20 }
 0x63a   : > { %v2780_v25 = vpop.eup %2779 }
 0x63b   : > { %v1354_v59 = vmul.f32 %v2778_v14, %v1353_v21  ;;  %v1360_v30 = vmul.f32 %v2780_v25, %v1348_v15  ;;  %vm1366_vm15 = vweird.f32 %v2780_v25 }
 0x63c   : > { %vm1367_vm4 = vmor %vm1365_vm0, %vm1366_vm15 }
 0x63d   : > { %v1361_v31 = vmul.f32 %v2780_v25, %v1360_v30  ;;  %v1358_v38 = vsel %vm1357_vm14, %v2778_v14, %v1354_v59 }
 0x63e   : > { %v1369_v45 = vmul.f32 %v1358_v38, %v1335_v2 }
 0x63f   : > { %v1362_v19 = vmul.f32 0.5, %v1361_v31 }
 0x640   : > { %v1372_v58 = vmul.f32 %v3699_v24, %v1369_v45 }
 0x641   : > { %v1363_v33 = vsub.f32 1.5, %v1362_v19 }
 0x642   : > { %v1375_v49 = vadd.f32 %v3702_v48, %v1372_v58 }
 0x643   : > { %v1364_v47 = vmul.f32 %v2780_v25, %v1363_v33 }
 0x645   : > { %v1368_v26 = vsel %vm1367_vm4, %v2780_v25, %v1364_v47 }
 0x646   : > { %v1370_v60 = vmul.f32 %v1368_v26, %v1336_v36 }
 0x648   : > { %v1373_v50 = vmul.f32 %v3699_v24, %v1370_v60 }
 0x64a   : > { %v1376_v13 = vadd.f32 %v3702_v48, %v1373_v50 }
 0x64c   : > { %v1377_v8 = vpack.c.bf16 %v1376_v13, %v1375_v49 }
 0x64e   : > { %2536 = vmatmul.msk.bf16.vlgmr.msra.gmra.mxu0 %vm711_vm1, %v1377_v8 }
 0x6cb   : > { %v1405_v55 = vpop.f32.mrf.mxu0 }
 0x6cc   : > { %v1406_v2 = vadd.f32 %v3730_v7, %v1405_v55 }
 0x6ce   : > { %v1410_v10 = vmax.f32 %v1406_v2, 0.0 }
 0x6d3   : > { %v1407_v6 = vpop.f32.mrf.mxu0 }
 0x6d4   : > { %v1408_v3 = vadd.f32 %v3730_v7, %v1407_v6 }
 0x6d6   : > { %v1411_v1 = vmax.f32 %v1408_v3, 0.0 }
 0x6d8   : > { %v1412_v36 = vpack.c.bf16 %v1411_v1, %v1410_v10  ;;  %v3749_v1 = vperm.slane %v3696_v28, 6 }
 0x6da   : > { %2553 = vmatmul.msk.bf16.vlgmr.msra.gmra.mxu1 %vm1438_vm5, %v1412_v36 }
 0x757   : > { %v1451_v35 = vpop.f32.mrf.mxu1 }
 0x758   : > { %v1452_v16 = vadd.f32 %v1451_v35, %v3736_v9  ;;  %v3752_v35 = vperm.slane %v3696_v28, 7 }
 0x75a   : > { %v1456_v32 = vadd.f32 %v1452_v16, %v1375_v49 }
 0x75c   : > { %v1458_v54 = vsel %vm711_vm1, %v1456_v32, 0.0 }
 0x75d   : > { %1459 = vadd.xlane.f32.xlu1 %v1458_v54 }
 0x75f   : > { %v1453_v46 = vpop.f32.mrf.mxu1 }
 0x760   : > { %v1454_v14 = vadd.f32 %v1453_v46, %v3736_v9 }
 0x762   : > { %v1457_v15 = vadd.f32 %v1454_v14, %v1376_v13 }
 0x764   : > { %v1461_v18 = vsel %vm711_vm1, %v1457_v15, 0.0 }
 0x765   : > { %1462 = vadd.xlane.f32.xlu2 %v1461_v18 }
 0x7d0   : > { %v1460_v44 = vpop.xlane.xlu1 %1459 }
 0x7d1   : > { %v1464_v20 = vmul.f32 %v1460_v44, %v3677_v5 }
 0x7d3   : > { %v1466_v21 = vsub.f32 %v1456_v32, %v1464_v20 }
 0x7d5   : > { %v1468_v25 = vmul.f32 %v1466_v21, %v1466_v21 }
 0x7d7   : > { %v1470_v59 = vsel %vm711_vm1, %v1468_v25, 0.0 }
 0x7d8   : > { %v1463_v30 = vpop.xlane.xlu2 %1462  ;;  %1471 = vadd.xlane.f32.xlu0 %v1470_v59 }
 0x7d9   : > { %v1465_v31 = vmul.f32 %v1463_v30, %v3677_v5 }
 0x7db   : > { %v1467_v38 = vsub.f32 %v1457_v15, %v1465_v31 }
 0x7dd   : > { %v1469_v19 = vmul.f32 %v1467_v38, %v1467_v38 }
 0x7df   : > { %v1473_v33 = vsel %vm711_vm1, %v1469_v19, 0.0 }
 0x7e0   : > { %1474 = vadd.xlane.f32.xlu1 %v1473_v33 }
 0x84b   : > { %v1472_v45 = vpop.xlane.xlu0 %1471 }
 0x84c   : > { %v1476_v47 = vmul.f32 %v1472_v45, %v3677_v5 }
 0x84e   : > { %v1478_v26 = vadd.f32 1e-05, %v1476_v47 }
 0x850   : > { %2781 = vrsqrt.f32 %v1478_v26  ;;  %vm1486_vm7 = vweird.f32 %v1478_v26 }
 0x853   : > { %v1475_v58 = vpop.xlane.xlu1 %1474 }
 0x854   : > { %v1477_v60 = vmul.f32 %v1475_v58, %v3677_v5 }
 0x856   : > { %v2782_v50 = vpop.eup %2781  ;;  %v1479_v49 = vadd.f32 1e-05, %v1477_v60 }
 0x857   : > { %v1481_v13 = vmul.f32 %v2782_v50, %v1478_v26  ;;  %vm1487_vm6 = vweird.f32 %v2782_v50 }
 0x858   : > { %2783 = vrsqrt.f32 %v1479_v49  ;;  %vm1488_vm8 = vmor %vm1486_vm7, %vm1487_vm6  ;;  %vm1496_vm11 = vweird.f32 %v1479_v49 }
 0x859   : > { %v1482_v8 = vmul.f32 %v2782_v50, %v1481_v13 }
 0x85b   : > { %v1483_v55 = vmul.f32 0.5, %v1482_v8 }
 0x85d   : > { %v1484_v2 = vsub.f32 1.5, %v1483_v55 }
 0x85e   : > { %v2784_v6 = vpop.eup %2783 }
 0x85f   : > { %v1485_v3 = vmul.f32 %v2782_v50, %v1484_v2  ;;  %v1491_v10 = vmul.f32 %v2784_v6, %v1479_v49  ;;  %vm1497_vm9 = vweird.f32 %v2784_v6 }
 0x860   : > { %vm1498_vm12 = vmor %vm1496_vm11, %vm1497_vm9 }
 0x861   : > { %v1489_v36 = vsel %vm1488_vm8, %v2782_v50, %v1485_v3  ;;  %v1492_v12 = vmul.f32 %v2784_v6, %v1491_v10 }
 0x862   : > { %v1500_v16 = vmul.f32 %v1489_v36, %v1466_v21 }
 0x863   : > { %v1493_v32 = vmul.f32 0.5, %v1492_v12 }
 0x864   : > { %v1503_v54 = vmul.f32 %v3749_v1, %v1500_v16 }
 0x865   : > { %v1494_v46 = vsub.f32 1.5, %v1493_v32 }
 0x866   : > { %v1506_v14 = vadd.f32 %v3752_v35, %v1503_v54 }
 0x867   : > { %v1495_v15 = vmul.f32 %v2784_v6, %v1494_v46 }
 0x868   : > { %1508 = vst.msk [vmem:[#allocation2] sm:$0xff] %vm711_vm1, %v1506_v14 }
 0x869   : > { %v1499_v18 = vsel %vm1498_vm12, %v2784_v6, %v1495_v15 }
 0x86a   : > { %v1501_v44 = vmul.f32 %v1499_v18, %v1467_v38 }
 0x86c   : > { %v1504_v20 = vmul.f32 %v3749_v1, %v1501_v44  ;;  %1512 = sbr.rel (%p2554_p3) target bundleno = 2438 (0x986), region = 92 }
 0x86e   : > { %v1507_v28 = vadd.f32 %v3752_v35, %v1504_v20 }
 0x870   : > { %1509 = vst.msk [vmem:[#allocation2 + $0x8] sm:$0xff] %vm711_vm1, %v1507_v28 }
 0x871   : > { %v1514_v21 = vsel %vm711_vm1, %v1506_v14, 0.0  ;;  %v1517_v25 = vsel %vm711_vm1, %v1507_v28, 0.0  ;;  %v1513_v36 = vld [vmem:[%s4152_s5] sm:$0x3] }
 0x872   : > { %1515 = vadd.xlane.f32.xlu0 %v1514_v21  ;;  %v1558_v46 = vperm.slane %v1513_v36, 0  ;;  %v1561_v44 = vperm.slane %v1513_v36, 1 }
 0x87a   : > { %1518 = vadd.xlane.f32.xlu0 %v1517_v25 }
 0x8e5   : > { %v1516_v59 = vpop.xlane.xlu0 %1515 }
 0x8e6   : > { %v1520_v30 = vmul.f32 %v1516_v59, %v3677_v5 }
 0x8e8   : > { %v1522_v31 = vsub.f32 %v1506_v14, %v1520_v30 }
 0x8ea   : > { %v1524_v38 = vmul.f32 %v1522_v31, %v1522_v31 }
 0x8ec   : > { %v1526_v19 = vsel %vm711_vm1, %v1524_v38, 0.0 }
 0x8ed   : > { %1527 = vadd.xlane.f32.xlu1 %v1526_v19  ;;  %v1519_v33 = vpop.xlane.xlu0 %1518 }
 0x8ee   : > { %v1521_v45 = vmul.f32 %v1519_v33, %v3677_v5 }
 0x8f0   : > { %v1523_v47 = vsub.f32 %v1507_v28, %v1521_v45 }
 0x8f2   : > { %v1525_v26 = vmul.f32 %v1523_v47, %v1523_v47 }
 0x8f4   : > { %v1529_v58 = vsel %vm711_vm1, %v1525_v26, 0.0 }
 0x8f5   : > { %1530 = vadd.xlane.f32.xlu1 %v1529_v58 }
 0x960   : > { %v1528_v60 = vpop.xlane.xlu1 %1527 }
 0x961   : > { %v1532_v50 = vmul.f32 %v1528_v60, %v3677_v5 }
 0x963   : > { %v1534_v49 = vadd.f32 1e-05, %v1532_v50 }
 0x965   : > { %2786 = vrsqrt.f32 %v1534_v49  ;;  %vm1542_vm14 = vweird.f32 %v1534_v49 }
 0x968   : > { %v1531_v13 = vpop.xlane.xlu1 %1530 }
 0x969   : > { %v1533_v8 = vmul.f32 %v1531_v13, %v3677_v5 }
 0x96b   : > { %v2787_v55 = vpop.eup %2786  ;;  %v1535_v2 = vadd.f32 1e-05, %v1533_v8 }
 0x96c   : > { %v1537_v6 = vmul.f32 %v2787_v55, %v1534_v49  ;;  %vm1543_vm13 = vweird.f32 %v2787_v55 }
 0x96d   : > { %2788 = vrsqrt.f32 %v1535_v2  ;;  %vm1544_vm15 = vmor %vm1542_vm14, %vm1543_vm13  ;;  %vm1552_vm4 = vweird.f32 %v1535_v2 }
 0x96e   : > { %v1538_v3 = vmul.f32 %v2787_v55, %v1537_v6 }
 0x970   : > { %v1539_v10 = vmul.f32 0.5, %v1538_v3 }
 0x972   : > { %v1540_v12 = vsub.f32 1.5, %v1539_v10 }
 0x973   : > { %v2789_v16 = vpop.eup %2788 }
 0x974   : > { %v1541_v32 = vmul.f32 %v2787_v55, %v1540_v12  ;;  %v1547_v54 = vmul.f32 %v2789_v16, %v1535_v2  ;;  %vm1553_vm0 = vweird.f32 %v2789_v16 }
 0x975   : > { %vm1554_vm6 = vmor %vm1552_vm4, %vm1553_vm0 }
 0x976   : > { %v1545_v14 = vsel %vm1544_vm15, %v2787_v55, %v1541_v32  ;;  %v1548_v15 = vmul.f32 %v2789_v16, %v1547_v54 }
 0x977   : > { %v1556_v18 = vmul.f32 %v1545_v14, %v1522_v31 }
 0x978   : > { %v1549_v20 = vmul.f32 0.5, %v1548_v15 }
 0x979   : > { %v1559_v28 = vmul.f32 %v1558_v46, %v1556_v18 }
 0x97a   : > { %v1550_v21 = vsub.f32 1.5, %v1549_v20 }
 0x97b   : > { %v1562_v25 = vadd.f32 %v1561_v44, %v1559_v28 }
 0x97c   : > { %v1551_v59 = vmul.f32 %v2789_v16, %v1550_v21 }
 0x97d   : > { %1564 = vst.msk [vmem:[#allocation11] sm:$0xff] %vm711_vm1, %v1562_v25 }
 0x97e   : > { %v1555_v30 = vsel %vm1554_vm6, %v2789_v16, %v1551_v59 }
 0x97f   : > { %v1557_v38 = vmul.f32 %v1555_v30, %v1523_v47 }
 0x981   : > { %v1560_v19 = vmul.f32 %v1558_v46, %v1557_v38 }
 0x983   : > { %v1563_v33 = vadd.f32 %v1561_v44, %v1560_v19 }
 0x985   : > { %1565 = vst.msk [vmem:[#allocation11 + $0x8] sm:$0xff] %vm711_vm1, %v1563_v33 }
 0x986 PF: > { %v1578_v31 = vunpack.c.l.b16 %v757_v57  ;;  %v1579_v45 = vunpack.c.l.b16 %v758_v0  ;;  %v1573_v26 = vunpack.c.l.b16 %v744_v56  ;;  %v1574_v47 = vunpack.c.l.b16 %v745_v63  ;;  %s4167_s25 = sld [smem:[#allocation26_spill]] (!%p2554_p3) }
 0x988   : > { %v1580_v58 = vpack.c.b16 %v1579_v45, %v1578_v31  ;;  %v1575_v60 = vpack.c.b16 %v1574_v47, %v1573_v26 }
 0x98a   : > { %1581 = vrot.lane.b32.xlu0 %v1580_v58, %s3118_s24  ;;  %1802 = vrot.lane.b32.xlu1 %v1580_v58, %s3119_s26 }
 0x98b   : > { %1800 = vrot.lane.b32.xlu2 %v1575_v60, %s3122_s17 }
 0x992   : > { %1693 = vrot.lane.b32.xlu0 %v1580_v58, %s3117_s0  ;;  %1691 = vrot.lane.b32.xlu1 %v1575_v60, %s3120_s9 }
 0x993   : > { %1911 = vrot.lane.b32.xlu2 %v1580_v58, %s3123_s6 }
 0x99a   : > { %1909 = vrot.lane.b32.xlu0 %v1575_v60, %s3121_s10 }
 0x9e5   : > { %v1801_v52 = vpop.permute.xlu2 %1800 }
 0x9ed   : > { %v1912_v62 = vpop.permute.xlu2 %1911 }
 0x9ee   : > { %v1917_v0 = vsel %vm819_vm2, %v1912_v62, 0 }
 0x9fc   : > { %v1582_v53 = vpop.permute.xlu0 %1581  ;;  %v1803_v56 = vpop.permute.xlu1 %1802 }
 0x9fd   : > { %v1587_v57 = vsel %vm819_vm2, %v1582_v53, 0  ;;  %v1808_v61 = vsel %vm819_vm2, %v1803_v56, 0 }
 0x9fe   : > { %1596 = vmatpush.bf16.xpose.msrb.mxu2 %v1587_v57 }
 0xa04   : > { %v1694_v63 = vpop.permute.xlu0 %1693  ;;  %v1692_v49 = vpop.permute.xlu1 %1691 }
 0xa05   : > { %2555 = vmatmul.msk.bf16.vlgmr.msrb.gmra.mxu2 %vm819_vm2, %v1575_v60  ;;  %v1699_v50 = vsel %vm819_vm2, %v1694_v63, 0 }
 0xa06   : > { %1817 = vmatpush.bf16.xpose.msra.mxu2 %v1808_v61  ;;  %1708 = vmatpush.bf16.xpose.msrb.mxu0 %v1699_v50 }
 0xa0c   : > { %v1910_v13 = vpop.permute.xlu0 %1909 }
 0xa0d   : > { %2557 = vmatmul.msk.bf16.vlgmr.msrb.gmra.mxu0 %vm819_vm2, %v1692_v49 }
 0xa0e   : > { %2058 = vmatpush.bf16.msrb.mxu2 %v3653_v4  ;;  %1926 = vmatpush.bf16.xpose.msra.mxu0 %v1917_v0  ;;  %v1636_v4 = vunpack.c.l.b16 %v801_v40 }
 0xa12   : > { %2059 = vmatpush.bf16.msrb.mxu2 %v3658_v51  ;;  %v1637_v51 = vunpack.c.l.b16 %v802_v43 }
 0xa15   : > { %2559 = vmatmul.msk.bf16.vlgmr.msra.gmra.mxu2 %vm819_vm2, %v1801_v52 }
 0xa16   : > { %2144 = vmatpush.bf16.msrb.mxu0 %v3710_v37  ;;  %v1638_v37 = vpack.c.b16 %v1637_v51, %v1636_v4 }
 0xa18   : > { %1650 = vmatpush.bf16.msra.mxu3 %v1638_v37 }
 0xa1a   : > { %2145 = vmatpush.bf16.msrb.mxu0 %v3714_v41  ;;  %v2805_v41 = vld [vmem:[#allocation6 + $0x1] ss:$0 sm:$0xff] }
 0xa1d   : > { %2561 = vmatmul.msk.bf16.vlgmr.msra.gmra.mxu0 %vm819_vm2, %v1910_v13 }
 0xa1e   : > { %2146 = vmatpush.bf16.msrb.mxu0 %v3718_v29 }
 0xa22   : > { %2147 = vmatpush.bf16.msrb.mxu0 %v3722_v27 }
 0xa88   : > { %v1598_v8 = vpop.f32.mrf.mxu2 }
 0xa89   : > { %v1599_v55 = vadd.f32 %v2805_v41, %v1598_v8 }
 0xa8a   : > { %v1710_v2 = vpop.f32.mrf.mxu0 }
 0xa8b   : > { %v1711_v29 = vadd.f32 %v2805_v41, %v1710_v2  ;;  %v1603_v6 = vsel %vm840_vm3, %v1599_v55, -inf }
 0xa8c   : > { %1604 = vmax.xlane.f32.xlu1 %v1603_v6 }
 0xa8d   : > { %v1715_v27 = vsel %vm840_vm3, %v1711_v29, -inf }
 0xa8e   : > { %1716 = vmax.xlane.f32.xlu0 %v1715_v27 }
 0xa90   : > { %v1600_v3 = vpop.f32.mrf.mxu2 }
 0xa91   : > { %v1601_v42 = vadd.f32 %v2805_v41, %v1600_v3 }
 0xa92   : > { %v1712_v39 = vpop.f32.mrf.mxu0 }
 0xa93   : > { %v1713_v40 = vadd.f32 %v2805_v41, %v1712_v39  ;;  %v1606_v16 = vsel %vm840_vm3, %v1601_v42, -inf }
 0xa95   : > { %v1718_v10 = vsel %vm840_vm3, %v1713_v40, -inf }
 0xa96   : > { %1719 = vmax.xlane.f32.xlu2 %v1718_v10 }
 0xa98   : > { %v1819_v12 = vpop.f32.mrf.mxu2 }
 0xa99   : > { %v1820_v54 = vadd.f32 %v2805_v41, %v1819_v12 }
 0xa9a   : > { %v1928_v43 = vpop.f32.mrf.mxu0 }
 0xa9b   : > { %v1929_v36 = vadd.f32 %v2805_v41, %v1928_v43  ;;  %v1824_v18 = vsel %vm840_vm3, %v1820_v54, -inf }
 0xa9d   : > { %v1933_v32 = vsel %vm840_vm3, %v1929_v36, -inf }
 0xa9e   : > { %1607 = vmax.xlane.f32.xlu2 %v1606_v16  ;;  %1934 = vmax.xlane.f32.xlu1 %v1933_v32 }
 0xaa0   : > { %v1821_v44 = vpop.f32.mrf.mxu2 }
 0xaa1   : > { %v1822_v20 = vadd.f32 %v2805_v41, %v1821_v44 }
 0xaa2   : > { %v1930_v46 = vpop.f32.mrf.mxu0  ;;  %1746 = vrot.lane.b32.xlu0 %v1638_v37, %s3120_s9 }
 0xaa3   : > { %v1931_v14 = vadd.f32 %v2805_v41, %v1930_v46  ;;  %v1827_v28 = vsel %vm840_vm3, %v1822_v20, -inf }
 0xaa5   : > { %v1936_v15 = vsel %vm840_vm3, %v1931_v14, -inf }
 0xaa6   : > { %1937 = vmax.xlane.f32.xlu2 %v1936_v15  ;;  %1825 = vmax.xlane.f32.xlu1 %v1824_v18 }
 0xaae   : > { %1828 = vmax.xlane.f32.xlu2 %v1827_v28 }
 0xabf   : > { %1855 = vrot.lane.b32.xlu1 %v1638_v37, %s3122_s17 }
 0xac6   : > { %1964 = vrot.lane.b32.xlu2 %v1638_v37, %s3121_s10 }
 0xaff   : > { %v3831_v38 = vpop.xlane.xlu1 %1604 }
 0xb00   : > { %v1609_v31 = vmax.f32 %v3831_v38, -1e+30 }
 0xb01   : > { %v3826_v21 = vpop.xlane.xlu0 %1716 }
 0xb02   : > { %v1721_v25 = vmax.f32 %v3826_v21, -1e+30  ;;  %v1617_v58 = vsub.f32 %v1599_v55, %v1609_v31 }
 0xb04   : > { %v1729_v59 = vsub.f32 %v1711_v29, %v1721_v25  ;;  %v1619_v57 = vmul.f32 1.442695, %v1617_v58 }
 0xb06   : > { %v1731_v30 = vmul.f32 1.442695, %v1729_v59 }
 0xb08   : > { %2806 = vpow2.f32 %v1731_v30 }
 0xb09   : > { %v3833_v19 = vpop.xlane.xlu2 %1719 }
 0xb0a   : > { %v1722_v33 = vmax.f32 %v3833_v19, -1e+30  ;;  %v1611_v19 = vsub.f32 -1e+30, %v1609_v31 }
 0xb0c   : > { %v1730_v45 = vsub.f32 %v1713_v40, %v1722_v33  ;;  %v1724_v58 = vsub.f32 -1e+30, %v1722_v33 }
 0xb0e   : > { %v1733_v26 = vmul.f32 1.442695, %v1730_v45  ;;  %v2807_v47 = vpop.eup %2806 }
 0xb0f   : > { %v1737_v60 = vsel %vm840_vm3, %v2807_v47, 0.0 }
 0xb10   : > { %2808 = vpow2.f32 %v1733_v26  ;;  %1738 = vadd.xlane.f32.xlu0 %v1737_v60  ;;  %v1723_v26 = vsub.f32 -1e+30, %v1721_v25  ;;  %v1727_v60 = vmul.f32 1.442695, %v1724_v58 }
 0xb11   : > { %v3842_v52 = vpop.xlane.xlu2 %1607  ;;  %v3844_v53 = vpop.xlane.xlu1 %1934  ;;  %2810 = vpow2.f32 %v1619_v57 }
 0xb12   : > { %v1610_v56 = vmax.f32 %v3842_v52, -1e+30  ;;  %v1939_v50 = vmax.f32 %v3844_v53, -1e+30 }
 0xb14   : > { %v1618_v61 = vsub.f32 %v1601_v42, %v1610_v56  ;;  %v1747_v62 = vpop.permute.xlu0 %1746  ;;  %v1947_v8 = vsub.f32 %v1929_v36, %v1939_v50  ;;  %v1941_v38 = vsub.f32 -1e+30, %v1939_v50 }
 0xb15   : > { %1759 = vmatpush.bf16.msrb.mxu1 %v1747_v62 }
 0xb16   : > { %v1621_v63 = vmul.f32 1.442695, %v1618_v61  ;;  %v2809_v0 = vpop.eup %2808  ;;  %v1949_v39 = vmul.f32 1.442695, %v1947_v8  ;;  %v1612_v8 = vsub.f32 -1e+30, %v1610_v56 }
 0xb17   : > { %v1740_v49 = vsel %vm840_vm3, %v2809_v0, 0.0  ;;  %v1745_v13 = vpack.c.bf16 %v2809_v0, %v2807_v47  ;;  %v2811_v29 = vpop.eup %2810  ;;  %v1725_v47 = vmul.f32 1.442695, %v1723_v26  ;;  %v1943_v50 = vmul.f32 1.442695, %v1941_v38 }
 0xb18   : > { %2812 = vpow2.f32 %v1621_v63  ;;  %1741 = vadd.xlane.f32.xlu1 %v1740_v49  ;;  %v1625_v45 = vsel %vm840_vm3, %v2811_v29, 0.0 }
 0xb19   : > { %v1938_v4 = vpop.xlane.xlu2 %1937  ;;  %v1826_v51 = vpop.xlane.xlu1 %1825  ;;  %2558 = vmatmul.msk.bf16.vlgmr.msrb.gmra.mxu1 %vm840_vm3, %v1745_v13 }
 0xb1a   : > { %v1940_v37 = vmax.f32 %v1938_v4, -1e+30  ;;  %v1830_v41 = vmax.f32 %v1826_v51, -1e+30 }
 0xb1c   : > { %v1948_v55 = vsub.f32 %v1931_v14, %v1940_v37  ;;  %v1838_v2 = vsub.f32 %v1820_v54, %v1830_v41  ;;  %v1942_v63 = vsub.f32 -1e+30, %v1940_v37  ;;  %v1832_v49 = vsub.f32 -1e+30, %v1830_v41 }
 0xb1d   : > { %v1615_v41 = vmul.f32 1.442695, %v1612_v8 }
 0xb1e   : > { %v1951_v6 = vmul.f32 1.442695, %v1948_v55  ;;  %v2813_v27 = vpop.eup %2812  ;;  %v1840_v3 = vmul.f32 1.442695, %v1838_v2  ;;  %v1945_v25 = vmul.f32 1.442695, %v1942_v63 }
 0xb1f   : > { %v1633_v40 = vpack.c.bf16 %v2813_v27, %v2811_v29  ;;  %v1628_v28 = vsel %vm840_vm3, %v2813_v27, 0.0  ;;  %v1834_v33 = vmul.f32 1.442695, %v1832_v49  ;;  %v1613_v29 = vmul.f32 1.442695, %v1611_v19 }
 0xb20   : > { %2814 = vpow2.f32 %v1951_v6 }
 0xb21   : > { %v1829_v10 = vpop.xlane.xlu2 %1828  ;;  %2556 = vmatmul.msk.bf16.vlgmr.msra.gmra.mxu3 %vm840_vm3, %v1633_v40  ;;  %2816 = vpow2.f32 %v1840_v3 }
 0xb22   : > { %v1831_v42 = vmax.f32 %v1829_v10, -1e+30  ;;  %2818 = vpow2.f32 %v1949_v39 }
 0xb24   : > { %v1839_v43 = vsub.f32 %v1822_v20, %v1831_v42  ;;  %v1833_v55 = vsub.f32 -1e+30, %v1831_v42 }
 0xb26   : > { %v1842_v12 = vmul.f32 1.442695, %v1839_v43  ;;  %v2815_v16 = vpop.eup %2814  ;;  %v1836_v6 = vmul.f32 1.442695, %v1833_v55 }
 0xb27   : > { %v1958_v36 = vsel %vm840_vm3, %v2815_v16, 0.0  ;;  %v2817_v32 = vpop.eup %2816 }
 0xb28   : > { %2820 = vpow2.f32 %v1842_v12  ;;  %1959 = vadd.xlane.f32.xlu1 %v1958_v36  ;;  %v2819_v46 = vpop.eup %2818  ;;  %v1846_v14 = vsel %vm840_vm3, %v2817_v32, 0.0 }
 0xb29   : > { %v1965_v54 = vpop.permute.xlu2 %1964  ;;  %1847 = vadd.xlane.f32.xlu2 %v1846_v14  ;;  %v1963_v15 = vpack.c.bf16 %v2815_v16, %v2819_v46  ;;  %v1955_v30 = vsel %vm840_vm3, %v2819_v46, 0.0  ;;  %2822 = vpow2.f32 %v1725_v47 }
 0xb2a   : > { %1977 = vmatpush.bf16.msra.mxu1 %v1965_v54  ;;  %2824 = vpow2.f32 %v1727_v60 }
 0xb2d   : > { %2562 = vmatmul.msk.bf16.vlgmr.msra.gmra.mxu1 %vm840_vm3, %v1963_v15 }
 0xb2e   : > { %v2821_v18 = vpop.eup %2820 }
 0xb2f   : > { %v1849_v44 = vsel %vm840_vm3, %v2821_v18, 0.0  ;;  %v1854_v59 = vpack.c.bf16 %v2821_v18, %v2817_v32 }
 0xb30   : > { %1850 = vadd.xlane.f32.xlu0 %v1849_v44 }
 0xb31   : > { %v1856_v20 = vpop.permute.xlu1 %1855  ;;  %1629 = vadd.xlane.f32.xlu2 %v1628_v28 }
 0xb32   : > { %1868 = vmatpush.bf16.msrb.mxu3 %v1856_v20 }
 0xb35   : > { %2560 = vmatmul.msk.bf16.vlgmr.msrb.gmra.mxu3 %vm840_vm3, %v1854_v59 }
 0xb36   : > { %2126 = vmatpush.bf16.msra.mxu3 %v3686_v11  ;;  %v2823_v11 = vpop.eup %2822 }
 0xb37   : > { %v1735_v57 = vmul.f32 0.0, %v2823_v11  ;;  %v2825_v62 = vpop.eup %2824 }
 0xb38   : > { %1956 = vadd.xlane.f32.xlu0 %v1955_v30  ;;  %v1736_v0 = vmul.f32 0.0, %v2825_v62 }
 0xb3a   : > { %2127 = vmatpush.bf16.msra.mxu3 %v3691_v17 }
 0xb40   : > { %1626 = vadd.xlane.f32.xlu0 %v1625_v45 }
 0xb83   : > { %v1739_v61 = vpop.xlane.xlu0 %1738 }
 0xb84   : > { %v1743_v17 = vadd.f32 %v1739_v61, %v1735_v57 }
 0xb86   : > { %2826 = vrcp.f32 %v1743_v17  ;;  %vm1773_vm9 = vweird.f32 %v1743_v17  ;;  %v1779_v42 = vand.u32 2147483648, %v1743_v17  ;;  %v1777_v36 = vand.u32 2147483647, %v1743_v17 }
 0xb88   : > { %v1780_v45 = vor.u32 1.1754944e-38, %v1779_v42  ;;  %vm1778_vm14 = vcmp.eq.f32.partialorder %v1777_v36, 8.507059e+37 }
 0xb8b   : > { %v1742_v13 = vpop.xlane.xlu1 %1741 }
 0xb8c   : > { %v2827_v4 = vpop.eup %2826  ;;  %v1744_v21 = vadd.f32 %v1742_v13, %v1736_v0 }
 0xb8d   : > { %v1769_v51 = vmul.f32 %v2827_v4, %v1743_v17  ;;  %vm1774_vm7 = vweird.f32 %v2827_v4 }
 0xb8e   : > { %2828 = vrcp.f32 %v1744_v21  ;;  %v1794_v12 = vand.u32 2147483648, %v1744_v21  ;;  %vm3877_vm11 = vmor %vm1773_vm9, %vm1774_vm7  ;;  %vm1788_vm12 = vweird.f32 %v1744_v21  ;;  %v1792_v53 = vand.u32 2147483647, %v1744_v21 }
 0xb8f   : > { %2830 = vpow2.f32 %v1945_v25  ;;  %v1770_v2 = vsub.f32 1.0, %v1769_v51 }
 0xb90   : > { %2832 = vpow2.f32 %v1834_v33  ;;  %v1795_v58 = vor.u32 1.1754944e-38, %v1794_v12  ;;  %vm1793_vm15 = vcmp.eq.f32.partialorder %v1792_v53, 8.507059e+37 }
 0xb91   : > { %v1771_v3 = vmul.f32 %v2827_v4, %v1770_v2  ;;  %2834 = vpow2.f32 %v1613_v29 }
 0xb92   : > { %2836 = vpow2.f32 %v1615_v41 }
 0xb93   : > { %2838 = vpow2.f32 %v1836_v6  ;;  %v1772_v52 = vadd.f32 %v2827_v4, %v1771_v3 }
 0xb94   : > { %v2829_v37 = vpop.eup %2828  ;;  %2840 = vpow2.f32 %v1943_v50 }
 0xb95   : > { %v1784_v27 = vmul.f32 %v2829_v37, %v1744_v21  ;;  %v2831_v40 = vpop.eup %2830  ;;  %vm1789_vm8 = vweird.f32 %v2829_v37  ;;  %v1776_v44 = vsel %vm3877_vm11, %v2827_v4, %v1772_v52 }
 0xb96   : > { %v1761_v39 = vpop.f32.mrf.mxu1  ;;  %v2833_v31 = vpop.eup %2832  ;;  %v3875_v43 = vmul.f32 0.0, %v2831_v40  ;;  %vm3883_vm13 = vmor %vm1788_vm12, %vm1789_vm8 }
 0xb97   : > { %v1785_v10 = vsub.f32 1.0, %v1784_v27  ;;  %v3881_v46 = vmul.f32 0.0, %v2833_v31  ;;  %v2835_v15 = vpop.eup %2834  ;;  %v1766_v18 = vadd.f32 %v1761_v39, %v1735_v57  ;;  %v1781_v57 = vsel %vm1778_vm14, %v1780_v45, %v1776_v44 }
 0xb98   : > { %v2837_v30 = vpop.eup %2836  ;;  %v1623_v13 = vmul.f32 0.0, %v2835_v15 }
 0xb99   : > { %v1786_v56 = vmul.f32 %v2829_v37, %v1785_v10  ;;  %v2839_v60 = vpop.eup %2838  ;;  %v1798_v17 = vmul.f32 %v1781_v57, %v1766_v18  ;;  %v1624_v25 = vmul.f32 0.0, %v2837_v30 }
 0xb9a   : > { %v3899_v63 = vmul.f32 0.0, %v2839_v60  ;;  %v2841_v33 = vpop.eup %2840 }
 0xb9b   : > { %v1960_v32 = vpop.xlane.xlu1 %1959  ;;  %v1787_v54 = vadd.f32 %v2829_v37, %v1786_v56  ;;  %v3912_v29 = vmul.f32 0.0, %v2841_v33 }
 0xb9c   : > { %v1848_v20 = vpop.xlane.xlu2 %1847  ;;  %v3890_v28 = vadd.f32 %v1960_v32, %v3875_v43 }
 0xb9d   : > { %v1791_v59 = vsel %vm3883_vm13, %v2829_v37, %v1787_v54  ;;  %v3895_v26 = vadd.f32 %v1848_v20, %v3881_v46 }
 0xb9e   : > { %v1763_v47 = vpop.f32.mrf.mxu1  ;;  %v1796_v61 = vsel %vm1793_vm15, %v1795_v58, %v1791_v59  ;;  %2842 = vrcp.f32 %v3890_v28  ;;  %v2012_v12 = vand.u32 2147483648, %v3890_v28  ;;  %vm2006_vm0 = vweird.f32 %v3890_v28 }
 0xb9f   : > { %v1767_v11 = vadd.f32 %v1763_v47, %v1736_v0  ;;  %2844 = vrcp.f32 %v3895_v26  ;;  %v2010_v32 = vand.u32 2147483647, %v3890_v28  ;;  %vm1882_vm4 = vweird.f32 %v3895_v26 }
 0xba0   : > { %v1886_v50 = vand.u32 2147483647, %v3895_v26  ;;  %v2013_v59 = vor.u32 1.1754944e-38, %v2012_v12  ;;  %v1888_v45 = vand.u32 2147483648, %v3895_v26 }
 0xba1   : > { %v1799_v62 = vmul.f32 %v1796_v61, %v1767_v11  ;;  %vm3938_vm9 = vcmp.eq.f32.partialorder %v2010_v32, 8.507059e+37 }
 0xba3   : > { %v1851_v49 = vpop.xlane.xlu0 %1850  ;;  %v2790_v4 = vpack.i.bf16 %v1799_v62, %v1798_v17 }
 0xba4   : > { %v3902_v21 = vadd.f32 %v1851_v49, %v3899_v63  ;;  %v1652_v0 = vpop.f32.mrf.mxu3  ;;  %v1630_v51 = vpop.xlane.xlu2 %1629 }
 0xba5   : > { %v3904_v19 = vadd.f32 %v1652_v0, %v1623_v13  ;;  %2791 = vrot.lane.b32.xlu1 %v2790_v4, %s3124_s2  ;;  %v1632_v8 = vadd.f32 %v1630_v51, %v1624_v25  ;;  %v3908_v55 = vpop.eup %2842 }
 0xba6   : > { %2846 = vrcp.f32 %v3902_v21  ;;  %v3910_v2 = vpop.eup %2844  ;;  %v2002_v41 = vmul.f32 %v3908_v55, %v3890_v28  ;;  %vm2007_vm7 = vweird.f32 %v3908_v55  ;;  %v1901_v28 = vand.u32 2147483647, %v3902_v21 }
 0xba7   : > { %2848 = vrcp.f32 %v1632_v8  ;;  %v1878_v37 = vmul.f32 %v3910_v2, %v3895_v26  ;;  %v1683_v54 = vand.u32 2147483647, %v1632_v8  ;;  %v1685_v53 = vand.u32 2147483648, %v1632_v8  ;;  %vm3956_vm15 = vmor %vm2006_vm0, %vm2007_vm7 }
 0xba8   : > { %v2003_v56 = vsub.f32 1.0, %v2002_v41  ;;  %vm1679_vm8 = vweird.f32 %v1632_v8  ;;  %vm1883_vm13 = vweird.f32 %v3910_v2  ;;  %vm1897_vm0 = vweird.f32 %v3902_v21 }
 0xba9   : > { %v1879_v52 = vsub.f32 1.0, %v1878_v37  ;;  %vm1684_vm12 = vcmp.eq.f32.partialorder %v1683_v54, 8.507059e+37  ;;  %v1686_v57 = vor.u32 1.1754944e-38, %v1685_v53 }
 0xbaa   : > { %v1979_v31 = vpop.f32.mrf.mxu1  ;;  %v2004_v15 = vmul.f32 %v3908_v55, %v2003_v56 }
 0xbab   : > { %v1957_v6 = vpop.xlane.xlu0 %1956  ;;  %v1880_v44 = vmul.f32 %v3910_v2, %v1879_v52 }
 0xbac   : > { %v3918_v27 = vpop.eup %2846  ;;  %v3921_v3 = vadd.f32 %v1957_v6, %v3912_v29  ;;  %v1654_v39 = vpop.f32.mrf.mxu3  ;;  %v2005_v62 = vadd.f32 %v3908_v55, %v2004_v15 }
 0xbad   : > { %v1893_v40 = vmul.f32 %v3918_v27, %v3902_v21  ;;  %v1658_v10 = vadd.f32 %v1654_v39, %v1624_v25  ;;  %v2849_v38 = vpop.eup %2848  ;;  %vm1898_vm14 = vweird.f32 %v3918_v27 }
 0xbae   : > { %2850 = vrcp.f32 %v3921_v3  ;;  %v1675_v42 = vmul.f32 %v2849_v38, %v1632_v8  ;;  %vm1680_vm6 = vweird.f32 %v2849_v38  ;;  %v1995_v0 = vand.u32 2147483647, %v3921_v3 }
 0xbaf   : > { %v1894_v16 = vsub.f32 1.0, %v1893_v40  ;;  %vm1681_vm11 = vmor %vm1679_vm8, %vm1680_vm6  ;;  %v1997_v51 = vand.u32 2147483648, %v3921_v3  ;;  %v1903_v40 = vand.u32 2147483648, %v3902_v21  ;;  %v2009_v26 = vsel %vm3956_vm15, %v3908_v55, %v2005_v62 }
 0xbb0   : > { %v1676_v36 = vsub.f32 1.0, %v1675_v42  ;;  %vm3965_vm8 = vmor %vm1882_vm4, %vm1883_vm13  ;;  %vm1991_vm7 = vweird.f32 %v3921_v3  ;;  %v1984_v42 = vadd.f32 %v1979_v31, %v3912_v29  ;;  %v1889_v21 = vor.u32 1.1754944e-38, %v1888_v45 }
 0xbb1   : > { %v1895_v11 = vmul.f32 %v3918_v27, %v1894_v16  ;;  %vm3982_vm4 = vmor %vm1897_vm0, %vm1898_vm14  ;;  %v1998_v55 = vor.u32 1.1754944e-38, %v1997_v51  ;;  %vm1996_vm13 = vcmp.eq.f32.partialorder %v1995_v0, 8.507059e+37  ;;  %v1904_v31 = vor.u32 1.1754944e-38, %v1903_v40 }
 0xbb2   : > { %v1677_v14 = vmul.f32 %v2849_v38, %v1676_v36  ;;  %v1981_v25 = vpop.f32.mrf.mxu1  ;;  %vm1902_vm14 = vcmp.eq.f32.partialorder %v1901_v28, 8.507059e+37 }
 0xbb3   : > { %v1627_v18 = vpop.xlane.xlu0 %1626  ;;  %v1896_v37 = vadd.f32 %v3918_v27, %v1895_v11 }
 0xbb4   : > { %v2851_v20 = vpop.eup %2850  ;;  %v3934_v30 = vadd.f32 %v1627_v18, %v1623_v13  ;;  %v1678_v58 = vadd.f32 %v2849_v38, %v1677_v14  ;;  %v1881_v13 = vadd.f32 %v3910_v2, %v1880_v44 }
 0xbb5   : > { %v1987_v47 = vmul.f32 %v2851_v20, %v3921_v3  ;;  %vm1992_vm6 = vweird.f32 %v2851_v20  ;;  %v1900_v16 = vsel %vm3982_vm4, %v3918_v27, %v1896_v37  ;;  %v2014_v3 = vsel %vm3938_vm9, %v2013_v59, %v2009_v26 }
 0xbb6   : > { %2852 = vrcp.f32 %v3934_v30  ;;  %v1682_v17 = vsel %vm1681_vm11, %v2849_v38, %v1678_v58  ;;  %vm3969_vm11 = vcmp.eq.f32.partialorder %v1886_v50, 8.507059e+37  ;;  %v1905_v27 = vsel %vm1902_vm14, %v1904_v31, %v1900_v16 }
 0xbb7   : > { %v1988_v61 = vsub.f32 1.0, %v1987_v47  ;;  %v1687_v4 = vsel %vm1684_vm12, %v1686_v57, %v1682_v17  ;;  %vm1993_vm12 = vmor %vm1991_vm7, %vm1992_vm6  ;;  %v1670_v18 = vand.u32 2147483648, %v3934_v30  ;;  %vm1664_vm15 = vweird.f32 %v3934_v30 }
 0xbb8   : > { %v1870_v49 = vpop.f32.mrf.mxu3  ;;  %v3950_v33 = vmul.f32 %v1687_v4, %v1658_v10  ;;  %v1985_v10 = vadd.f32 %v1981_v25, %v3875_v43  ;;  %v1885_v43 = vsel %vm3965_vm8, %v3910_v2, %v1881_v13 }
 0xbb9   : > { %v1989_v41 = vmul.f32 %v2851_v20, %v1988_v61  ;;  %v1875_v29 = vadd.f32 %v1870_v49, %v3881_v46  ;;  %v1890_v14 = vsel %vm3969_vm11, %v1889_v21, %v1885_v43  ;;  %v1668_v46 = vand.u32 2147483647, %v3934_v30 }
 0xbba   : > { %v2017_v2 = vmul.f32 %v2014_v3, %v1985_v10  ;;  %v1671_v60 = vor.u32 1.1754944e-38, %v1670_v18 }
 0xbbb   : > { %v1990_v52 = vadd.f32 %v2851_v20, %v1989_v41  ;;  %v1907_v59 = vmul.f32 %v1890_v14, %v1875_v29  ;;  %vm1669_vm8 = vcmp.eq.f32.partialorder %v1668_v46, 8.507059e+37 }
 0xbbc   : > { %v2853_v56 = vpop.eup %2852 }
 0xbbd   : > { %v1660_v12 = vmul.f32 %v2853_v56, %v3934_v30  ;;  %v1994_v36 = vsel %vm1993_vm12, %v2851_v20, %v1990_v52  ;;  %vm1665_vm9 = vweird.f32 %v2853_v56 }
 0xbbe   : > { %v1999_v32 = vsel %vm1996_vm13, %v1998_v55, %v1994_v36  ;;  %vm1666_vm6 = vmor %vm1664_vm15, %vm1665_vm9 }
 0xbbf   : > { %v1661_v54 = vsub.f32 1.0, %v1660_v12  ;;  %v2016_v50 = vmul.f32 %v1999_v32, %v1984_v42 }
 0xbc0   : > { %v1872_v53 = vpop.f32.mrf.mxu3 }
 0xbc1   : > { %v1876_v15 = vadd.f32 %v1872_v53, %v3899_v63  ;;  %v2800_v44 = vpack.i.bf16 %v2017_v2, %v2016_v50  ;;  %v1662_v20 = vmul.f32 %v2853_v56, %v1661_v54 }
 0xbc3   : > { %v1908_v45 = vmul.f32 %v1905_v27, %v1876_v15  ;;  %2801 = vrot.lane.b32.xlu2 %v2800_v44, %s3126_s11  ;;  %v1663_v47 = vadd.f32 %v2853_v56, %v1662_v20 }
 0xbc5   : > { %v2795_v58 = vpack.i.bf16 %v1908_v45, %v1907_v59  ;;  %v1667_v11 = vsel %vm1666_vm6, %v2853_v56, %v1663_v47 }
 0xbc6   : > { %v1672_v63 = vsel %vm1669_vm8, %v1671_v60, %v1667_v11 }
 0xbc7   : > { %2796 = vrot.lane.b32.xlu0 %v2795_v58, %s3125_s27  ;;  %v1689_v57 = vmul.f32 %v1672_v63, %v3904_v19 }
 0xc17   : > { %v2792_v61 = vpop.permute.xlu1 %2791 }
 0xc18   : > { %v2794_v17 = vunpack.i.h.bf16 %v2792_v61  ;;  %v2793_v62 = vunpack.i.l.bf16 %v2792_v61 }
 0xc1a   : > { %v2043_v30 = vsel %vm819_vm2, %v3950_v33, %v2794_v17  ;;  %v2042_v0 = vsel %vm819_vm2, %v1689_v57, %v2793_v62 }
 0xc1d   : > { %v2802_v49 = vpop.permute.xlu2 %2801 }
 0xc1e   : > { %v2804_v51 = vunpack.i.h.bf16 %v2802_v49  ;;  %v2803_v8 = vunpack.i.l.bf16 %v2802_v49 }
 0xc39   : > { %v2797_v13 = vpop.permute.xlu0 %2796 }
 0xc3a   : > { %v2799_v4 = vunpack.i.h.bf16 %v2797_v13  ;;  %v2798_v25 = vunpack.i.l.bf16 %v2797_v13 }
 0xc3c   : > { %v2044_v37 = vsel %vm840_vm3, %v2042_v0, %v2798_v25  ;;  %v2045_v41 = vsel %vm840_vm3, %v2043_v30, %v2799_v4 }
 0xc3d   : > { %v2046_v19 = vsel %vm1284_vm10, %v2044_v37, %v2803_v8  ;;  %v2047_v6 = vsel %vm1284_vm10, %v2045_v41, %v2804_v51 }
 0xc3e   : > { %v2048_v39 = vpack.c.bf16 %v2047_v6, %v2046_v19 }
 0xc40   : > { %2563 = vmatmul.msk.bf16.vlgmr.msrb.gmra.mxu2 %vm711_vm1, %v2048_v39 }
 0xcc3   : > { %v2061_v28 = vpop.f32.mrf.mxu2 }
 0xcc4   : > { %v2062_v40 = vadd.f32 %v2061_v28, %v3669_v34 }
 0xcc6   : > { %v2066_v33 = vadd.f32 %v2062_v40, %v3385_v22 }
 0xcc8   : > { %v2068_v10 = vsel %vm711_vm1, %v2066_v33, 0.0 }
 0xcc9   : > { %2069 = vadd.xlane.f32.xlu0 %v2068_v10 }
 0xccb   : > { %v2063_v26 = vpop.f32.mrf.mxu2 }
 0xccc   : > { %v2064_v38 = vadd.f32 %v2063_v26, %v3669_v34 }
 0xcce   : > { %v2067_v52 = vadd.f32 %v2064_v38, %v3387_v23 }
 0xcd0   : > { %v2071_v56 = vsel %vm711_vm1, %v2067_v52, 0.0 }
 0xcd1   : > { %2072 = vadd.xlane.f32.xlu1 %v2071_v56 }
 0xd3c   : > { %v2070_v42 = vpop.xlane.xlu0 %2069 }
 0xd3d   : > { %v2074_v43 = vmul.f32 %v2070_v42, %v3677_v5 }
 0xd3f   : > { %v2076_v21 = vsub.f32 %v2066_v33, %v2074_v43 }
 0xd41   : > { %v2078_v55 = vmul.f32 %v2076_v21, %v2076_v21 }
 0xd43   : > { %v2080_v12 = vsel %vm711_vm1, %v2078_v55, 0.0 }
 0xd44   : > { %v2073_v16 = vpop.xlane.xlu1 %2072  ;;  %2081 = vadd.xlane.f32.xlu2 %v2080_v12 }
 0xd45   : > { %v2075_v22 = vmul.f32 %v2073_v16, %v3677_v5 }
 0xd47   : > { %v2077_v36 = vsub.f32 %v2067_v52, %v2075_v22 }
 0xd49   : > { %v2079_v3 = vmul.f32 %v2077_v36, %v2077_v36 }
 0xd4b   : > { %v2083_v34 = vsel %vm711_vm1, %v2079_v3, 0.0 }
 0xd4c   : > { %2084 = vadd.xlane.f32.xlu0 %v2083_v34 }
 0xdb7   : > { %v2082_v23 = vpop.xlane.xlu2 %2081 }
 0xdb8   : > { %v2086_v29 = vmul.f32 %v2082_v23, %v3677_v5 }
 0xdba   : > { %v2088_v31 = vadd.f32 1e-05, %v2086_v29 }
 0xdbc   : > { %2854 = vrsqrt.f32 %v2088_v31  ;;  %vm2096_vm3 = vweird.f32 %v2088_v31 }
 0xdbf   : > { %v2085_v32 = vpop.xlane.xlu0 %2084 }
 0xdc0   : > { %v2087_v2 = vmul.f32 %v2085_v32, %v3677_v5 }
 0xdc2   : > { %v2855_v54 = vpop.eup %2854  ;;  %v2089_v53 = vadd.f32 1e-05, %v2087_v2 }
 0xdc3   : > { %v2091_v50 = vmul.f32 %v2855_v54, %v2088_v31  ;;  %vm2097_vm2 = vweird.f32 %v2855_v54 }
 0xdc4   : > { %2856 = vrsqrt.f32 %v2089_v53  ;;  %vm2098_vm10 = vmor %vm2096_vm3, %vm2097_vm2  ;;  %vm2106_vm0 = vweird.f32 %v2089_v53 }
 0xdc5   : > { %v2092_v14 = vmul.f32 %v2855_v54, %v2091_v50 }
 0xdc7   : > { %v2093_v15 = vmul.f32 0.5, %v2092_v14 }
 0xdc9   : > { %v2094_v27 = vsub.f32 1.5, %v2093_v15 }
 0xdca   : > { %v2857_v18 = vpop.eup %2856 }
 0xdcb   : > { %v2095_v44 = vmul.f32 %v2855_v54, %v2094_v27  ;;  %v2101_v20 = vmul.f32 %v2857_v18, %v2089_v53  ;;  %vm2107_vm11 = vweird.f32 %v2857_v18 }
 0xdcc   : > { %vm2108_vm4 = vmor %vm2106_vm0, %vm2107_vm11 }
 0xdcd   : > { %v2102_v46 = vmul.f32 %v2857_v18, %v2101_v20  ;;  %v2099_v59 = vsel %vm2098_vm10, %v2855_v54, %v2095_v44 }
 0xdce   : > { %v2110_v58 = vmul.f32 %v2099_v59, %v2076_v21 }
 0xdcf   : > { %v2103_v45 = vmul.f32 0.5, %v2102_v46 }
 0xdd0   : > { %v2112_v57 = vmul.f32 %v2110_v58, %v3699_v24 }
 0xdd1   : > { %v2104_v47 = vsub.f32 1.5, %v2103_v45 }
 0xdd2   : > { %v2114_v17 = vadd.f32 %v2112_v57, %v3702_v48 }
 0xdd3   : > { %v2105_v60 = vmul.f32 %v2857_v18, %v2104_v47 }
 0xdd5   : > { %v2109_v11 = vsel %vm2108_vm4, %v2857_v18, %v2105_v60 }
 0xdd6   : > { %v2111_v63 = vmul.f32 %v2109_v11, %v2077_v36 }
 0xdd8   : > { %v2113_v61 = vmul.f32 %v2111_v63, %v3699_v24 }
 0xdda   : > { %v2115_v62 = vadd.f32 %v2113_v61, %v3702_v48 }
 0xddc   : > { %v2116_v49 = vpack.c.bf16 %v2115_v62, %v2114_v17 }
 0xdde   : > { %2564 = vmatmul.msk.bf16.vlgmr.msra.gmra.mxu3 %vm711_vm1, %v2116_v49 }
 0xe61   : > { %v2129_v13 = vpop.f32.mrf.mxu3 }
 0xe62   : > { %v2130_v4 = vadd.f32 %v3730_v7, %v2129_v13 }
 0xe64   : > { %v2134_v0 = vmax.f32 %v2130_v4, 0.0 }
 0xe69   : > { %v2131_v25 = vpop.f32.mrf.mxu3 }
 0xe6a   : > { %v2132_v30 = vadd.f32 %v3730_v7, %v2131_v25 }
 0xe6c   : > { %v2135_v51 = vmax.f32 %v2132_v30, 0.0 }
 0xe6e   : > { %v2136_v8 = vpack.c.bf16 %v2135_v51, %v2134_v0 }
 0xe70   : > { %2565 = vmatmul.msk.bf16.vlgmr.msrb.gmra.mxu0 %vm1438_vm5, %v2136_v8 }
 0xeed   : > { %v2149_v37 = vpop.f32.mrf.mxu0 }
 0xeee   : > { %v2150_v24 = vadd.f32 %v2149_v37, %v3736_v9 }
 0xef0   : > { %v2154_v41 = vadd.f32 %v2150_v24, %v2114_v17 }
 0xef2   : > { %v2156_v48 = vsel %vm711_vm1, %v2154_v41, 0.0 }
 0xef3   : > { %2157 = vadd.xlane.f32.xlu1 %v2156_v48 }
 0xef5   : > { %v2151_v19 = vpop.f32.mrf.mxu0 }
 0xef6   : > { %v2152_v6 = vadd.f32 %v2151_v19, %v3736_v9 }
 0xef8   : > { %v2155_v39 = vadd.f32 %v2152_v6, %v2115_v62 }
 0xefa   : > { %v2159_v28 = vsel %vm711_vm1, %v2155_v39, 0.0 }
 0xefb   : > { %2160 = vadd.xlane.f32.xlu2 %v2159_v28 }
 0xf66   : > { %v2158_v7 = vpop.xlane.xlu1 %2157 }
 0xf67   : > { %v2162_v40 = vmul.f32 %v2158_v7, %v3677_v5 }
 0xf69   : > { %v2164_v33 = vsub.f32 %v2154_v41, %v2162_v40 }
 0xf6b   : > { %v2166_v10 = vmul.f32 %v2164_v33, %v2164_v33 }
 0xf6d   : > { %v2168_v26 = vsel %vm711_vm1, %v2166_v10, 0.0 }
 0xf6e   : > { %v2161_v38 = vpop.xlane.xlu2 %2160  ;;  %2169 = vadd.xlane.f32.xlu0 %v2168_v26 }
 0xf6f   : > { %v2163_v52 = vmul.f32 %v2161_v38, %v3677_v5 }
 0xf71   : > { %v2165_v56 = vsub.f32 %v2155_v39, %v2163_v52 }
 0xf73   : > { %v2167_v42 = vmul.f32 %v2165_v56, %v2165_v56 }
 0xf75   : > { %v2171_v43 = vsel %vm711_vm1, %v2167_v42, 0.0 }
 0xf76   : > { %2172 = vadd.xlane.f32.xlu1 %v2171_v43 }
 0xfe1   : > { %v2170_v9 = vpop.xlane.xlu0 %2169 }
 0xfe2   : > { %v2174_v21 = vmul.f32 %v2170_v9, %v3677_v5 }
 0xfe4   : > { %v2176_v55 = vadd.f32 1e-05, %v2174_v21 }
 0xfe6   : > { %2858 = vrsqrt.f32 %v2176_v55  ;;  %vm2184_vm7 = vweird.f32 %v2176_v55 }
 0xfe9   : > { %v2173_v12 = vpop.xlane.xlu1 %2172 }
 0xfea   : > { %v2175_v16 = vmul.f32 %v2173_v12, %v3677_v5 }
 0xfec   : > { %v2859_v22 = vpop.eup %2858  ;;  %v2177_v36 = vadd.f32 1e-05, %v2175_v16 }
 0xfed   : > { %v2179_v3 = vmul.f32 %v2859_v22, %v2176_v55  ;;  %vm2185_vm5 = vweird.f32 %v2859_v22 }
 0xfee   : > { %2860 = vrsqrt.f32 %v2177_v36  ;;  %vm2186_vm12 = vmor %vm2184_vm7, %vm2185_vm5  ;;  %vm2194_vm14 = vweird.f32 %v2177_v36 }
 0xfef   : > { %v2180_v34 = vmul.f32 %v2859_v22, %v2179_v3 }
 0xff1   : > { %v2181_v23 = vmul.f32 0.5, %v2180_v34 }
 0xff3   : > { %v2182_v29 = vsub.f32 1.5, %v2181_v23 }
 0xff4   : > { %v2861_v31 = vpop.eup %2860 }
 0xff5   : > { %v2183_v32 = vmul.f32 %v2859_v22, %v2182_v29  ;;  %v2189_v2 = vmul.f32 %v2861_v31, %v2177_v36  ;;  %vm2195_vm13 = vweird.f32 %v2861_v31 }
 0xff6   : > { %vm2196_vm9 = vmor %vm2194_vm14, %vm2195_vm13 }
 0xff7   : > { %v2187_v54 = vsel %vm2186_vm12, %v2859_v22, %v2183_v32  ;;  %v2190_v53 = vmul.f32 %v2861_v31, %v2189_v2 }
 0xff8   : > { %v2198_v50 = vmul.f32 %v2187_v54, %v2164_v33 }
 0xff9   : > { %v2191_v14 = vmul.f32 0.5, %v2190_v53 }
 0xffa   : > { %v2200_v15 = vmul.f32 %v2198_v50, %v3749_v1 }
 0xffb   : > { %v2192_v27 = vsub.f32 1.5, %v2191_v14 }
 0xffc   : > { %v2202_v18 = vadd.f32 %v2200_v15, %v3752_v35 }
 0xffd   : > { %v2193_v44 = vmul.f32 %v2861_v31, %v2192_v27 }
 0xffe   : > { %2205 = vst.msk [vmem:[#allocation2 + $0x10] sm:$0xff] %vm711_vm1, %v2202_v18 }
 0xfff   : > { %v2197_v20 = vsel %vm2196_vm9, %v2861_v31, %v2193_v44 }
0x1000   : > { %v2199_v46 = vmul.f32 %v2197_v20, %v2165_v56 }
0x1002   : > { %v2201_v59 = vmul.f32 %v2199_v46, %v3749_v1  ;;  %2209 = sbr.rel (%p2554_p3) target bundleno = 4380 (0x111c), region = 96 }
0x1004   : > { %v2203_v45 = vadd.f32 %v2201_v59, %v3752_v35 }
0x1006   : > { %2206 = vst.msk [vmem:[#allocation2 + $0x18] sm:$0xff] %vm711_vm1, %v2203_v45 }
0x1007   : > { %v2211_v47 = vsel %vm711_vm1, %v2202_v18, 0.0  ;;  %v2214_v58 = vsel %vm711_vm1, %v2203_v45, 0.0  ;;  %v2210_v48 = vld [vmem:[%s4167_s25] sm:$0x3] }
0x1008   : > { %2212 = vadd.xlane.f32.xlu0 %v2211_v47  ;;  %v2255_v7 = vperm.slane %v2210_v48, 0  ;;  %v2258_v10 = vperm.slane %v2210_v48, 1 }
0x1010   : > { %2215 = vadd.xlane.f32.xlu0 %v2214_v58 }
0x107b   : > { %v2213_v60 = vpop.xlane.xlu0 %2212 }
0x107c   : > { %v2217_v11 = vmul.f32 %v2213_v60, %v3677_v5 }
0x107e   : > { %v2219_v63 = vsub.f32 %v2202_v18, %v2217_v11 }
0x1080   : > { %v2221_v57 = vmul.f32 %v2219_v63, %v2219_v63 }
0x1082   : > { %v2223_v1 = vsel %vm711_vm1, %v2221_v57, 0.0 }
0x1083   : > { %2224 = vadd.xlane.f32.xlu1 %v2223_v1  ;;  %v2216_v35 = vpop.xlane.xlu0 %2215 }
0x1084   : > { %v2218_v61 = vmul.f32 %v2216_v35, %v3677_v5 }
0x1086   : > { %v2220_v17 = vsub.f32 %v2203_v45, %v2218_v61 }
0x1088   : > { %v2222_v62 = vmul.f32 %v2220_v17, %v2220_v17 }
0x108a   : > { %v2226_v49 = vsel %vm711_vm1, %v2222_v62, 0.0 }
0x108b   : > { %2227 = vadd.xlane.f32.xlu1 %v2226_v49 }
0x10f6   : > { %v2225_v13 = vpop.xlane.xlu1 %2224 }
0x10f7   : > { %v2229_v4 = vmul.f32 %v2225_v13, %v3677_v5 }
0x10f9   : > { %v2231_v25 = vadd.f32 1e-05, %v2229_v4 }
0x10fb   : > { %2862 = vrsqrt.f32 %v2231_v25  ;;  %vm2239_vm6 = vweird.f32 %v2231_v25 }
0x10fe   : > { %v2228_v30 = vpop.xlane.xlu1 %2227 }
0x10ff   : > { %v2230_v0 = vmul.f32 %v2228_v30, %v3677_v5 }
0x1101   : > { %v2863_v51 = vpop.eup %2862  ;;  %v2232_v8 = vadd.f32 1e-05, %v2230_v0 }
0x1102   : > { %v2234_v37 = vmul.f32 %v2863_v51, %v2231_v25  ;;  %vm2240_vm15 = vweird.f32 %v2863_v51 }
0x1103   : > { %2864 = vrsqrt.f32 %v2232_v8  ;;  %vm2241_vm8 = vmor %vm2239_vm6, %vm2240_vm15  ;;  %vm2249_vm3 = vweird.f32 %v2232_v8 }
0x1104   : > { %v2235_v24 = vmul.f32 %v2863_v51, %v2234_v37 }
0x1106   : > { %v2236_v41 = vmul.f32 0.5, %v2235_v24 }
0x1108   : > { %v2237_v19 = vsub.f32 1.5, %v2236_v41 }
0x1109   : > { %v2865_v6 = vpop.eup %2864 }
0x110a   : > { %v2238_v39 = vmul.f32 %v2863_v51, %v2237_v19  ;;  %v2244_v28 = vmul.f32 %v2865_v6, %v2232_v8  ;;  %vm2250_vm2 = vweird.f32 %v2865_v6 }
0x110b   : > { %vm2251_vm10 = vmor %vm2249_vm3, %vm2250_vm2 }
0x110c   : > { %v2242_v40 = vsel %vm2241_vm8, %v2863_v51, %v2238_v39  ;;  %v2245_v5 = vmul.f32 %v2865_v6, %v2244_v28 }
0x110d   : > { %v2253_v33 = vmul.f32 %v2242_v40, %v2219_v63 }
0x110e   : > { %v2246_v26 = vmul.f32 0.5, %v2245_v5 }
0x110f   : > { %v2256_v38 = vmul.f32 %v2255_v7, %v2253_v33 }
0x1110   : > { %v2247_v52 = vsub.f32 1.5, %v2246_v26 }
0x1111   : > { %v2259_v56 = vadd.f32 %v2258_v10, %v2256_v38 }
0x1112   : > { %v2248_v42 = vmul.f32 %v2865_v6, %v2247_v52 }
0x1113   : > { %2262 = vst.msk [vmem:[#allocation11 + $0x10] sm:$0xff] %vm711_vm1, %v2259_v56 }
0x1114   : > { %v2252_v43 = vsel %vm2251_vm10, %v2865_v6, %v2248_v42 }
0x1115   : > { %v2254_v9 = vmul.f32 %v2252_v43, %v2220_v17 }
0x1117   : > { %v2257_v21 = vmul.f32 %v2255_v7, %v2254_v9 }
0x1119   : > { %v2260_v55 = vadd.f32 %v2258_v10, %v2257_v21 }
0x111b   : > { %2263 = vst.msk [vmem:[#allocation11 + $0x18] sm:$0xff] %vm711_vm1, %v2260_v55 }
0x111c PF: > { %p2638_p4 = scmp.eq.s32.totalorder %s3219_s23, 1  ;;  %s4168_s21 = sld [smem:[#allocation27_spill]] }
0x111d   : > { %s3128_s0 = smov [#allocation11]   ;;  %s3129_s26 = smov 128  }
0x111e   : > { %s2273_s24 = sshll.u32 %s3128_s0, 4  ;;  %s2274_s24 = int_to_ptr.vmem [resolvable:$true] %s2273_s24 }
0x1122   : > { %s2275_s15 = sshll.u32 %s4168_s21, 4  ;;  %s2276_s15 = int_to_ptr.hbm [resolvable:$true] %s2275_s15 }
0x1123   : > { %2613 = dma.vmem_to_hbm [thread:$0]  (%p2638_p4), %s2274_s24, 512, %s2276_s15, [#allocation5], %s3129_s26, %s3129_s26, %s3124_s2  }
0x1124   : > { %3081 = dma.done.wait (%p2638_p4), [#allocation5], 512  }
0x1125   : > { %3083 = vsyncadd (%p2638_p4), [#allocation5], 4294966784 }
0x1126 PF: > { %s24_s22 = sadd.s32 1, %s3106_s22   ;;  %s4169_s9 = sld [smem:[#allocation16_spill]] }
0x1127   : > { %p21_p5 = scmp.ge.s32.totalorder %s24_s22, 4   ;;  %s4170_s19 = sld [smem:[#allocation19_spill]] }
0x1128   : > { %s4171_s20 = sld [smem:[#allocation17_spill]]  ;;  %s4173_s17 = smov %s3090_s18 }
0x1129   : > { %s4172_s21 = sld [smem:[#allocation18_spill]]  ;;  %23 = sbr.rel (!%p21_p5) target bundleno = 14 (0xe), region = 163 }
0x112c   : > { %s4174_s18 = smov %s4169_s9 }
0x112e   :  { %2292 = vsyncpa [#allocation4], 1 }
0x112f   :  { %2294 = vsyncpa [#allocation4 + $0x1], 1 }
0x1130   :  { %2295 = vsyncpa [#allocation7], 1 }
0x1131   :  { %2296 = vsyncpa [#allocation5], 1 }
0x1132   :  { %2298 = vsyncpa [#allocation5 + $0x1], 1 }

</bundles_post_ra>
